<compile_context>
chip_gen: v7x
topology: tpu7x:2x2x1
jax: 0.10.0
libtpu: 0.0.40
codegen_flags: <defaults>
</compile_context>

<pallas_src>
import functools

import numpy as np
import jax
import jax.numpy as jnp
from jax.experimental import pallas as pl
from jax.experimental.pallas import tpu as pltpu

_BN_EPS = 1e-5
_LRELU_SLOPE = 0.01  # torch.nn.functional.leaky_relu default


def _round_up(x, m):
    return ((x + m - 1) // m) * m


def _fused_kernel(n_ref, x_ref, *refs, residual_flags, a_val, b_val):
    """Entire DummyFCModel forward fused into one kernel.

    n_ref:  (1,) int32 in SMEM  -- number of valid rows (scalar prefetch).
    x_ref:  (Np, D0p) f32       -- padded input activations (pad rows/cols zero).
    refs:   w0_hbm, p0, ..., w9_hbm, p9, o_ref, wbuf0..wbuf9, dma_sem
            wi_hbm: (Dip, Dop) bf16 padded weight in HBM (pl.ANY), pad rows/cols 0.
            pi:     (8, Dop) f32 slab: row0=gamma, row1=beta (pad cols zero).
            o_ref:  (Np, DLp) f32 padded output.
            wbufi:  (Dip, Dop) bf16 VMEM scratch (manual DMA destination).
            dma_sem: DMA semaphore array, one slot per layer.
    """
    n_layers = len(residual_flags)
    w_hbm = [refs[2 * i] for i in range(n_layers)]
    p_refs = [refs[2 * i + 1] for i in range(n_layers)]
    o_ref = refs[2 * n_layers]
    w_buf = refs[2 * n_layers + 1: 2 * n_layers + 1 + n_layers]
    dma_sem = refs[2 * n_layers + 1 + n_layers]

    def w_copy(i):
        return pltpu.make_async_copy(w_hbm[i], w_buf[i], dma_sem.at[i])

    # Kick off ALL weight fetches up front; each layer waits only on its own
    # weight, so later layers' DMAs overlap earlier layers' compute.
    for i in range(n_layers):
        w_copy(i).start()

    # Hoisted scalars / masks (guard n >= 1 against an empty batch).
    n_valid = jnp.maximum(n_ref[0], 1)
    inv_n = 1.0 / n_valid.astype(jnp.float32)
    n_pad = x_ref.shape[0]
    row_ids = jax.lax.broadcasted_iota(jnp.int32, (n_pad, 1), 0)
    row_mask = row_ids < n_valid                      # (Np, 1) bool

    # L2 row normalization (padded cols are zero so the norm is exact; all-zero
    # pad rows stay exactly zero).
    x = x_ref[...]
    sum_sq = jnp.sum(x * x, axis=-1, keepdims=True)
    inv_norm = jnp.where(sum_sq > 0.0, jax.lax.rsqrt(sum_sq), 0.0)
    x = x * inv_norm

    for i in range(n_layers):
        w_copy(i).wait()
        gamma = p_refs[i][0:1, :]
        beta = p_refs[i][1:2, :]

        # Linear WITHOUT bias: train-mode BN subtracts the batch mean, which
        # cancels a constant per-column bias exactly.  bf16 MXU, f32 accumulate.
        y = jnp.dot(x.astype(jnp.bfloat16), w_buf[i][...],
                    preferred_element_type=jnp.float32)

        # One-pass batch statistics.  Activation pad rows are exactly zero, so
        # summing over all padded rows equals the sum over the n valid rows.
        mean = jnp.sum(y, axis=0, keepdims=True) * inv_n
        ex2 = jnp.sum(y * y, axis=0, keepdims=True) * inv_n
        var = jnp.maximum(ex2 - mean * mean, 0.0)

        # Folded BN: (y - mean)*rsqrt(var+eps)*gamma + beta == y*s + t.
        s = gamma * jax.lax.rsqrt(var + _BN_EPS)      # (1, Dop)
        t = beta - mean * s                           # (1, Dop)
        y = y * s + t

        if i < n_layers - 1:
            y = jnp.where(y >= 0.0, y, _LRELU_SLOPE * y)
        if residual_flags[i]:                         # true feature dims equal
            y = y + x
        # Re-zero pad rows (the BN shift t made them nonzero) so the next
        # layer's batch statistics stay exact.  Single select per layer.
        x = jnp.where(row_mask, y, 0.0)

    # (b - a) * sigmoid(.) + a  (only column 0 of valid rows is consumed).
    o_ref[...] = (b_val - a_val) * jax.nn.sigmoid(x) + a_val


def make_params(dim, dim_fc_list=None, scale=0.05, seed=0):
    """Deterministic parameter init mirroring the torch module's shapes."""
    if dim_fc_list is None:
        dim_fc_list = [dim ** 2 - 1, 128, 256, 256, 512, 512, 512, 256, 256, 128, 1]
    else:
        assert dim_fc_list[0] == dim ** 2 - 1
    assert scale >= 0
    key = jax.random.PRNGKey(seed)
    params = []
    for i in range(len(dim_fc_list) - 1):
        din, dout = dim_fc_list[i], dim_fc_list[i + 1]
        key, kw, kb = jax.random.split(key, 3)
        bound = 1.0 / np.sqrt(din)            # torch.nn.Linear default init range
        w = jax.random.uniform(kw, (din, dout), jnp.float32, -bound, bound)
        bias = jax.random.uniform(kb, (dout,), jnp.float32, -bound, bound)
        gamma = jnp.ones((dout,), jnp.float32)   # BatchNorm1d weight init
        beta = jnp.zeros((dout,), jnp.float32)   # BatchNorm1d bias init
        params.append((w, bias, gamma, beta))
    a = float(np.sqrt(1.0 / (2 * dim * (dim - 1))) * (1 - scale))
    b = float(np.sqrt((dim - 1) / (2.0 * dim)) * (1 + scale))
    return params, a, b


def prepare_params(params):
    """One-time padding/packing/casting of the parameters for the fused kernel.

    The Linear bias is intentionally NOT packed: train-mode BatchNorm cancels it
    exactly, so the kernel never needs it.
    """
    prepared = []
    residual_flags = []
    for (w, bias, gamma, beta) in params:
        del bias  # cancelled exactly by train-mode BatchNorm
        din, dout = w.shape
        dip, dop = _round_up(din, 128), _round_up(dout, 128)
        wp = (jnp.zeros((dip, dop), jnp.float32)
              .at[:din, :dout].set(w)
              .astype(jnp.bfloat16))
        pslab = (jnp.zeros((8, dop), jnp.float32)
                 .at[0, :dout].set(gamma)
                 .at[1, :dout].set(beta))
        prepared.append((wp, pslab, din, dout, dip, dop))
        residual_flags.append(din == dout)
    return prepared, tuple(residual_flags)


def dummy_fc_forward_pallas(prepared, residual_flags, x, a, b):
    shape = x.shape
    x2 = x.reshape(-1, shape[-1]).astype(jnp.float32)
    n, d0 = x2.shape
    assert n >= 1, "empty batch"
    assert d0 == prepared[0][2], "input feature dim must match first layer"
    n_pad = _round_up(n, 8)
    d0_pad = prepared[0][4]
    xp = jnp.zeros((n_pad, d0_pad), jnp.float32).at[:n, :d0].set(x2)
    n_arr = jnp.full((1,), n, jnp.int32)     # SMEM scalar (no recompile per n)

    dop_last = prepared[-1][5]
    kernel = functools.partial(
        _fused_kernel,
        residual_flags=residual_flags,
        a_val=float(a),
        b_val=float(b),
    )

    in_specs = [pl.BlockSpec((n_pad, d0_pad), lambda i, n_s: (0, 0))]
    flat_params = []
    scratch_shapes = []
    weight_bytes = 0
    slab_bytes = 0
    total_macs = 0
    max_dop = 0
    for (wp, pslab, din, dout, dip, dop) in prepared:
        in_specs.append(pl.BlockSpec(memory_space=pl.ANY))       # weight stays in HBM
        in_specs.append(pl.BlockSpec((8, dop), lambda i, n_s: (0, 0)))
        flat_params += [wp, pslab]
        scratch_shapes.append(pltpu.VMEM((dip, dop), jnp.bfloat16))
        weight_bytes += dip * dop * 2
        slab_bytes += 8 * dop * 4
        total_macs += dip * dop
        max_dop = max(max_dop, dop)
    scratch_shapes.append(pltpu.SemaphoreType.DMA((len(prepared),)))

    # Explicit, generation-aware VMEM budget: weights (single-buffered scratch),
    # double-buffered slabs / in / out, live f32 activations, plus headroom.
    act_bytes = 8 * n_pad * max_dop * 4
    io_bytes = 2 * (n_pad * d0_pad + n_pad * dop_last) * 4
    needed = weight_bytes + 2 * slab_bytes + act_bytes + io_bytes + (8 << 20)
    try:
        info = pltpu.get_tpu_info()
        vmem_cap = int(getattr(info, "vmem_capacity_bytes", 64 << 20))
    except Exception:
        vmem_cap = 64 << 20   # conservative fallback (v7x per-core physical VMEM)
    vmem_limit = int(min(max(needed, 32 << 20), int(0.9 * vmem_cap)))

    cost = pl.CostEstimate(
        flops=int(2 * n_pad * total_macs),
        transcendentals=int(n_pad * (1 + dop_last) + len(prepared) * max_dop),
        bytes_accessed=int(weight_bytes + slab_bytes
                           + n_pad * d0_pad * 4 + n_pad * dop_last * 4),
    )

    grid_spec = pltpu.PrefetchScalarGridSpec(
        num_scalar_prefetch=1,
        grid=(1,),
        in_specs=in_specs,
        out_specs=pl.BlockSpec((n_pad, dop_last), lambda i, n_s: (0, 0)),
        scratch_shapes=scratch_shapes,
    )

    out_padded = pl.pallas_call(
        kernel,
        grid_spec=grid_spec,
        out_shape=jax.ShapeDtypeStruct((n_pad, dop_last), jnp.float32),
        compiler_params=pltpu.CompilerParams(
            dimension_semantics=("arbitrary",),
            vmem_limit_bytes=vmem_limit),
        cost_estimate=cost,
    )(n_arr, xp, *flat_params)

    out = out_padded[:n, 0]
    if len(shape) == 1:
        return out[0]
    return out.reshape(shape[:-1])


def reference_forward(params, x, a, b):
    """Pure-JAX f32 reference matching the torch forward (train-mode BN, with bias)."""
    shape = x.shape
    h = x.reshape(-1, shape[-1]).astype(jnp.float32)
    h = h / jnp.linalg.norm(h, axis=-1, keepdims=True)
    n_layers = len(params)
    for i, (w, bias, gamma, beta) in enumerate(params):
        y = h @ w + bias
        mean = jnp.mean(y, axis=0, keepdims=True)
        var = jnp.mean((y - mean) ** 2, axis=0, keepdims=True)
        y = (y - mean) / jnp.sqrt(var + _BN_EPS) * gamma + beta
        if i < n_layers - 1:
            y = jnp.where(y >= 0.0, y, _LRELU_SLOPE * y)
        h = y + h if h.shape[-1] == y.shape[-1] else y
    out = (b - a) * jax.nn.sigmoid(h[:, 0]) + a
    if len(shape) == 1:
        return out[0]
    return out.reshape(shape[:-1])


if __name__ == "__main__":
    dim = 4                               # -> input feature dim = dim**2 - 1 = 15
    params, a, b = make_params(dim, scale=0.05, seed=0)
    prepared, residual_flags = prepare_params(params)

    key = jax.random.PRNGKey(0)
    x = jax.random.normal(key, (2, 8, dim ** 2 - 1), dtype=jnp.float32)

    out = dummy_fc_forward_pallas(prepared, residual_flags, x, a, b)
    out = jax.block_until_ready(out)
    assert out.shape == (2, 8)

    ref = reference_forward(params, x, a, b)
    # Tolerance accounts for the bf16-operand MXU path (f32 accumulation) vs the
    # pure-f32 reference; output range is [a, b] ~ [0.19, 0.64].  Note the
    # reference keeps the Linear bias, numerically confirming that train-mode
    # BatchNorm cancels it.
    np.testing.assert_allclose(np.asarray(out), np.asarray(ref),
                               rtol=2e-2, atol=2e-2)
    print("KERNEL_OK")
</pallas_src>

<mosaic_0001>
module attributes {stable_mosaic.version = 11 : i64} {
  func.func @_fused_kernel(%arg0: i32, %arg1: memref<1xi32, #tpu.memory_space<smem>>, %arg2: memref<16x128xf32, #tpu.memory_space<vmem>>, %arg3: memref<128x128xbf16, #tpu.memory_space<any>>, %arg4: memref<8x128xf32, #tpu.memory_space<vmem>>, %arg5: memref<128x256xbf16, #tpu.memory_space<any>>, %arg6: memref<8x256xf32, #tpu.memory_space<vmem>>, %arg7: memref<256x256xbf16, #tpu.memory_space<any>>, %arg8: memref<8x256xf32, #tpu.memory_space<vmem>>, %arg9: memref<256x512xbf16, #tpu.memory_space<any>>, %arg10: memref<8x512xf32, #tpu.memory_space<vmem>>, %arg11: memref<512x512xbf16, #tpu.memory_space<any>>, %arg12: memref<8x512xf32, #tpu.memory_space<vmem>>, %arg13: memref<512x512xbf16, #tpu.memory_space<any>>, %arg14: memref<8x512xf32, #tpu.memory_space<vmem>>, %arg15: memref<512x256xbf16, #tpu.memory_space<any>>, %arg16: memref<8x256xf32, #tpu.memory_space<vmem>>, %arg17: memref<256x256xbf16, #tpu.memory_space<any>>, %arg18: memref<8x256xf32, #tpu.memory_space<vmem>>, %arg19: memref<256x128xbf16, #tpu.memory_space<any>>, %arg20: memref<8x128xf32, #tpu.memory_space<vmem>>, %arg21: memref<128x128xbf16, #tpu.memory_space<any>>, %arg22: memref<8x128xf32, #tpu.memory_space<vmem>>, %arg23: memref<16x128xf32, #tpu.memory_space<vmem>>, %arg24: memref<128x128xbf16, #tpu.memory_space<vmem>>, %arg25: memref<128x256xbf16, #tpu.memory_space<vmem>>, %arg26: memref<256x256xbf16, #tpu.memory_space<vmem>>, %arg27: memref<256x512xbf16, #tpu.memory_space<vmem>>, %arg28: memref<512x512xbf16, #tpu.memory_space<vmem>>, %arg29: memref<512x512xbf16, #tpu.memory_space<vmem>>, %arg30: memref<512x256xbf16, #tpu.memory_space<vmem>>, %arg31: memref<256x256xbf16, #tpu.memory_space<vmem>>, %arg32: memref<256x128xbf16, #tpu.memory_space<vmem>>, %arg33: memref<128x128xbf16, #tpu.memory_space<vmem>>, %arg34: memref<10x!tpu.dma_semaphore, #tpu.memory_space<semaphore_mem>>) attributes {dimension_semantics = [#tpu.dimension_semantics<arbitrary>], iteration_bounds = array<i64: 1>, scalar_prefetch = 1 : i64, scratch_operands = 11 : i64, tpu.core_type = #tpu.core_type<tc>, window_params = [{pipeline_mode = #tpu.pipeline_mode<synchronous>, transform_indices = @transform_0, window_bounds = array<i64: 16, 128>}, {}, {pipeline_mode = #tpu.pipeline_mode<synchronous>, transform_indices = @transform_2, window_bounds = array<i64: 8, 128>}, {}, {pipeline_mode = #tpu.pipeline_mode<synchronous>, transform_indices = @transform_4, window_bounds = array<i64: 8, 256>}, {}, {pipeline_mode = #tpu.pipeline_mode<synchronous>, transform_indices = @transform_6, window_bounds = array<i64: 8, 256>}, {}, {pipeline_mode = #tpu.pipeline_mode<synchronous>, transform_indices = @transform_8, window_bounds = array<i64: 8, 512>}, {}, {pipeline_mode = #tpu.pipeline_mode<synchronous>, transform_indices = @transform_10, window_bounds = array<i64: 8, 512>}, {}, {pipeline_mode = #tpu.pipeline_mode<synchronous>, transform_indices = @transform_12, window_bounds = array<i64: 8, 512>}, {}, {pipeline_mode = #tpu.pipeline_mode<synchronous>, transform_indices = @transform_14, window_bounds = array<i64: 8, 256>}, {}, {pipeline_mode = #tpu.pipeline_mode<synchronous>, transform_indices = @transform_16, window_bounds = array<i64: 8, 256>}, {}, {pipeline_mode = #tpu.pipeline_mode<synchronous>, transform_indices = @transform_18, window_bounds = array<i64: 8, 128>}, {}, {pipeline_mode = #tpu.pipeline_mode<synchronous>, transform_indices = @transform_20, window_bounds = array<i64: 8, 128>}, {pipeline_mode = #tpu.pipeline_mode<synchronous>, transform_indices = @transform_21, window_bounds = array<i64: 16, 128>}]} {
    %c0_i32 = arith.constant 0 : i32
    %0 = tpu.memref_slice %arg34[%c0_i32] : memref<10x!tpu.dma_semaphore, #tpu.memory_space<semaphore_mem>> -> memref<1x!tpu.dma_semaphore, #tpu.memory_space<semaphore_mem>>
    %1 = tpu.memref_squeeze %0 : memref<1x!tpu.dma_semaphore, #tpu.memory_space<semaphore_mem>> -> memref<!tpu.dma_semaphore, #tpu.memory_space<semaphore_mem>>
    tpu.enqueue_dma source(%arg3 : memref<128x128xbf16, #tpu.memory_space<any>>) target(%arg24 : memref<128x128xbf16, #tpu.memory_space<vmem>>) target_semaphore(%1 : memref<!tpu.dma_semaphore, #tpu.memory_space<semaphore_mem>>)
    %c1_i32 = arith.constant 1 : i32
    %2 = tpu.memref_slice %arg34[%c1_i32] : memref<10x!tpu.dma_semaphore, #tpu.memory_space<semaphore_mem>> -> memref<1x!tpu.dma_semaphore, #tpu.memory_space<semaphore_mem>>
    %3 = tpu.memref_squeeze %2 : memref<1x!tpu.dma_semaphore, #tpu.memory_space<semaphore_mem>> -> memref<!tpu.dma_semaphore, #tpu.memory_space<semaphore_mem>>
    tpu.enqueue_dma source(%arg5 : memref<128x256xbf16, #tpu.memory_space<any>>) target(%arg25 : memref<128x256xbf16, #tpu.memory_space<vmem>>) target_semaphore(%3 : memref<!tpu.dma_semaphore, #tpu.memory_space<semaphore_mem>>)
    %c2_i32 = arith.constant 2 : i32
    %4 = tpu.memref_slice %arg34[%c2_i32] : memref<10x!tpu.dma_semaphore, #tpu.memory_space<semaphore_mem>> -> memref<1x!tpu.dma_semaphore, #tpu.memory_space<semaphore_mem>>
    %5 = tpu.memref_squeeze %4 : memref<1x!tpu.dma_semaphore, #tpu.memory_space<semaphore_mem>> -> memref<!tpu.dma_semaphore, #tpu.memory_space<semaphore_mem>>
    tpu.enqueue_dma source(%arg7 : memref<256x256xbf16, #tpu.memory_space<any>>) target(%arg26 : memref<256x256xbf16, #tpu.memory_space<vmem>>) target_semaphore(%5 : memref<!tpu.dma_semaphore, #tpu.memory_space<semaphore_mem>>)
    %c3_i32 = arith.constant 3 : i32
    %6 = tpu.memref_slice %arg34[%c3_i32] : memref<10x!tpu.dma_semaphore, #tpu.memory_space<semaphore_mem>> -> memref<1x!tpu.dma_semaphore, #tpu.memory_space<semaphore_mem>>
    %7 = tpu.memref_squeeze %6 : memref<1x!tpu.dma_semaphore, #tpu.memory_space<semaphore_mem>> -> memref<!tpu.dma_semaphore, #tpu.memory_space<semaphore_mem>>
    tpu.enqueue_dma source(%arg9 : memref<256x512xbf16, #tpu.memory_space<any>>) target(%arg27 : memref<256x512xbf16, #tpu.memory_space<vmem>>) target_semaphore(%7 : memref<!tpu.dma_semaphore, #tpu.memory_space<semaphore_mem>>)
    %c4_i32 = arith.constant 4 : i32
    %8 = tpu.memref_slice %arg34[%c4_i32] : memref<10x!tpu.dma_semaphore, #tpu.memory_space<semaphore_mem>> -> memref<1x!tpu.dma_semaphore, #tpu.memory_space<semaphore_mem>>
    %9 = tpu.memref_squeeze %8 : memref<1x!tpu.dma_semaphore, #tpu.memory_space<semaphore_mem>> -> memref<!tpu.dma_semaphore, #tpu.memory_space<semaphore_mem>>
    tpu.enqueue_dma source(%arg11 : memref<512x512xbf16, #tpu.memory_space<any>>) target(%arg28 : memref<512x512xbf16, #tpu.memory_space<vmem>>) target_semaphore(%9 : memref<!tpu.dma_semaphore, #tpu.memory_space<semaphore_mem>>)
    %c5_i32 = arith.constant 5 : i32
    %10 = tpu.memref_slice %arg34[%c5_i32] : memref<10x!tpu.dma_semaphore, #tpu.memory_space<semaphore_mem>> -> memref<1x!tpu.dma_semaphore, #tpu.memory_space<semaphore_mem>>
    %11 = tpu.memref_squeeze %10 : memref<1x!tpu.dma_semaphore, #tpu.memory_space<semaphore_mem>> -> memref<!tpu.dma_semaphore, #tpu.memory_space<semaphore_mem>>
    tpu.enqueue_dma source(%arg13 : memref<512x512xbf16, #tpu.memory_space<any>>) target(%arg29 : memref<512x512xbf16, #tpu.memory_space<vmem>>) target_semaphore(%11 : memref<!tpu.dma_semaphore, #tpu.memory_space<semaphore_mem>>)
    %c6_i32 = arith.constant 6 : i32
    %12 = tpu.memref_slice %arg34[%c6_i32] : memref<10x!tpu.dma_semaphore, #tpu.memory_space<semaphore_mem>> -> memref<1x!tpu.dma_semaphore, #tpu.memory_space<semaphore_mem>>
    %13 = tpu.memref_squeeze %12 : memref<1x!tpu.dma_semaphore, #tpu.memory_space<semaphore_mem>> -> memref<!tpu.dma_semaphore, #tpu.memory_space<semaphore_mem>>
    tpu.enqueue_dma source(%arg15 : memref<512x256xbf16, #tpu.memory_space<any>>) target(%arg30 : memref<512x256xbf16, #tpu.memory_space<vmem>>) target_semaphore(%13 : memref<!tpu.dma_semaphore, #tpu.memory_space<semaphore_mem>>)
    %c7_i32 = arith.constant 7 : i32
    %14 = tpu.memref_slice %arg34[%c7_i32] : memref<10x!tpu.dma_semaphore, #tpu.memory_space<semaphore_mem>> -> memref<1x!tpu.dma_semaphore, #tpu.memory_space<semaphore_mem>>
    %15 = tpu.memref_squeeze %14 : memref<1x!tpu.dma_semaphore, #tpu.memory_space<semaphore_mem>> -> memref<!tpu.dma_semaphore, #tpu.memory_space<semaphore_mem>>
    tpu.enqueue_dma source(%arg17 : memref<256x256xbf16, #tpu.memory_space<any>>) target(%arg31 : memref<256x256xbf16, #tpu.memory_space<vmem>>) target_semaphore(%15 : memref<!tpu.dma_semaphore, #tpu.memory_space<semaphore_mem>>)
    %c8_i32 = arith.constant 8 : i32
    %16 = tpu.memref_slice %arg34[%c8_i32] : memref<10x!tpu.dma_semaphore, #tpu.memory_space<semaphore_mem>> -> memref<1x!tpu.dma_semaphore, #tpu.memory_space<semaphore_mem>>
    %17 = tpu.memref_squeeze %16 : memref<1x!tpu.dma_semaphore, #tpu.memory_space<semaphore_mem>> -> memref<!tpu.dma_semaphore, #tpu.memory_space<semaphore_mem>>
    tpu.enqueue_dma source(%arg19 : memref<256x128xbf16, #tpu.memory_space<any>>) target(%arg32 : memref<256x128xbf16, #tpu.memory_space<vmem>>) target_semaphore(%17 : memref<!tpu.dma_semaphore, #tpu.memory_space<semaphore_mem>>)
    %c9_i32 = arith.constant 9 : i32
    %18 = tpu.memref_slice %arg34[%c9_i32] : memref<10x!tpu.dma_semaphore, #tpu.memory_space<semaphore_mem>> -> memref<1x!tpu.dma_semaphore, #tpu.memory_space<semaphore_mem>>
    %19 = tpu.memref_squeeze %18 : memref<1x!tpu.dma_semaphore, #tpu.memory_space<semaphore_mem>> -> memref<!tpu.dma_semaphore, #tpu.memory_space<semaphore_mem>>
    tpu.enqueue_dma source(%arg21 : memref<128x128xbf16, #tpu.memory_space<any>>) target(%arg33 : memref<128x128xbf16, #tpu.memory_space<vmem>>) target_semaphore(%19 : memref<!tpu.dma_semaphore, #tpu.memory_space<semaphore_mem>>)
    %c0 = arith.constant 0 : index
    %20 = memref.load %arg1[%c0] : memref<1xi32, #tpu.memory_space<smem>>
    %c1_i32_0 = arith.constant 1 : i32
    %21 = arith.maxsi %20, %c1_i32_0 : i32
    %22 = arith.sitofp %21 : i32 to f32
    %cst = arith.constant 1.000000e+00 : f32
    %23 = arith.divf %cst, %22 : f32
    %24 = tpu.iota {dimensions = array<i32: 0>} : vector<16x1xi32>
    %25 = vector.broadcast %21 : i32 to vector<16x1xi32>
    %26 = arith.cmpi slt, %24, %25 : vector<16x1xi32>
    %c0_1 = arith.constant 0 : index
    %c0_2 = arith.constant 0 : index
    %27 = vector.load %arg2[%c0_1, %c0_2] : memref<16x128xf32, #tpu.memory_space<vmem>>, vector<16x128xf32>
    %28 = arith.mulf %27, %27 : vector<16x128xf32>
    %cst_3 = arith.constant dense<0.000000e+00> : vector<16xf32>
    %29 = vector.multi_reduction <add>, %28, %cst_3 [1] : vector<16x128xf32> to vector<16xf32>
    %30 = vector.shape_cast %29 : vector<16xf32> to vector<16x1xf32>
    %cst_4 = arith.constant 0.000000e+00 : f32
    %31 = vector.broadcast %cst_4 : f32 to vector<16x1xf32>
    %32 = arith.cmpf ogt, %30, %31 : vector<16x1xf32>
    %33 = math.rsqrt %30 : vector<16x1xf32>
    %cst_5 = arith.constant 0.000000e+00 : f32
    %34 = vector.broadcast %cst_5 : f32 to vector<16x1xf32>
    %35 = arith.select %32, %33, %34 : vector<16x1xi1>, vector<16x1xf32>
    %36 = vector.broadcast %35 : vector<16x1xf32> to vector<16x128xf32>
    %37 = arith.mulf %27, %36 : vector<16x128xf32>
    %c0_i32_6 = arith.constant 0 : i32
    %38 = tpu.memref_slice %arg34[%c0_i32_6] : memref<10x!tpu.dma_semaphore, #tpu.memory_space<semaphore_mem>> -> memref<1x!tpu.dma_semaphore, #tpu.memory_space<semaphore_mem>>
    %39 = tpu.memref_squeeze %38 : memref<1x!tpu.dma_semaphore, #tpu.memory_space<semaphore_mem>> -> memref<!tpu.dma_semaphore, #tpu.memory_space<semaphore_mem>>
    tpu.wait_dma2 semaphore(%39 : memref<!tpu.dma_semaphore, #tpu.memory_space<semaphore_mem>>) src(%arg3 : memref<128x128xbf16, #tpu.memory_space<any>>) dst(%arg24 : memref<128x128xbf16, #tpu.memory_space<vmem>>)
    %c0_7 = arith.constant 0 : index
    %c0_8 = arith.constant 0 : index
    %40 = vector.load %arg4[%c0_7, %c0_8] : memref<8x128xf32, #tpu.memory_space<vmem>>, vector<1x128xf32>
    %c1 = arith.constant 1 : index
    %c0_9 = arith.constant 0 : index
    %41 = vector.load %arg4[%c1, %c0_9] : memref<8x128xf32, #tpu.memory_space<vmem>>, vector<1x128xf32>
    %42 = arith.truncf %37 : vector<16x128xf32> to vector<16x128xbf16>
    %c0_10 = arith.constant 0 : index
    %c0_11 = arith.constant 0 : index
    %43 = vector.load %arg24[%c0_10, %c0_11] : memref<128x128xbf16, #tpu.memory_space<vmem>>, vector<128x128xbf16>
    %cst_12 = arith.constant dense<0.000000e+00> : vector<16x128xf32>
    %44 = tpu.matmul %42, %43, %cst_12 {dimension_numbers = #tpu.dot_dimension_numbers<[1], [0], [0], [1], [0, 0, 1, 1], [], []>} : vector<16x128xbf16>, vector<128x128xbf16>, vector<16x128xf32> -> vector<16x128xf32>
    %cst_13 = arith.constant dense<0.000000e+00> : vector<128xf32>
    %45 = vector.multi_reduction <add>, %44, %cst_13 [0] : vector<16x128xf32> to vector<128xf32>
    %46 = vector.shape_cast %45 : vector<128xf32> to vector<1x128xf32>
    %47 = vector.broadcast %23 : f32 to vector<1x128xf32>
    %48 = arith.mulf %46, %47 : vector<1x128xf32>
    %49 = arith.mulf %44, %44 : vector<16x128xf32>
    %cst_14 = arith.constant dense<0.000000e+00> : vector<128xf32>
    %50 = vector.multi_reduction <add>, %49, %cst_14 [0] : vector<16x128xf32> to vector<128xf32>
    %51 = vector.shape_cast %50 : vector<128xf32> to vector<1x128xf32>
    %52 = vector.broadcast %23 : f32 to vector<1x128xf32>
    %53 = arith.mulf %51, %52 : vector<1x128xf32>
    %54 = arith.mulf %48, %48 : vector<1x128xf32>
    %55 = arith.subf %53, %54 : vector<1x128xf32>
    %cst_15 = arith.constant 0.000000e+00 : f32
    %56 = vector.broadcast %cst_15 : f32 to vector<1x128xf32>
    %57 = arith.maximumf %55, %56 : vector<1x128xf32>
    %cst_16 = arith.constant 9.99999974E-6 : f32
    %58 = vector.broadcast %cst_16 : f32 to vector<1x128xf32>
    %59 = arith.addf %57, %58 : vector<1x128xf32>
    %60 = math.rsqrt %59 : vector<1x128xf32>
    %61 = arith.mulf %40, %60 : vector<1x128xf32>
    %62 = arith.mulf %48, %61 : vector<1x128xf32>
    %63 = arith.subf %41, %62 : vector<1x128xf32>
    %64 = vector.broadcast %61 : vector<1x128xf32> to vector<16x128xf32>
    %65 = arith.mulf %44, %64 : vector<16x128xf32>
    %66 = vector.broadcast %63 : vector<1x128xf32> to vector<16x128xf32>
    %67 = arith.addf %65, %66 : vector<16x128xf32>
    %cst_17 = arith.constant 0.000000e+00 : f32
    %68 = vector.broadcast %cst_17 : f32 to vector<16x128xf32>
    %69 = arith.cmpf oge, %67, %68 : vector<16x128xf32>
    %cst_18 = arith.constant 0.00999999977 : f32
    %70 = vector.broadcast %cst_18 : f32 to vector<16x128xf32>
    %71 = arith.mulf %70, %67 : vector<16x128xf32>
    %72 = arith.select %69, %67, %71 : vector<16x128xi1>, vector<16x128xf32>
    %cst_19 = arith.constant 0.000000e+00 : f32
    %73 = vector.shape_cast %26 : vector<16x1xi1> to vector<16x1xi1>
    %74 = vector.broadcast %73 : vector<16x1xi1> to vector<16x128xi1>
    %75 = vector.broadcast %cst_19 : f32 to vector<16x128xf32>
    %76 = arith.select %74, %72, %75 : vector<16x128xi1>, vector<16x128xf32>
    %c1_i32_20 = arith.constant 1 : i32
    %77 = tpu.memref_slice %arg34[%c1_i32_20] : memref<10x!tpu.dma_semaphore, #tpu.memory_space<semaphore_mem>> -> memref<1x!tpu.dma_semaphore, #tpu.memory_space<semaphore_mem>>
    %78 = tpu.memref_squeeze %77 : memref<1x!tpu.dma_semaphore, #tpu.memory_space<semaphore_mem>> -> memref<!tpu.dma_semaphore, #tpu.memory_space<semaphore_mem>>
    tpu.wait_dma2 semaphore(%78 : memref<!tpu.dma_semaphore, #tpu.memory_space<semaphore_mem>>) src(%arg5 : memref<128x256xbf16, #tpu.memory_space<any>>) dst(%arg25 : memref<128x256xbf16, #tpu.memory_space<vmem>>)
    %c0_21 = arith.constant 0 : index
    %c0_22 = arith.constant 0 : index
    %79 = vector.load %arg6[%c0_21, %c0_22] : memref<8x256xf32, #tpu.memory_space<vmem>>, vector<1x256xf32>
    %c1_23 = arith.constant 1 : index
    %c0_24 = arith.constant 0 : index
    %80 = vector.load %arg6[%c1_23, %c0_24] : memref<8x256xf32, #tpu.memory_space<vmem>>, vector<1x256xf32>
    %81 = arith.truncf %76 : vector<16x128xf32> to vector<16x128xbf16>
    %c0_25 = arith.constant 0 : index
    %c0_26 = arith.constant 0 : index
    %82 = vector.load %arg25[%c0_25, %c0_26] : memref<128x256xbf16, #tpu.memory_space<vmem>>, vector<128x256xbf16>
    %cst_27 = arith.constant dense<0.000000e+00> : vector<16x256xf32>
    %83 = tpu.matmul %81, %82, %cst_27 {dimension_numbers = #tpu.dot_dimension_numbers<[1], [0], [0], [1], [0, 0, 1, 1], [], []>} : vector<16x128xbf16>, vector<128x256xbf16>, vector<16x256xf32> -> vector<16x256xf32>
    %cst_28 = arith.constant dense<0.000000e+00> : vector<256xf32>
    %84 = vector.multi_reduction <add>, %83, %cst_28 [0] : vector<16x256xf32> to vector<256xf32>
    %85 = vector.shape_cast %84 : vector<256xf32> to vector<1x256xf32>
    %86 = vector.broadcast %23 : f32 to vector<1x256xf32>
    %87 = arith.mulf %85, %86 : vector<1x256xf32>
    %88 = arith.mulf %83, %83 : vector<16x256xf32>
    %cst_29 = arith.constant dense<0.000000e+00> : vector<256xf32>
    %89 = vector.multi_reduction <add>, %88, %cst_29 [0] : vector<16x256xf32> to vector<256xf32>
    %90 = vector.shape_cast %89 : vector<256xf32> to vector<1x256xf32>
    %91 = vector.broadcast %23 : f32 to vector<1x256xf32>
    %92 = arith.mulf %90, %91 : vector<1x256xf32>
    %93 = arith.mulf %87, %87 : vector<1x256xf32>
    %94 = arith.subf %92, %93 : vector<1x256xf32>
    %cst_30 = arith.constant 0.000000e+00 : f32
    %95 = vector.broadcast %cst_30 : f32 to vector<1x256xf32>
    %96 = arith.maximumf %94, %95 : vector<1x256xf32>
    %cst_31 = arith.constant 9.99999974E-6 : f32
    %97 = vector.broadcast %cst_31 : f32 to vector<1x256xf32>
    %98 = arith.addf %96, %97 : vector<1x256xf32>
    %99 = math.rsqrt %98 : vector<1x256xf32>
    %100 = arith.mulf %79, %99 : vector<1x256xf32>
    %101 = arith.mulf %87, %100 : vector<1x256xf32>
    %102 = arith.subf %80, %101 : vector<1x256xf32>
    %103 = vector.broadcast %100 : vector<1x256xf32> to vector<16x256xf32>
    %104 = arith.mulf %83, %103 : vector<16x256xf32>
    %105 = vector.broadcast %102 : vector<1x256xf32> to vector<16x256xf32>
    %106 = arith.addf %104, %105 : vector<16x256xf32>
    %cst_32 = arith.constant 0.000000e+00 : f32
    %107 = vector.broadcast %cst_32 : f32 to vector<16x256xf32>
    %108 = arith.cmpf oge, %106, %107 : vector<16x256xf32>
    %cst_33 = arith.constant 0.00999999977 : f32
    %109 = vector.broadcast %cst_33 : f32 to vector<16x256xf32>
    %110 = arith.mulf %109, %106 : vector<16x256xf32>
    %111 = arith.select %108, %106, %110 : vector<16x256xi1>, vector<16x256xf32>
    %cst_34 = arith.constant 0.000000e+00 : f32
    %112 = vector.shape_cast %26 : vector<16x1xi1> to vector<16x1xi1>
    %113 = vector.broadcast %112 : vector<16x1xi1> to vector<16x256xi1>
    %114 = vector.broadcast %cst_34 : f32 to vector<16x256xf32>
    %115 = arith.select %113, %111, %114 : vector<16x256xi1>, vector<16x256xf32>
    %c2_i32_35 = arith.constant 2 : i32
    %116 = tpu.memref_slice %arg34[%c2_i32_35] : memref<10x!tpu.dma_semaphore, #tpu.memory_space<semaphore_mem>> -> memref<1x!tpu.dma_semaphore, #tpu.memory_space<semaphore_mem>>
    %117 = tpu.memref_squeeze %116 : memref<1x!tpu.dma_semaphore, #tpu.memory_space<semaphore_mem>> -> memref<!tpu.dma_semaphore, #tpu.memory_space<semaphore_mem>>
    tpu.wait_dma2 semaphore(%117 : memref<!tpu.dma_semaphore, #tpu.memory_space<semaphore_mem>>) src(%arg7 : memref<256x256xbf16, #tpu.memory_space<any>>) dst(%arg26 : memref<256x256xbf16, #tpu.memory_space<vmem>>)
    %c0_36 = arith.constant 0 : index
    %c0_37 = arith.constant 0 : index
    %118 = vector.load %arg8[%c0_36, %c0_37] : memref<8x256xf32, #tpu.memory_space<vmem>>, vector<1x256xf32>
    %c1_38 = arith.constant 1 : index
    %c0_39 = arith.constant 0 : index
    %119 = vector.load %arg8[%c1_38, %c0_39] : memref<8x256xf32, #tpu.memory_space<vmem>>, vector<1x256xf32>
    %120 = arith.truncf %115 : vector<16x256xf32> to vector<16x256xbf16>
    %c0_40 = arith.constant 0 : index
    %c0_41 = arith.constant 0 : index
    %121 = vector.load %arg26[%c0_40, %c0_41] : memref<256x256xbf16, #tpu.memory_space<vmem>>, vector<256x256xbf16>
    %cst_42 = arith.constant dense<0.000000e+00> : vector<16x256xf32>
    %122 = tpu.matmul %120, %121, %cst_42 {dimension_numbers = #tpu.dot_dimension_numbers<[1], [0], [0], [1], [0, 0, 1, 1], [], []>} : vector<16x256xbf16>, vector<256x256xbf16>, vector<16x256xf32> -> vector<16x256xf32>
    %cst_43 = arith.constant dense<0.000000e+00> : vector<256xf32>
    %123 = vector.multi_reduction <add>, %122, %cst_43 [0] : vector<16x256xf32> to vector<256xf32>
    %124 = vector.shape_cast %123 : vector<256xf32> to vector<1x256xf32>
    %125 = vector.broadcast %23 : f32 to vector<1x256xf32>
    %126 = arith.mulf %124, %125 : vector<1x256xf32>
    %127 = arith.mulf %122, %122 : vector<16x256xf32>
    %cst_44 = arith.constant dense<0.000000e+00> : vector<256xf32>
    %128 = vector.multi_reduction <add>, %127, %cst_44 [0] : vector<16x256xf32> to vector<256xf32>
    %129 = vector.shape_cast %128 : vector<256xf32> to vector<1x256xf32>
    %130 = vector.broadcast %23 : f32 to vector<1x256xf32>
    %131 = arith.mulf %129, %130 : vector<1x256xf32>
    %132 = arith.mulf %126, %126 : vector<1x256xf32>
    %133 = arith.subf %131, %132 : vector<1x256xf32>
    %cst_45 = arith.constant 0.000000e+00 : f32
    %134 = vector.broadcast %cst_45 : f32 to vector<1x256xf32>
    %135 = arith.maximumf %133, %134 : vector<1x256xf32>
    %cst_46 = arith.constant 9.99999974E-6 : f32
    %136 = vector.broadcast %cst_46 : f32 to vector<1x256xf32>
    %137 = arith.addf %135, %136 : vector<1x256xf32>
    %138 = math.rsqrt %137 : vector<1x256xf32>
    %139 = arith.mulf %118, %138 : vector<1x256xf32>
    %140 = arith.mulf %126, %139 : vector<1x256xf32>
    %141 = arith.subf %119, %140 : vector<1x256xf32>
    %142 = vector.broadcast %139 : vector<1x256xf32> to vector<16x256xf32>
    %143 = arith.mulf %122, %142 : vector<16x256xf32>
    %144 = vector.broadcast %141 : vector<1x256xf32> to vector<16x256xf32>
    %145 = arith.addf %143, %144 : vector<16x256xf32>
    %cst_47 = arith.constant 0.000000e+00 : f32
    %146 = vector.broadcast %cst_47 : f32 to vector<16x256xf32>
    %147 = arith.cmpf oge, %145, %146 : vector<16x256xf32>
    %cst_48 = arith.constant 0.00999999977 : f32
    %148 = vector.broadcast %cst_48 : f32 to vector<16x256xf32>
    %149 = arith.mulf %148, %145 : vector<16x256xf32>
    %150 = arith.select %147, %145, %149 : vector<16x256xi1>, vector<16x256xf32>
    %151 = arith.addf %150, %115 : vector<16x256xf32>
    %cst_49 = arith.constant 0.000000e+00 : f32
    %152 = vector.shape_cast %26 : vector<16x1xi1> to vector<16x1xi1>
    %153 = vector.broadcast %152 : vector<16x1xi1> to vector<16x256xi1>
    %154 = vector.broadcast %cst_49 : f32 to vector<16x256xf32>
    %155 = arith.select %153, %151, %154 : vector<16x256xi1>, vector<16x256xf32>
    %c3_i32_50 = arith.constant 3 : i32
    %156 = tpu.memref_slice %arg34[%c3_i32_50] : memref<10x!tpu.dma_semaphore, #tpu.memory_space<semaphore_mem>> -> memref<1x!tpu.dma_semaphore, #tpu.memory_space<semaphore_mem>>
    %157 = tpu.memref_squeeze %156 : memref<1x!tpu.dma_semaphore, #tpu.memory_space<semaphore_mem>> -> memref<!tpu.dma_semaphore, #tpu.memory_space<semaphore_mem>>
    tpu.wait_dma2 semaphore(%157 : memref<!tpu.dma_semaphore, #tpu.memory_space<semaphore_mem>>) src(%arg9 : memref<256x512xbf16, #tpu.memory_space<any>>) dst(%arg27 : memref<256x512xbf16, #tpu.memory_space<vmem>>)
    %c0_51 = arith.constant 0 : index
    %c0_52 = arith.constant 0 : index
    %158 = vector.load %arg10[%c0_51, %c0_52] : memref<8x512xf32, #tpu.memory_space<vmem>>, vector<1x512xf32>
    %c1_53 = arith.constant 1 : index
    %c0_54 = arith.constant 0 : index
    %159 = vector.load %arg10[%c1_53, %c0_54] : memref<8x512xf32, #tpu.memory_space<vmem>>, vector<1x512xf32>
    %160 = arith.truncf %155 : vector<16x256xf32> to vector<16x256xbf16>
    %c0_55 = arith.constant 0 : index
    %c0_56 = arith.constant 0 : index
    %161 = vector.load %arg27[%c0_55, %c0_56] : memref<256x512xbf16, #tpu.memory_space<vmem>>, vector<256x512xbf16>
    %cst_57 = arith.constant dense<0.000000e+00> : vector<16x512xf32>
    %162 = tpu.matmul %160, %161, %cst_57 {dimension_numbers = #tpu.dot_dimension_numbers<[1], [0], [0], [1], [0, 0, 1, 1], [], []>} : vector<16x256xbf16>, vector<256x512xbf16>, vector<16x512xf32> -> vector<16x512xf32>
    %cst_58 = arith.constant dense<0.000000e+00> : vector<512xf32>
    %163 = vector.multi_reduction <add>, %162, %cst_58 [0] : vector<16x512xf32> to vector<512xf32>
    %164 = vector.shape_cast %163 : vector<512xf32> to vector<1x512xf32>
    %165 = vector.broadcast %23 : f32 to vector<1x512xf32>
    %166 = arith.mulf %164, %165 : vector<1x512xf32>
    %167 = arith.mulf %162, %162 : vector<16x512xf32>
    %cst_59 = arith.constant dense<0.000000e+00> : vector<512xf32>
    %168 = vector.multi_reduction <add>, %167, %cst_59 [0] : vector<16x512xf32> to vector<512xf32>
    %169 = vector.shape_cast %168 : vector<512xf32> to vector<1x512xf32>
    %170 = vector.broadcast %23 : f32 to vector<1x512xf32>
    %171 = arith.mulf %169, %170 : vector<1x512xf32>
    %172 = arith.mulf %166, %166 : vector<1x512xf32>
    %173 = arith.subf %171, %172 : vector<1x512xf32>
    %cst_60 = arith.constant 0.000000e+00 : f32
    %174 = vector.broadcast %cst_60 : f32 to vector<1x512xf32>
    %175 = arith.maximumf %173, %174 : vector<1x512xf32>
    %cst_61 = arith.constant 9.99999974E-6 : f32
    %176 = vector.broadcast %cst_61 : f32 to vector<1x512xf32>
    %177 = arith.addf %175, %176 : vector<1x512xf32>
    %178 = math.rsqrt %177 : vector<1x512xf32>
    %179 = arith.mulf %158, %178 : vector<1x512xf32>
    %180 = arith.mulf %166, %179 : vector<1x512xf32>
    %181 = arith.subf %159, %180 : vector<1x512xf32>
    %182 = vector.broadcast %179 : vector<1x512xf32> to vector<16x512xf32>
    %183 = arith.mulf %162, %182 : vector<16x512xf32>
    %184 = vector.broadcast %181 : vector<1x512xf32> to vector<16x512xf32>
    %185 = arith.addf %183, %184 : vector<16x512xf32>
    %cst_62 = arith.constant 0.000000e+00 : f32
    %186 = vector.broadcast %cst_62 : f32 to vector<16x512xf32>
    %187 = arith.cmpf oge, %185, %186 : vector<16x512xf32>
    %cst_63 = arith.constant 0.00999999977 : f32
    %188 = vector.broadcast %cst_63 : f32 to vector<16x512xf32>
    %189 = arith.mulf %188, %185 : vector<16x512xf32>
    %190 = arith.select %187, %185, %189 : vector<16x512xi1>, vector<16x512xf32>
    %cst_64 = arith.constant 0.000000e+00 : f32
    %191 = vector.shape_cast %26 : vector<16x1xi1> to vector<16x1xi1>
    %192 = vector.broadcast %191 : vector<16x1xi1> to vector<16x512xi1>
    %193 = vector.broadcast %cst_64 : f32 to vector<16x512xf32>
    %194 = arith.select %192, %190, %193 : vector<16x512xi1>, vector<16x512xf32>
    %c4_i32_65 = arith.constant 4 : i32
    %195 = tpu.memref_slice %arg34[%c4_i32_65] : memref<10x!tpu.dma_semaphore, #tpu.memory_space<semaphore_mem>> -> memref<1x!tpu.dma_semaphore, #tpu.memory_space<semaphore_mem>>
    %196 = tpu.memref_squeeze %195 : memref<1x!tpu.dma_semaphore, #tpu.memory_space<semaphore_mem>> -> memref<!tpu.dma_semaphore, #tpu.memory_space<semaphore_mem>>
    tpu.wait_dma2 semaphore(%196 : memref<!tpu.dma_semaphore, #tpu.memory_space<semaphore_mem>>) src(%arg11 : memref<512x512xbf16, #tpu.memory_space<any>>) dst(%arg28 : memref<512x512xbf16, #tpu.memory_space<vmem>>)
    %c0_66 = arith.constant 0 : index
    %c0_67 = arith.constant 0 : index
    %197 = vector.load %arg12[%c0_66, %c0_67] : memref<8x512xf32, #tpu.memory_space<vmem>>, vector<1x512xf32>
    %c1_68 = arith.constant 1 : index
    %c0_69 = arith.constant 0 : index
    %198 = vector.load %arg12[%c1_68, %c0_69] : memref<8x512xf32, #tpu.memory_space<vmem>>, vector<1x512xf32>
    %199 = arith.truncf %194 : vector<16x512xf32> to vector<16x512xbf16>
    %c0_70 = arith.constant 0 : index
    %c0_71 = arith.constant 0 : index
    %200 = vector.load %arg28[%c0_70, %c0_71] : memref<512x512xbf16, #tpu.memory_space<vmem>>, vector<512x512xbf16>
    %cst_72 = arith.constant dense<0.000000e+00> : vector<16x512xf32>
    %201 = tpu.matmul %199, %200, %cst_72 {dimension_numbers = #tpu.dot_dimension_numbers<[1], [0], [0], [1], [0, 0, 1, 1], [], []>} : vector<16x512xbf16>, vector<512x512xbf16>, vector<16x512xf32> -> vector<16x512xf32>
    %cst_73 = arith.constant dense<0.000000e+00> : vector<512xf32>
    %202 = vector.multi_reduction <add>, %201, %cst_73 [0] : vector<16x512xf32> to vector<512xf32>
    %203 = vector.shape_cast %202 : vector<512xf32> to vector<1x512xf32>
    %204 = vector.broadcast %23 : f32 to vector<1x512xf32>
    %205 = arith.mulf %203, %204 : vector<1x512xf32>
    %206 = arith.mulf %201, %201 : vector<16x512xf32>
    %cst_74 = arith.constant dense<0.000000e+00> : vector<512xf32>
    %207 = vector.multi_reduction <add>, %206, %cst_74 [0] : vector<16x512xf32> to vector<512xf32>
    %208 = vector.shape_cast %207 : vector<512xf32> to vector<1x512xf32>
    %209 = vector.broadcast %23 : f32 to vector<1x512xf32>
    %210 = arith.mulf %208, %209 : vector<1x512xf32>
    %211 = arith.mulf %205, %205 : vector<1x512xf32>
    %212 = arith.subf %210, %211 : vector<1x512xf32>
    %cst_75 = arith.constant 0.000000e+00 : f32
    %213 = vector.broadcast %cst_75 : f32 to vector<1x512xf32>
    %214 = arith.maximumf %212, %213 : vector<1x512xf32>
    %cst_76 = arith.constant 9.99999974E-6 : f32
    %215 = vector.broadcast %cst_76 : f32 to vector<1x512xf32>
    %216 = arith.addf %214, %215 : vector<1x512xf32>
    %217 = math.rsqrt %216 : vector<1x512xf32>
    %218 = arith.mulf %197, %217 : vector<1x512xf32>
    %219 = arith.mulf %205, %218 : vector<1x512xf32>
    %220 = arith.subf %198, %219 : vector<1x512xf32>
    %221 = vector.broadcast %218 : vector<1x512xf32> to vector<16x512xf32>
    %222 = arith.mulf %201, %221 : vector<16x512xf32>
    %223 = vector.broadcast %220 : vector<1x512xf32> to vector<16x512xf32>
    %224 = arith.addf %222, %223 : vector<16x512xf32>
    %cst_77 = arith.constant 0.000000e+00 : f32
    %225 = vector.broadcast %cst_77 : f32 to vector<16x512xf32>
    %226 = arith.cmpf oge, %224, %225 : vector<16x512xf32>
    %cst_78 = arith.constant 0.00999999977 : f32
    %227 = vector.broadcast %cst_78 : f32 to vector<16x512xf32>
    %228 = arith.mulf %227, %224 : vector<16x512xf32>
    %229 = arith.select %226, %224, %228 : vector<16x512xi1>, vector<16x512xf32>
    %230 = arith.addf %229, %194 : vector<16x512xf32>
    %cst_79 = arith.constant 0.000000e+00 : f32
    %231 = vector.shape_cast %26 : vector<16x1xi1> to vector<16x1xi1>
    %232 = vector.broadcast %231 : vector<16x1xi1> to vector<16x512xi1>
    %233 = vector.broadcast %cst_79 : f32 to vector<16x512xf32>
    %234 = arith.select %232, %230, %233 : vector<16x512xi1>, vector<16x512xf32>
    %c5_i32_80 = arith.constant 5 : i32
    %235 = tpu.memref_slice %arg34[%c5_i32_80] : memref<10x!tpu.dma_semaphore, #tpu.memory_space<semaphore_mem>> -> memref<1x!tpu.dma_semaphore, #tpu.memory_space<semaphore_mem>>
    %236 = tpu.memref_squeeze %235 : memref<1x!tpu.dma_semaphore, #tpu.memory_space<semaphore_mem>> -> memref<!tpu.dma_semaphore, #tpu.memory_space<semaphore_mem>>
    tpu.wait_dma2 semaphore(%236 : memref<!tpu.dma_semaphore, #tpu.memory_space<semaphore_mem>>) src(%arg13 : memref<512x512xbf16, #tpu.memory_space<any>>) dst(%arg29 : memref<512x512xbf16, #tpu.memory_space<vmem>>)
    %c0_81 = arith.constant 0 : index
    %c0_82 = arith.constant 0 : index
    %237 = vector.load %arg14[%c0_81, %c0_82] : memref<8x512xf32, #tpu.memory_space<vmem>>, vector<1x512xf32>
    %c1_83 = arith.constant 1 : index
    %c0_84 = arith.constant 0 : index
    %238 = vector.load %arg14[%c1_83, %c0_84] : memref<8x512xf32, #tpu.memory_space<vmem>>, vector<1x512xf32>
    %239 = arith.truncf %234 : vector<16x512xf32> to vector<16x512xbf16>
    %c0_85 = arith.constant 0 : index
    %c0_86 = arith.constant 0 : index
    %240 = vector.load %arg29[%c0_85, %c0_86] : memref<512x512xbf16, #tpu.memory_space<vmem>>, vector<512x512xbf16>
    %cst_87 = arith.constant dense<0.000000e+00> : vector<16x512xf32>
    %241 = tpu.matmul %239, %240, %cst_87 {dimension_numbers = #tpu.dot_dimension_numbers<[1], [0], [0], [1], [0, 0, 1, 1], [], []>} : vector<16x512xbf16>, vector<512x512xbf16>, vector<16x512xf32> -> vector<16x512xf32>
    %cst_88 = arith.constant dense<0.000000e+00> : vector<512xf32>
    %242 = vector.multi_reduction <add>, %241, %cst_88 [0] : vector<16x512xf32> to vector<512xf32>
    %243 = vector.shape_cast %242 : vector<512xf32> to vector<1x512xf32>
    %244 = vector.broadcast %23 : f32 to vector<1x512xf32>
    %245 = arith.mulf %243, %244 : vector<1x512xf32>
    %246 = arith.mulf %241, %241 : vector<16x512xf32>
    %cst_89 = arith.constant dense<0.000000e+00> : vector<512xf32>
    %247 = vector.multi_reduction <add>, %246, %cst_89 [0] : vector<16x512xf32> to vector<512xf32>
    %248 = vector.shape_cast %247 : vector<512xf32> to vector<1x512xf32>
    %249 = vector.broadcast %23 : f32 to vector<1x512xf32>
    %250 = arith.mulf %248, %249 : vector<1x512xf32>
    %251 = arith.mulf %245, %245 : vector<1x512xf32>
    %252 = arith.subf %250, %251 : vector<1x512xf32>
    %cst_90 = arith.constant 0.000000e+00 : f32
    %253 = vector.broadcast %cst_90 : f32 to vector<1x512xf32>
    %254 = arith.maximumf %252, %253 : vector<1x512xf32>
    %cst_91 = arith.constant 9.99999974E-6 : f32
    %255 = vector.broadcast %cst_91 : f32 to vector<1x512xf32>
    %256 = arith.addf %254, %255 : vector<1x512xf32>
    %257 = math.rsqrt %256 : vector<1x512xf32>
    %258 = arith.mulf %237, %257 : vector<1x512xf32>
    %259 = arith.mulf %245, %258 : vector<1x512xf32>
    %260 = arith.subf %238, %259 : vector<1x512xf32>
    %261 = vector.broadcast %258 : vector<1x512xf32> to vector<16x512xf32>
    %262 = arith.mulf %241, %261 : vector<16x512xf32>
    %263 = vector.broadcast %260 : vector<1x512xf32> to vector<16x512xf32>
    %264 = arith.addf %262, %263 : vector<16x512xf32>
    %cst_92 = arith.constant 0.000000e+00 : f32
    %265 = vector.broadcast %cst_92 : f32 to vector<16x512xf32>
    %266 = arith.cmpf oge, %264, %265 : vector<16x512xf32>
    %cst_93 = arith.constant 0.00999999977 : f32
    %267 = vector.broadcast %cst_93 : f32 to vector<16x512xf32>
    %268 = arith.mulf %267, %264 : vector<16x512xf32>
    %269 = arith.select %266, %264, %268 : vector<16x512xi1>, vector<16x512xf32>
    %270 = arith.addf %269, %234 : vector<16x512xf32>
    %cst_94 = arith.constant 0.000000e+00 : f32
    %271 = vector.shape_cast %26 : vector<16x1xi1> to vector<16x1xi1>
    %272 = vector.broadcast %271 : vector<16x1xi1> to vector<16x512xi1>
    %273 = vector.broadcast %cst_94 : f32 to vector<16x512xf32>
    %274 = arith.select %272, %270, %273 : vector<16x512xi1>, vector<16x512xf32>
    %c6_i32_95 = arith.constant 6 : i32
    %275 = tpu.memref_slice %arg34[%c6_i32_95] : memref<10x!tpu.dma_semaphore, #tpu.memory_space<semaphore_mem>> -> memref<1x!tpu.dma_semaphore, #tpu.memory_space<semaphore_mem>>
    %276 = tpu.memref_squeeze %275 : memref<1x!tpu.dma_semaphore, #tpu.memory_space<semaphore_mem>> -> memref<!tpu.dma_semaphore, #tpu.memory_space<semaphore_mem>>
    tpu.wait_dma2 semaphore(%276 : memref<!tpu.dma_semaphore, #tpu.memory_space<semaphore_mem>>) src(%arg15 : memref<512x256xbf16, #tpu.memory_space<any>>) dst(%arg30 : memref<512x256xbf16, #tpu.memory_space<vmem>>)
    %c0_96 = arith.constant 0 : index
    %c0_97 = arith.constant 0 : index
    %277 = vector.load %arg16[%c0_96, %c0_97] : memref<8x256xf32, #tpu.memory_space<vmem>>, vector<1x256xf32>
    %c1_98 = arith.constant 1 : index
    %c0_99 = arith.constant 0 : index
    %278 = vector.load %arg16[%c1_98, %c0_99] : memref<8x256xf32, #tpu.memory_space<vmem>>, vector<1x256xf32>
    %279 = arith.truncf %274 : vector<16x512xf32> to vector<16x512xbf16>
    %c0_100 = arith.constant 0 : index
    %c0_101 = arith.constant 0 : index
    %280 = vector.load %arg30[%c0_100, %c0_101] : memref<512x256xbf16, #tpu.memory_space<vmem>>, vector<512x256xbf16>
    %cst_102 = arith.constant dense<0.000000e+00> : vector<16x256xf32>
    %281 = tpu.matmul %279, %280, %cst_102 {dimension_numbers = #tpu.dot_dimension_numbers<[1], [0], [0], [1], [0, 0, 1, 1], [], []>} : vector<16x512xbf16>, vector<512x256xbf16>, vector<16x256xf32> -> vector<16x256xf32>
    %cst_103 = arith.constant dense<0.000000e+00> : vector<256xf32>
    %282 = vector.multi_reduction <add>, %281, %cst_103 [0] : vector<16x256xf32> to vector<256xf32>
    %283 = vector.shape_cast %282 : vector<256xf32> to vector<1x256xf32>
    %284 = vector.broadcast %23 : f32 to vector<1x256xf32>
    %285 = arith.mulf %283, %284 : vector<1x256xf32>
    %286 = arith.mulf %281, %281 : vector<16x256xf32>
    %cst_104 = arith.constant dense<0.000000e+00> : vector<256xf32>
    %287 = vector.multi_reduction <add>, %286, %cst_104 [0] : vector<16x256xf32> to vector<256xf32>
    %288 = vector.shape_cast %287 : vector<256xf32> to vector<1x256xf32>
    %289 = vector.broadcast %23 : f32 to vector<1x256xf32>
    %290 = arith.mulf %288, %289 : vector<1x256xf32>
    %291 = arith.mulf %285, %285 : vector<1x256xf32>
    %292 = arith.subf %290, %291 : vector<1x256xf32>
    %cst_105 = arith.constant 0.000000e+00 : f32
    %293 = vector.broadcast %cst_105 : f32 to vector<1x256xf32>
    %294 = arith.maximumf %292, %293 : vector<1x256xf32>
    %cst_106 = arith.constant 9.99999974E-6 : f32
    %295 = vector.broadcast %cst_106 : f32 to vector<1x256xf32>
    %296 = arith.addf %294, %295 : vector<1x256xf32>
    %297 = math.rsqrt %296 : vector<1x256xf32>
    %298 = arith.mulf %277, %297 : vector<1x256xf32>
    %299 = arith.mulf %285, %298 : vector<1x256xf32>
    %300 = arith.subf %278, %299 : vector<1x256xf32>
    %301 = vector.broadcast %298 : vector<1x256xf32> to vector<16x256xf32>
    %302 = arith.mulf %281, %301 : vector<16x256xf32>
    %303 = vector.broadcast %300 : vector<1x256xf32> to vector<16x256xf32>
    %304 = arith.addf %302, %303 : vector<16x256xf32>
    %cst_107 = arith.constant 0.000000e+00 : f32
    %305 = vector.broadcast %cst_107 : f32 to vector<16x256xf32>
    %306 = arith.cmpf oge, %304, %305 : vector<16x256xf32>
    %cst_108 = arith.constant 0.00999999977 : f32
    %307 = vector.broadcast %cst_108 : f32 to vector<16x256xf32>
    %308 = arith.mulf %307, %304 : vector<16x256xf32>
    %309 = arith.select %306, %304, %308 : vector<16x256xi1>, vector<16x256xf32>
    %cst_109 = arith.constant 0.000000e+00 : f32
    %310 = vector.shape_cast %26 : vector<16x1xi1> to vector<16x1xi1>
    %311 = vector.broadcast %310 : vector<16x1xi1> to vector<16x256xi1>
    %312 = vector.broadcast %cst_109 : f32 to vector<16x256xf32>
    %313 = arith.select %311, %309, %312 : vector<16x256xi1>, vector<16x256xf32>
    %c7_i32_110 = arith.constant 7 : i32
    %314 = tpu.memref_slice %arg34[%c7_i32_110] : memref<10x!tpu.dma_semaphore, #tpu.memory_space<semaphore_mem>> -> memref<1x!tpu.dma_semaphore, #tpu.memory_space<semaphore_mem>>
    %315 = tpu.memref_squeeze %314 : memref<1x!tpu.dma_semaphore, #tpu.memory_space<semaphore_mem>> -> memref<!tpu.dma_semaphore, #tpu.memory_space<semaphore_mem>>
    tpu.wait_dma2 semaphore(%315 : memref<!tpu.dma_semaphore, #tpu.memory_space<semaphore_mem>>) src(%arg17 : memref<256x256xbf16, #tpu.memory_space<any>>) dst(%arg31 : memref<256x256xbf16, #tpu.memory_space<vmem>>)
    %c0_111 = arith.constant 0 : index
    %c0_112 = arith.constant 0 : index
    %316 = vector.load %arg18[%c0_111, %c0_112] : memref<8x256xf32, #tpu.memory_space<vmem>>, vector<1x256xf32>
    %c1_113 = arith.constant 1 : index
    %c0_114 = arith.constant 0 : index
    %317 = vector.load %arg18[%c1_113, %c0_114] : memref<8x256xf32, #tpu.memory_space<vmem>>, vector<1x256xf32>
    %318 = arith.truncf %313 : vector<16x256xf32> to vector<16x256xbf16>
    %c0_115 = arith.constant 0 : index
    %c0_116 = arith.constant 0 : index
    %319 = vector.load %arg31[%c0_115, %c0_116] : memref<256x256xbf16, #tpu.memory_space<vmem>>, vector<256x256xbf16>
    %cst_117 = arith.constant dense<0.000000e+00> : vector<16x256xf32>
    %320 = tpu.matmul %318, %319, %cst_117 {dimension_numbers = #tpu.dot_dimension_numbers<[1], [0], [0], [1], [0, 0, 1, 1], [], []>} : vector<16x256xbf16>, vector<256x256xbf16>, vector<16x256xf32> -> vector<16x256xf32>
    %cst_118 = arith.constant dense<0.000000e+00> : vector<256xf32>
    %321 = vector.multi_reduction <add>, %320, %cst_118 [0] : vector<16x256xf32> to vector<256xf32>
    %322 = vector.shape_cast %321 : vector<256xf32> to vector<1x256xf32>
    %323 = vector.broadcast %23 : f32 to vector<1x256xf32>
    %324 = arith.mulf %322, %323 : vector<1x256xf32>
    %325 = arith.mulf %320, %320 : vector<16x256xf32>
    %cst_119 = arith.constant dense<0.000000e+00> : vector<256xf32>
    %326 = vector.multi_reduction <add>, %325, %cst_119 [0] : vector<16x256xf32> to vector<256xf32>
    %327 = vector.shape_cast %326 : vector<256xf32> to vector<1x256xf32>
    %328 = vector.broadcast %23 : f32 to vector<1x256xf32>
    %329 = arith.mulf %327, %328 : vector<1x256xf32>
    %330 = arith.mulf %324, %324 : vector<1x256xf32>
    %331 = arith.subf %329, %330 : vector<1x256xf32>
    %cst_120 = arith.constant 0.000000e+00 : f32
    %332 = vector.broadcast %cst_120 : f32 to vector<1x256xf32>
    %333 = arith.maximumf %331, %332 : vector<1x256xf32>
    %cst_121 = arith.constant 9.99999974E-6 : f32
    %334 = vector.broadcast %cst_121 : f32 to vector<1x256xf32>
    %335 = arith.addf %333, %334 : vector<1x256xf32>
    %336 = math.rsqrt %335 : vector<1x256xf32>
    %337 = arith.mulf %316, %336 : vector<1x256xf32>
    %338 = arith.mulf %324, %337 : vector<1x256xf32>
    %339 = arith.subf %317, %338 : vector<1x256xf32>
    %340 = vector.broadcast %337 : vector<1x256xf32> to vector<16x256xf32>
    %341 = arith.mulf %320, %340 : vector<16x256xf32>
    %342 = vector.broadcast %339 : vector<1x256xf32> to vector<16x256xf32>
    %343 = arith.addf %341, %342 : vector<16x256xf32>
    %cst_122 = arith.constant 0.000000e+00 : f32
    %344 = vector.broadcast %cst_122 : f32 to vector<16x256xf32>
    %345 = arith.cmpf oge, %343, %344 : vector<16x256xf32>
    %cst_123 = arith.constant 0.00999999977 : f32
    %346 = vector.broadcast %cst_123 : f32 to vector<16x256xf32>
    %347 = arith.mulf %346, %343 : vector<16x256xf32>
    %348 = arith.select %345, %343, %347 : vector<16x256xi1>, vector<16x256xf32>
    %349 = arith.addf %348, %313 : vector<16x256xf32>
    %cst_124 = arith.constant 0.000000e+00 : f32
    %350 = vector.shape_cast %26 : vector<16x1xi1> to vector<16x1xi1>
    %351 = vector.broadcast %350 : vector<16x1xi1> to vector<16x256xi1>
    %352 = vector.broadcast %cst_124 : f32 to vector<16x256xf32>
    %353 = arith.select %351, %349, %352 : vector<16x256xi1>, vector<16x256xf32>
    %c8_i32_125 = arith.constant 8 : i32
    %354 = tpu.memref_slice %arg34[%c8_i32_125] : memref<10x!tpu.dma_semaphore, #tpu.memory_space<semaphore_mem>> -> memref<1x!tpu.dma_semaphore, #tpu.memory_space<semaphore_mem>>
    %355 = tpu.memref_squeeze %354 : memref<1x!tpu.dma_semaphore, #tpu.memory_space<semaphore_mem>> -> memref<!tpu.dma_semaphore, #tpu.memory_space<semaphore_mem>>
    tpu.wait_dma2 semaphore(%355 : memref<!tpu.dma_semaphore, #tpu.memory_space<semaphore_mem>>) src(%arg19 : memref<256x128xbf16, #tpu.memory_space<any>>) dst(%arg32 : memref<256x128xbf16, #tpu.memory_space<vmem>>)
    %c0_126 = arith.constant 0 : index
    %c0_127 = arith.constant 0 : index
    %356 = vector.load %arg20[%c0_126, %c0_127] : memref<8x128xf32, #tpu.memory_space<vmem>>, vector<1x128xf32>
    %c1_128 = arith.constant 1 : index
    %c0_129 = arith.constant 0 : index
    %357 = vector.load %arg20[%c1_128, %c0_129] : memref<8x128xf32, #tpu.memory_space<vmem>>, vector<1x128xf32>
    %358 = arith.truncf %353 : vector<16x256xf32> to vector<16x256xbf16>
    %c0_130 = arith.constant 0 : index
    %c0_131 = arith.constant 0 : index
    %359 = vector.load %arg32[%c0_130, %c0_131] : memref<256x128xbf16, #tpu.memory_space<vmem>>, vector<256x128xbf16>
    %cst_132 = arith.constant dense<0.000000e+00> : vector<16x128xf32>
    %360 = tpu.matmul %358, %359, %cst_132 {dimension_numbers = #tpu.dot_dimension_numbers<[1], [0], [0], [1], [0, 0, 1, 1], [], []>} : vector<16x256xbf16>, vector<256x128xbf16>, vector<16x128xf32> -> vector<16x128xf32>
    %cst_133 = arith.constant dense<0.000000e+00> : vector<128xf32>
    %361 = vector.multi_reduction <add>, %360, %cst_133 [0] : vector<16x128xf32> to vector<128xf32>
    %362 = vector.shape_cast %361 : vector<128xf32> to vector<1x128xf32>
    %363 = vector.broadcast %23 : f32 to vector<1x128xf32>
    %364 = arith.mulf %362, %363 : vector<1x128xf32>
    %365 = arith.mulf %360, %360 : vector<16x128xf32>
    %cst_134 = arith.constant dense<0.000000e+00> : vector<128xf32>
    %366 = vector.multi_reduction <add>, %365, %cst_134 [0] : vector<16x128xf32> to vector<128xf32>
    %367 = vector.shape_cast %366 : vector<128xf32> to vector<1x128xf32>
    %368 = vector.broadcast %23 : f32 to vector<1x128xf32>
    %369 = arith.mulf %367, %368 : vector<1x128xf32>
    %370 = arith.mulf %364, %364 : vector<1x128xf32>
    %371 = arith.subf %369, %370 : vector<1x128xf32>
    %cst_135 = arith.constant 0.000000e+00 : f32
    %372 = vector.broadcast %cst_135 : f32 to vector<1x128xf32>
    %373 = arith.maximumf %371, %372 : vector<1x128xf32>
    %cst_136 = arith.constant 9.99999974E-6 : f32
    %374 = vector.broadcast %cst_136 : f32 to vector<1x128xf32>
    %375 = arith.addf %373, %374 : vector<1x128xf32>
    %376 = math.rsqrt %375 : vector<1x128xf32>
    %377 = arith.mulf %356, %376 : vector<1x128xf32>
    %378 = arith.mulf %364, %377 : vector<1x128xf32>
    %379 = arith.subf %357, %378 : vector<1x128xf32>
    %380 = vector.broadcast %377 : vector<1x128xf32> to vector<16x128xf32>
    %381 = arith.mulf %360, %380 : vector<16x128xf32>
    %382 = vector.broadcast %379 : vector<1x128xf32> to vector<16x128xf32>
    %383 = arith.addf %381, %382 : vector<16x128xf32>
    %cst_137 = arith.constant 0.000000e+00 : f32
    %384 = vector.broadcast %cst_137 : f32 to vector<16x128xf32>
    %385 = arith.cmpf oge, %383, %384 : vector<16x128xf32>
    %cst_138 = arith.constant 0.00999999977 : f32
    %386 = vector.broadcast %cst_138 : f32 to vector<16x128xf32>
    %387 = arith.mulf %386, %383 : vector<16x128xf32>
    %388 = arith.select %385, %383, %387 : vector<16x128xi1>, vector<16x128xf32>
    %cst_139 = arith.constant 0.000000e+00 : f32
    %389 = vector.shape_cast %26 : vector<16x1xi1> to vector<16x1xi1>
    %390 = vector.broadcast %389 : vector<16x1xi1> to vector<16x128xi1>
    %391 = vector.broadcast %cst_139 : f32 to vector<16x128xf32>
    %392 = arith.select %390, %388, %391 : vector<16x128xi1>, vector<16x128xf32>
    %c9_i32_140 = arith.constant 9 : i32
    %393 = tpu.memref_slice %arg34[%c9_i32_140] : memref<10x!tpu.dma_semaphore, #tpu.memory_space<semaphore_mem>> -> memref<1x!tpu.dma_semaphore, #tpu.memory_space<semaphore_mem>>
    %394 = tpu.memref_squeeze %393 : memref<1x!tpu.dma_semaphore, #tpu.memory_space<semaphore_mem>> -> memref<!tpu.dma_semaphore, #tpu.memory_space<semaphore_mem>>
    tpu.wait_dma2 semaphore(%394 : memref<!tpu.dma_semaphore, #tpu.memory_space<semaphore_mem>>) src(%arg21 : memref<128x128xbf16, #tpu.memory_space<any>>) dst(%arg33 : memref<128x128xbf16, #tpu.memory_space<vmem>>)
    %c0_141 = arith.constant 0 : index
    %c0_142 = arith.constant 0 : index
    %395 = vector.load %arg22[%c0_141, %c0_142] : memref<8x128xf32, #tpu.memory_space<vmem>>, vector<1x128xf32>
    %c1_143 = arith.constant 1 : index
    %c0_144 = arith.constant 0 : index
    %396 = vector.load %arg22[%c1_143, %c0_144] : memref<8x128xf32, #tpu.memory_space<vmem>>, vector<1x128xf32>
    %397 = arith.truncf %392 : vector<16x128xf32> to vector<16x128xbf16>
    %c0_145 = arith.constant 0 : index
    %c0_146 = arith.constant 0 : index
    %398 = vector.load %arg33[%c0_145, %c0_146] : memref<128x128xbf16, #tpu.memory_space<vmem>>, vector<128x128xbf16>
    %cst_147 = arith.constant dense<0.000000e+00> : vector<16x128xf32>
    %399 = tpu.matmul %397, %398, %cst_147 {dimension_numbers = #tpu.dot_dimension_numbers<[1], [0], [0], [1], [0, 0, 1, 1], [], []>} : vector<16x128xbf16>, vector<128x128xbf16>, vector<16x128xf32> -> vector<16x128xf32>
    %cst_148 = arith.constant dense<0.000000e+00> : vector<128xf32>
    %400 = vector.multi_reduction <add>, %399, %cst_148 [0] : vector<16x128xf32> to vector<128xf32>
    %401 = vector.shape_cast %400 : vector<128xf32> to vector<1x128xf32>
    %402 = vector.broadcast %23 : f32 to vector<1x128xf32>
    %403 = arith.mulf %401, %402 : vector<1x128xf32>
    %404 = arith.mulf %399, %399 : vector<16x128xf32>
    %cst_149 = arith.constant dense<0.000000e+00> : vector<128xf32>
    %405 = vector.multi_reduction <add>, %404, %cst_149 [0] : vector<16x128xf32> to vector<128xf32>
    %406 = vector.shape_cast %405 : vector<128xf32> to vector<1x128xf32>
    %407 = vector.broadcast %23 : f32 to vector<1x128xf32>
    %408 = arith.mulf %406, %407 : vector<1x128xf32>
    %409 = arith.mulf %403, %403 : vector<1x128xf32>
    %410 = arith.subf %408, %409 : vector<1x128xf32>
    %cst_150 = arith.constant 0.000000e+00 : f32
    %411 = vector.broadcast %cst_150 : f32 to vector<1x128xf32>
    %412 = arith.maximumf %410, %411 : vector<1x128xf32>
    %cst_151 = arith.constant 9.99999974E-6 : f32
    %413 = vector.broadcast %cst_151 : f32 to vector<1x128xf32>
    %414 = arith.addf %412, %413 : vector<1x128xf32>
    %415 = math.rsqrt %414 : vector<1x128xf32>
    %416 = arith.mulf %395, %415 : vector<1x128xf32>
    %417 = arith.mulf %403, %416 : vector<1x128xf32>
    %418 = arith.subf %396, %417 : vector<1x128xf32>
    %419 = vector.broadcast %416 : vector<1x128xf32> to vector<16x128xf32>
    %420 = arith.mulf %399, %419 : vector<16x128xf32>
    %421 = vector.broadcast %418 : vector<1x128xf32> to vector<16x128xf32>
    %422 = arith.addf %420, %421 : vector<16x128xf32>
    %cst_152 = arith.constant 0.000000e+00 : f32
    %423 = vector.shape_cast %26 : vector<16x1xi1> to vector<16x1xi1>
    %424 = vector.broadcast %423 : vector<16x1xi1> to vector<16x128xi1>
    %425 = vector.broadcast %cst_152 : f32 to vector<16x128xf32>
    %426 = arith.select %424, %422, %425 : vector<16x128xi1>, vector<16x128xf32>
    %427 = arith.negf %426 : vector<16x128xf32>
    %428 = math.exp %427 : vector<16x128xf32>
    %cst_153 = arith.constant 1.000000e+00 : f32
    %429 = vector.broadcast %cst_153 : f32 to vector<16x128xf32>
    %430 = arith.addf %429, %428 : vector<16x128xf32>
    %431 = arith.divf %429, %430 : vector<16x128xf32>
    %cst_154 = arith.constant 0.449073106 : f32
    %432 = vector.broadcast %cst_154 : f32 to vector<16x128xf32>
    %433 = arith.mulf %432, %431 : vector<16x128xf32>
    %cst_155 = arith.constant 0.193917945 : f32
    %434 = vector.broadcast %cst_155 : f32 to vector<16x128xf32>
    %435 = arith.addf %433, %434 : vector<16x128xf32>
    %c0_156 = arith.constant 0 : index
    %c0_157 = arith.constant 0 : index
    %436 = vector.load %arg23[%c0_156, %c0_157] : memref<16x128xf32, #tpu.memory_space<vmem>>, vector<16x128xf32>
    tpu.vector_store %arg23[%c0_156, %c0_157], %435 {strides = array<i32>} : memref<16x128xf32, #tpu.memory_space<vmem>>, vector<16x128xf32>,
    return
  }
  func.func @transform_0(%arg0: i32, %arg1: memref<1xi32, #tpu.memory_space<smem>>) -> (i32, i32) {
    %c0_i32 = arith.constant 0 : i32
    %c0_i32_0 = arith.constant 0 : i32
    %c0_i32_1 = arith.constant 0 : i32
    return %c0_i32, %c0_i32_0 : i32, i32
  }
  func.func @transform_2(%arg0: i32, %arg1: memref<1xi32, #tpu.memory_space<smem>>) -> (i32, i32) {
    %c0_i32 = arith.constant 0 : i32
    %c0_i32_0 = arith.constant 0 : i32
    %c0_i32_1 = arith.constant 0 : i32
    return %c0_i32, %c0_i32_0 : i32, i32
  }
  func.func @transform_4(%arg0: i32, %arg1: memref<1xi32, #tpu.memory_space<smem>>) -> (i32, i32) {
    %c0_i32 = arith.constant 0 : i32
    %c0_i32_0 = arith.constant 0 : i32
    %c0_i32_1 = arith.constant 0 : i32
    return %c0_i32, %c0_i32_0 : i32, i32
  }
  func.func @transform_6(%arg0: i32, %arg1: memref<1xi32, #tpu.memory_space<smem>>) -> (i32, i32) {
    %c0_i32 = arith.constant 0 : i32
    %c0_i32_0 = arith.constant 0 : i32
    %c0_i32_1 = arith.constant 0 : i32
    return %c0_i32, %c0_i32_0 : i32, i32
  }
  func.func @transform_8(%arg0: i32, %arg1: memref<1xi32, #tpu.memory_space<smem>>) -> (i32, i32) {
    %c0_i32 = arith.constant 0 : i32
    %c0_i32_0 = arith.constant 0 : i32
    %c0_i32_1 = arith.constant 0 : i32
    return %c0_i32, %c0_i32_0 : i32, i32
  }
  func.func @transform_10(%arg0: i32, %arg1: memref<1xi32, #tpu.memory_space<smem>>) -> (i32, i32) {
    %c0_i32 = arith.constant 0 : i32
    %c0_i32_0 = arith.constant 0 : i32
    %c0_i32_1 = arith.constant 0 : i32
    return %c0_i32, %c0_i32_0 : i32, i32
  }
  func.func @transform_12(%arg0: i32, %arg1: memref<1xi32, #tpu.memory_space<smem>>) -> (i32, i32) {
    %c0_i32 = arith.constant 0 : i32
    %c0_i32_0 = arith.constant 0 : i32
    %c0_i32_1 = arith.constant 0 : i32
    return %c0_i32, %c0_i32_0 : i32, i32
  }
  func.func @transform_14(%arg0: i32, %arg1: memref<1xi32, #tpu.memory_space<smem>>) -> (i32, i32) {
    %c0_i32 = arith.constant 0 : i32
    %c0_i32_0 = arith.constant 0 : i32
    %c0_i32_1 = arith.constant 0 : i32
    return %c0_i32, %c0_i32_0 : i32, i32
  }
  func.func @transform_16(%arg0: i32, %arg1: memref<1xi32, #tpu.memory_space<smem>>) -> (i32, i32) {
    %c0_i32 = arith.constant 0 : i32
    %c0_i32_0 = arith.constant 0 : i32
    %c0_i32_1 = arith.constant 0 : i32
    return %c0_i32, %c0_i32_0 : i32, i32
  }
  func.func @transform_18(%arg0: i32, %arg1: memref<1xi32, #tpu.memory_space<smem>>) -> (i32, i32) {
    %c0_i32 = arith.constant 0 : i32
    %c0_i32_0 = arith.constant 0 : i32
    %c0_i32_1 = arith.constant 0 : i32
    return %c0_i32, %c0_i32_0 : i32, i32
  }
  func.func @transform_20(%arg0: i32, %arg1: memref<1xi32, #tpu.memory_space<smem>>) -> (i32, i32) {
    %c0_i32 = arith.constant 0 : i32
    %c0_i32_0 = arith.constant 0 : i32
    %c0_i32_1 = arith.constant 0 : i32
    return %c0_i32, %c0_i32_0 : i32, i32
  }
  func.func @transform_21(%arg0: i32, %arg1: memref<1xi32, #tpu.memory_space<smem>>) -> (i32, i32) {
    %c0_i32 = arith.constant 0 : i32
    %c0_i32_0 = arith.constant 0 : i32
    %c0_i32_1 = arith.constant 0 : i32
    return %c0_i32, %c0_i32_0 : i32, i32
  }
}

</mosaic_0001>

<bundles_post_ra>
// kernel: tpu_custom_call.1
= control target key start
LH: loop header
LB: loop body
LE: loop exit
PB: predicated region body
PF: predicated region fallthrough
CT: control target
= control target key end

     0   :  { %s5247_s0 = inlined_call_operand.<no memory space> [shape: s32[1], index: 0, kind: input, shape index: {}]   ;;  %s5248_s1 = inlined_call_operand.hbm [shape: f32[16,128], index: 1, kind: input, shape index: {}]   ;;  %s5249_s2 = inlined_call_operand.hbm [shape: bf16[128,128], index: 2, kind: input, shape index: {}]   ;;  %s5250_s3 = inlined_call_operand.vmem [shape: f32[8,128], index: 3, kind: input, shape index: {}]   ;;  %s5251_s4 = inlined_call_operand.hbm [shape: bf16[128,256], index: 4, kind: input, shape index: {}]   ;;  %s5252_s5 = inlined_call_operand.hbm [shape: f32[8,256], index: 5, kind: input, shape index: {}]   ;;  %s5253_s6 = inlined_call_operand.hbm [shape: bf16[256,256], index: 6, kind: input, shape index: {}]   ;;  %s5254_s7 = inlined_call_operand.hbm [shape: f32[8,256], index: 7, kind: input, shape index: {}]   ;;  %s5255_s8 = inlined_call_operand.hbm [shape: bf16[256,512], index: 8, kind: input, shape index: {}]   ;;  %s5256_s9 = inlined_call_operand.hbm [shape: f32[8,512], index: 9, kind: input, shape index: {}]   ;;  %s5257_s10 = inlined_call_operand.hbm [shape: bf16[512,512], index: 10, kind: input, shape index: {}]   ;;  %s5258_s11 = inlined_call_operand.hbm [shape: f32[8,512], index: 11, kind: input, shape index: {}]   ;;  %s5259_s12 = inlined_call_operand.hbm [shape: bf16[512,512], index: 12, kind: input, shape index: {}]   ;;  %s5260_s13 = inlined_call_operand.hbm [shape: f32[8,512], index: 13, kind: input, shape index: {}]   ;;  %s5261_s14 = inlined_call_operand.hbm [shape: bf16[512,256], index: 14, kind: input, shape index: {}]   ;;  %s5262_s15 = inlined_call_operand.hbm [shape: f32[8,256], index: 15, kind: input, shape index: {}]   ;;  %s5263_s16 = inlined_call_operand.hbm [shape: bf16[256,256], index: 16, kind: input, shape index: {}]   ;;  %s5264_s17 = inlined_call_operand.hbm [shape: f32[8,256], index: 17, kind: input, shape index: {}]   ;;  %s5265_s18 = inlined_call_operand.hbm [shape: bf16[256,128], index: 18, kind: input, shape index: {}]   ;;  %s5266_s19 = inlined_call_operand.hbm [shape: f32[8,128], index: 19, kind: input, shape index: {}]   ;;  %s5267_s20 = inlined_call_operand.vmem [shape: bf16[128,128], index: 20, kind: input, shape index: {}]   ;;  %s5268_s21 = inlined_call_operand.hbm [shape: f32[8,128], index: 21, kind: input, shape index: {}]   ;;  %s5269_s22 = inlined_call_operand.hbm [shape: f32[16,128], index: 22, kind: output, shape index: {}]  }
   0x1   :  { %5277 = sst [smem:[#allocation73_spill]] %s5247_s0 }
   0x2   :  { %5278 = sst [smem:[#allocation74_spill]] %s5248_s1 }
   0x3   :  { %5279 = sst [smem:[#allocation75_spill]] %s5249_s2 }
   0x4   :  { %5280 = sst [smem:[#allocation76_spill]] %s5250_s3 }
   0x5   :  { %5281 = sst [smem:[#allocation77_spill]] %s5251_s4 }
   0x6   :  { %5282 = sst [smem:[#allocation78_spill]] %s5252_s5 }
   0x7   :  { %5283 = sst [smem:[#allocation79_spill]] %s5253_s6 }
   0x8   :  { %28 = vsyncpa [#allocation16], 0 }
   0x9   :  { %29 = vsyncpa [#allocation19], 0 }
   0xa   :  { %30 = vsyncpa [#allocation22], 0 }
   0xb   :  { %31 = vsyncpa [#allocation25], 0 }
   0xc   :  { %32 = vsyncpa [#allocation28], 0 }
   0xd   :  { %33 = vsyncpa [#allocation31], 0 }
   0xe   :  { %34 = vsyncpa [#allocation17], 0  ;;  %s4062_s3 = smov [#allocation18]   ;;  %s4063_s29 = smov [#allocation21]  }
   0xf   :  { %s55_s28 = sshll.u32 %s4062_s3, 4  ;;  %s75_s30 = sshll.u32 %s4063_s29, 4  ;;  %s56_s28 = int_to_ptr.vmem [resolvable:$true] %s55_s28  ;;  %s76_s30 = int_to_ptr.vmem [resolvable:$true] %s75_s30 }
  0x10   :  { %s5284_s23 = sld [smem:[#allocation78_spill]] }
  0x16   :  { %s3742_s1 = scalar_lea.hbm %s5284_s23, 256 }
  0x17   :  { %p3743_p0 = scmp.ne.s32.totalorder %s5284_s23, %s3742_s1  ;;  %p3746_p1 = scmp.lt.u32.totalorder %s3742_s1, %s5284_s23 }
  0x19   :  { %p3748_p2 = pnand %p3746_p1, %p3743_p0 }
  0x1b   :  { %3751 = shalt.err (!%p3748_p2)
}
  0x1c   :  { %s3752_s26 = scalar_lea.vmem %s56_s28, 256  ;;  %p3757_p4 = scmp.lt.s32.totalorder %s56_s28, %s56_s28 }
  0x1d   :  { %p3753_p3 = scmp.ne.s32.totalorder %s56_s28, %s3752_s26  ;;  %p3758_p5 = scmp.lt.s32.totalorder %s3752_s26, %s3752_s26 }
  0x1f   :  { %p3759_p6 = por %p3758_p5, %p3757_p4 }
  0x21   :  { %p3760_p7 = pnand %p3759_p6, %p3753_p3 }
  0x23   :  { %3763 = shalt.err (!%p3760_p7)
}
  0x24   :  { %58 = dma.hbm_to_vmem [thread:$0]  %s5284_s23, 256, %s56_s28, [#allocation19]  }
  0x25   :  { %s3764_s4 = scalar_lea.hbm %s5256_s9, 512 }
  0x26   :  { %p3765_p8 = scmp.ne.s32.totalorder %s5256_s9, %s3764_s4  ;;  %p3768_p9 = scmp.lt.u32.totalorder %s3764_s4, %s5256_s9 }
  0x28   :  { %p3770_p10 = pnand %p3768_p9, %p3765_p8 }
  0x2a   :  { %3773 = shalt.err (!%p3770_p10)
}
  0x2b   :  { %s3774_s6 = scalar_lea.vmem %s76_s30, 512  ;;  %p3779_p12 = scmp.lt.s32.totalorder %s76_s30, %s76_s30 }
  0x2c   :  { %p3775_p11 = scmp.ne.s32.totalorder %s76_s30, %s3774_s6  ;;  %p3780_p13 = scmp.lt.s32.totalorder %s3774_s6, %s3774_s6 }
  0x2e   :  { %p3781_p0 = por %p3780_p13, %p3779_p12 }
  0x30   :  { %p3782_p1 = pnand %p3781_p0, %p3775_p11 }
  0x32   :  { %3785 = shalt.err (!%p3782_p1)
}
  0x33   :  { %78 = dma.hbm_to_vmem [thread:$0]  %s5256_s9, 512, %s76_s30, [#allocation22]  }
  0x34   :  { %s4064_s25 = smov [#allocation24]   ;;  %s4065_s2 = smov [#allocation27]  }
  0x35   :  { %s95_s26 = sshll.u32 %s4064_s25, 4  ;;  %s115_s27 = sshll.u32 %s4065_s2, 4  ;;  %s96_s26 = int_to_ptr.vmem [resolvable:$true] %s95_s26  ;;  %s116_s27 = int_to_ptr.vmem [resolvable:$true] %s115_s27 }
  0x36   :  { %s3786_s4 = scalar_lea.hbm %s5260_s13, 512 }
  0x37   :  { %p3787_p2 = scmp.ne.s32.totalorder %s5260_s13, %s3786_s4  ;;  %p3790_p3 = scmp.lt.u32.totalorder %s3786_s4, %s5260_s13 }
  0x39   :  { %p3792_p4 = pnand %p3790_p3, %p3787_p2 }
  0x3b   :  { %3795 = shalt.err (!%p3792_p4)
}
  0x3c   :  { %s3796_s9 = scalar_lea.vmem %s96_s26, 512  ;;  %p3801_p6 = scmp.lt.s32.totalorder %s96_s26, %s96_s26 }
  0x3d   :  { %p3797_p5 = scmp.ne.s32.totalorder %s96_s26, %s3796_s9  ;;  %p3802_p7 = scmp.lt.s32.totalorder %s3796_s9, %s3796_s9 }
  0x3f   :  { %p3803_p8 = por %p3802_p7, %p3801_p6 }
  0x41   :  { %p3804_p9 = pnand %p3803_p8, %p3797_p5 }
  0x43   :  { %3807 = shalt.err (!%p3804_p9)
}
  0x44   :  { %98 = dma.hbm_to_vmem [thread:$0]  %s5260_s13, 512, %s96_s26, [#allocation25]  }
  0x45   :  { %s3808_s25 = scalar_lea.hbm %s5264_s17, 256 }
  0x46   :  { %p3809_p10 = scmp.ne.s32.totalorder %s5264_s17, %s3808_s25  ;;  %p3812_p11 = scmp.lt.u32.totalorder %s3808_s25, %s5264_s17 }
  0x48   :  { %p3814_p12 = pnand %p3812_p11, %p3809_p10 }
  0x4a   :  { %3817 = shalt.err (!%p3814_p12)
}
  0x4b   :  { %s3818_s0 = scalar_lea.vmem %s116_s27, 256  ;;  %p3823_p0 = scmp.lt.s32.totalorder %s116_s27, %s116_s27 }
  0x4c   :  { %p3819_p13 = scmp.ne.s32.totalorder %s116_s27, %s3818_s0  ;;  %p3824_p1 = scmp.lt.s32.totalorder %s3818_s0, %s3818_s0 }
  0x4e   :  { %p3825_p2 = por %p3824_p1, %p3823_p0 }
  0x50   :  { %p3826_p3 = pnand %p3825_p2, %p3819_p13 }
  0x52   :  { %3829 = shalt.err (!%p3826_p3)
}
  0x53   :  { %118 = dma.hbm_to_vmem [thread:$0]  %s5264_s17, 256, %s116_s27, [#allocation28]  }
  0x54   :  { %s4066_s5 = smov [#allocation15]   ;;  %s5285_s30 = sld [smem:[#allocation74_spill]] }
  0x55   :  { %s40_s1 = sshll.u32 %s4066_s5, 4  ;;  %s41_s1 = int_to_ptr.vmem [resolvable:$true] %s40_s1 }
  0x5a   :  { %s3830_s6 = scalar_lea.hbm %s5285_s30, 256 }
  0x5b   :  { %p3831_p4 = scmp.ne.s32.totalorder %s5285_s30, %s3830_s6  ;;  %p3834_p5 = scmp.lt.u32.totalorder %s3830_s6, %s5285_s30 }
  0x5d   :  { %p3836_p6 = pnand %p3834_p5, %p3831_p4 }
  0x5f   :  { %3839 = shalt.err (!%p3836_p6)
}
  0x60   :  { %s3840_s3 = scalar_lea.vmem %s41_s1, 256  ;;  %p3845_p8 = scmp.lt.s32.totalorder %s41_s1, %s41_s1 }
  0x61   :  { %p3841_p7 = scmp.ne.s32.totalorder %s41_s1, %s3840_s3  ;;  %p3846_p9 = scmp.lt.s32.totalorder %s3840_s3, %s3840_s3 }
  0x63   :  { %p3847_p10 = por %p3846_p9, %p3845_p8 }
  0x65   :  { %p3848_p11 = pnand %p3847_p10, %p3841_p7 }
  0x67   :  { %3851 = shalt.err (!%p3848_p11)
}
  0x68   :  { %s4067_s17 = smov 128   ;;  %s4068_s27 = smov 8  }
  0x69   :  { %46 = dma.hbm_to_vmem [thread:$0]  %s5285_s30, 256, %s41_s1, [#allocation16], %s4067_s17, %s4067_s17, %s4068_s27  }
  0x6a   :  { %s4069_s0 = smov [#allocation20]   ;;  %s4070_s26 = smov [#allocation23]  }
  0x6b   :  { %s65_s13 = sshll.u32 %s4069_s0, 4  ;;  %s85_s5 = sshll.u32 %s4070_s26, 4  ;;  %s66_s13 = int_to_ptr.vmem [resolvable:$true] %s65_s13  ;;  %s86_s5 = int_to_ptr.vmem [resolvable:$true] %s85_s5 }
  0x6c   :  { %s3852_s6 = scalar_lea.hbm %s5254_s7, 256 }
  0x6d   :  { %p3853_p12 = scmp.ne.s32.totalorder %s5254_s7, %s3852_s6  ;;  %p3856_p13 = scmp.lt.u32.totalorder %s3852_s6, %s5254_s7 }
  0x6f   :  { %p3858_p0 = pnand %p3856_p13, %p3853_p12 }
  0x71   :  { %3861 = shalt.err (!%p3858_p0)
}
  0x72   :  { %s3862_s1 = scalar_lea.vmem %s66_s13, 256  ;;  %p3867_p2 = scmp.lt.s32.totalorder %s66_s13, %s66_s13 }
  0x73   :  { %p3863_p1 = scmp.ne.s32.totalorder %s66_s13, %s3862_s1  ;;  %p3868_p3 = scmp.lt.s32.totalorder %s3862_s1, %s3862_s1 }
  0x75   :  { %p3869_p4 = por %p3868_p3, %p3867_p2 }
  0x77   :  { %p3870_p5 = pnand %p3869_p4, %p3863_p1 }
  0x79   :  { %3873 = shalt.err (!%p3870_p5)
}
  0x7a   :  { %68 = dma.hbm_to_vmem [thread:$0]  %s5254_s7, 256, %s66_s13, [#allocation19]  }
  0x7b   :  { %s3874_s0 = scalar_lea.hbm %s5258_s11, 512 }
  0x7c   :  { %p3875_p6 = scmp.ne.s32.totalorder %s5258_s11, %s3874_s0  ;;  %p3878_p7 = scmp.lt.u32.totalorder %s3874_s0, %s5258_s11 }
  0x7e   :  { %p3880_p8 = pnand %p3878_p7, %p3875_p6 }
  0x80   :  { %3883 = shalt.err (!%p3880_p8)
}
  0x81   :  { %s3884_s28 = scalar_lea.vmem %s86_s5, 512  ;;  %p3889_p10 = scmp.lt.s32.totalorder %s86_s5, %s86_s5 }
  0x82   :  { %p3885_p9 = scmp.ne.s32.totalorder %s86_s5, %s3884_s28  ;;  %p3890_p11 = scmp.lt.s32.totalorder %s3884_s28, %s3884_s28 }
  0x84   :  { %p3891_p12 = por %p3890_p11, %p3889_p10 }
  0x86   :  { %p3892_p13 = pnand %p3891_p12, %p3885_p9 }
  0x88   :  { %3895 = shalt.err (!%p3892_p13)
}
  0x89   :  { %88 = dma.hbm_to_vmem [thread:$0]  %s5258_s11, 512, %s86_s5, [#allocation22]  }
  0x8a   :  { %s4071_s23 = smov [#allocation26]   ;;  %s4072_s2 = smov [#allocation29]  }
  0x8b   :  { %s105_s25 = sshll.u32 %s4071_s23, 4  ;;  %s125_s1 = sshll.u32 %s4072_s2, 4  ;;  %s106_s25 = int_to_ptr.vmem [resolvable:$true] %s105_s25  ;;  %s126_s1 = int_to_ptr.vmem [resolvable:$true] %s125_s1 }
  0x8c   :  { %s3896_s29 = scalar_lea.hbm %s5262_s15, 256 }
  0x8d   :  { %p3897_p0 = scmp.ne.s32.totalorder %s5262_s15, %s3896_s29  ;;  %p3900_p1 = scmp.lt.u32.totalorder %s3896_s29, %s5262_s15 }
  0x8f   :  { %p3902_p2 = pnand %p3900_p1, %p3897_p0 }
  0x91   :  { %3905 = shalt.err (!%p3902_p2)
}
  0x92   :  { %s3906_s11 = scalar_lea.vmem %s106_s25, 256  ;;  %p3911_p4 = scmp.lt.s32.totalorder %s106_s25, %s106_s25 }
  0x93   :  { %p3907_p3 = scmp.ne.s32.totalorder %s106_s25, %s3906_s11  ;;  %p3912_p5 = scmp.lt.s32.totalorder %s3906_s11, %s3906_s11 }
  0x95   :  { %p3913_p6 = por %p3912_p5, %p3911_p4 }
  0x97   :  { %p3914_p7 = pnand %p3913_p6, %p3907_p3 }
  0x99   :  { %3917 = shalt.err (!%p3914_p7)
}
  0x9a   :  { %108 = dma.hbm_to_vmem [thread:$0]  %s5262_s15, 256, %s106_s25, [#allocation25]  }
  0x9b   :  { %s3918_s7 = scalar_lea.hbm %s5266_s19, 128 }
  0x9c   :  { %p3919_p8 = scmp.ne.s32.totalorder %s5266_s19, %s3918_s7  ;;  %p3922_p9 = scmp.lt.u32.totalorder %s3918_s7, %s5266_s19 }
  0x9e   :  { %p3924_p10 = pnand %p3922_p9, %p3919_p8 }
  0xa0   :  { %3927 = shalt.err (!%p3924_p10)
}
  0xa1   :  { %s3928_s3 = scalar_lea.vmem %s126_s1, 128  ;;  %p3933_p12 = scmp.lt.s32.totalorder %s126_s1, %s126_s1 }
  0xa2   :  { %p3929_p11 = scmp.ne.s32.totalorder %s126_s1, %s3928_s3  ;;  %p3934_p13 = scmp.lt.s32.totalorder %s3928_s3, %s3928_s3 }
  0xa4   :  { %p3935_p0 = por %p3934_p13, %p3933_p12 }
  0xa6   :  { %p3936_p1 = pnand %p3935_p0, %p3929_p11 }
  0xa8   :  { %3939 = shalt.err (!%p3936_p1)
}
  0xa9   :  { %128 = dma.hbm_to_vmem [thread:$0]  %s5266_s19, 128, %s126_s1, [#allocation28]  }
  0xaa   :  { %s4073_s29 = smov [#allocation30]   ;;  %s3940_s24 = scalar_lea.hbm %s5268_s21, 128 }
  0xab   :  { %s135_s4 = sshll.u32 %s4073_s29, 4  ;;  %p3941_p2 = scmp.ne.s32.totalorder %s5268_s21, %s3940_s24  ;;  %s136_s4 = int_to_ptr.vmem [resolvable:$true] %s135_s4 }
  0xac   :  { %p3944_p3 = scmp.lt.u32.totalorder %s3940_s24, %s5268_s21 }
  0xae   :  { %p3946_p4 = pnand %p3944_p3, %p3941_p2 }
  0xb0   :  { %3949 = shalt.err (!%p3946_p4)
}
  0xb1   :  { %s3950_s28 = scalar_lea.vmem %s136_s4, 128  ;;  %p3955_p6 = scmp.lt.s32.totalorder %s136_s4, %s136_s4 }
  0xb2   :  { %p3951_p5 = scmp.ne.s32.totalorder %s136_s4, %s3950_s28  ;;  %p3956_p7 = scmp.lt.s32.totalorder %s3950_s28, %s3950_s28 }
  0xb4   :  { %p3957_p8 = por %p3956_p7, %p3955_p6 }
  0xb6   :  { %p3958_p9 = pnand %p3957_p8, %p3951_p5 }
  0xb8   :  { %3961 = shalt.err (!%p3958_p9)
}
  0xb9   :  { %138 = dma.hbm_to_vmem [thread:$0]  %s5268_s21, 128, %s136_s4, [#allocation31]  }
  0xba   :  { %4028 = dma.done.wait [#allocation16], 256  }
  0xbb   :  { %4029 = vsyncadd [#allocation16], 4294967040 }
  0xbc   :  { %4030 = dma.done.wait [#allocation19], 512  }
  0xbd   :  { %4031 = vsyncadd [#allocation19], 4294966784 }
  0xbe   :  { %4032 = dma.done.wait [#allocation22], 1024  }
  0xbf   :  { %4033 = vsyncadd [#allocation22], 4294966272 }
  0xc0   :  { %4034 = dma.done.wait [#allocation25], 768  }
  0xc1   :  { %4035 = vsyncadd [#allocation25], 4294966528 }
  0xc2   :  { %4036 = dma.done.wait [#allocation28], 384  }
  0xc3   :  { %4037 = vsyncadd [#allocation28], 4294966912 }
  0xc4   :  { %4038 = dma.done.wait [#allocation31], 128  }
  0xc5   :  { %4039 = vsyncadd [#allocation31], 4294967168  ;;  %s186_s7 = sld [smem:[#allocation0]]   ;;  %s4074_s13 = smov 256  }
  0xc6   :  { %198 = sst [smem:[#allocation38]] %s4074_s13  ;;  %s4075_s23 = smov 2  }
  0xc7   :  { %200 = sst [smem:[#allocation38 + $0x1]] %s4074_s13  ;;  %s4076_s21 = smov 64  }
  0xc8   :  { %202 = sst [smem:[#allocation38 + $0x2]] %s4075_s23  ;;  %s4077_s2 = smov [#allocation2]  }
  0xc9   :  { %204 = sst [smem:[#allocation38 + $0x3]] %s4076_s21  ;;  %s177_s30 = sshll.u32 %s4077_s2, 4  ;;  %s178_s30 = int_to_ptr.vmem [resolvable:$true] %s177_s30 }
  0xca   :  { %206 = sst [smem:[#allocation38 + $0x4]] %s4067_s17  ;;  %s4078_s25 = smov 4  }
  0xcb   :  { %208 = sst [smem:[#allocation38 + $0x5]] %s4075_s23  ;;  %s3413_s3 = sshll.u32 %s186_s7, 26 }
  0xcc   :  { %210 = sst [smem:[#allocation38 + $0x6]] %s4067_s17  ;;  %s4352_s15 = sadd.s32 134217728, %s3413_s3 }
  0xcd   :  { %212 = sst [smem:[#allocation38 + $0x7]] %s4076_s21  ;;  %s5286_s0 = sld [smem:[#allocation75_spill]] }
  0xce   :  { %214 = sst [smem:[#allocation38 + $0x8]] %s4078_s25 }
  0xd3   :  { %s3962_s26 = scalar_lea.hbm %s5286_s0, 1024 }
  0xd4   :  { %p3963_p10 = scmp.ne.s32.totalorder %s5286_s0, %s3962_s26  ;;  %p3966_p11 = scmp.lt.u32.totalorder %s3962_s26, %s5286_s0 }
  0xd6   :  { %p3968_p12 = pnand %p3966_p11, %p3963_p10 }
  0xd8   :  { %3971 = shalt.err (!%p3968_p12)  }
  0xd9   :  { %s3972_s6 = scalar_lea.vmem %s178_s30, 1024  ;;  %p3977_p0 = scmp.lt.s32.totalorder %s178_s30, %s178_s30 }
  0xda   :  { %p3973_p13 = scmp.ne.s32.totalorder %s178_s30, %s3972_s6  ;;  %p3978_p1 = scmp.lt.s32.totalorder %s3972_s6, %s3972_s6 }
  0xdc   :  { %p3979_p2 = por %p3978_p1, %p3977_p0 }
  0xde   :  { %p3980_p3 = pnand %p3979_p2, %p3973_p13 }
  0xe0   :  { %3983 = shalt.err (!%p3980_p3)  }
  0xe1   :  { %180 = dma.hbm_to_vmem [thread:$0]  %s5286_s0, 1024, %s178_s30, [#allocation12] }
  0xe2   :  { %s4079_s1 = smov [#allocation3]   ;;  %s4080_s2 = smov [#allocation12 + $0x1]  }
  0xe3   :  { %s194_s7 = sshll.u32 %s4079_s1, 4  ;;  %s4081_s3 = smov [#allocation37]   ;;  %s195_s7 = int_to_ptr.vmem [resolvable:$true] %s194_s7 }
  0xe4   :  { %s5287_s26 = sld [smem:[#allocation77_spill]]  ;;  %s4082_s24 = smov [#allocation4]  }
  0xe5   :  { %s229_s11 = sshll.u32 %s4082_s24, 4  ;;  %s4083_s30 = smov [#allocation12 + $0x2]   ;;  %s230_s11 = int_to_ptr.vmem [resolvable:$true] %s229_s11 }
  0xe6   :  { %s4084_s0 = smov [#allocation39]   ;;  %s4085_s28 = smov 512  }
  0xe7   :  { %s4086_s19 = smov [#allocation5]   ;;  %s4089_s4 = smov [#allocation6]  }
  0xe8   :  { %s264_s1 = sshll.u32 %s4086_s19, 4  ;;  %s4091_s24 = smov [#allocation43]   ;;  %s265_s1 = int_to_ptr.vmem [resolvable:$true] %s264_s1 }
  0xe9   :  { %s4094_s9 = smov [#allocation45]   ;;  %s4095_s19 = smov [#allocation8]  }
  0xea   :  { %216 = dma.general %s5287_s26, 2048, %s195_s7, %s4080_s2, %s4081_s3, [#allocation38], %s4352_s15, 0  }
  0xeb   :  { %233 = sst [smem:[#allocation40]] %s4074_s13  ;;  %s5288_s6 = sld [smem:[#allocation79_spill]] }
  0xec   :  { %235 = sst [smem:[#allocation40 + $0x1]] %s4074_s13  ;;  %s4087_s7 = smov [#allocation12 + $0x3]  }
  0xed   :  { %237 = sst [smem:[#allocation40 + $0x2]] %s4075_s23  ;;  %s4088_s2 = smov [#allocation41]  }
  0xee   :  { %239 = sst [smem:[#allocation40 + $0x3]] %s4076_s21  ;;  %s299_s26 = sshll.u32 %s4089_s4, 4  ;;  %s300_s26 = int_to_ptr.vmem [resolvable:$true] %s299_s26 }
  0xef   :  { %241 = sst [smem:[#allocation40 + $0x4]] %s4067_s17  ;;  %s4098_s29 = smov [#allocation9]  }
  0xf0   :  { %243 = sst [smem:[#allocation40 + $0x5]] %s4075_s23  ;;  %s404_s4 = sshll.u32 %s4098_s29, 4  ;;  %s405_s4 = int_to_ptr.vmem [resolvable:$true] %s404_s4 }
  0xf1   :  { %245 = sst [smem:[#allocation40 + $0x6]] %s4067_s17 }
  0xf2   :  { %247 = sst [smem:[#allocation40 + $0x7]] %s4076_s21 }
  0xf3   :  { %249 = sst [smem:[#allocation40 + $0x8]] %s4078_s25 }
  0xf4   :  { %251 = dma.general %s5288_s6, 4096, %s230_s11, %s4083_s30, %s4084_s0, [#allocation40], %s4352_s15, 0  }
  0xf5   :  { %268 = sst [smem:[#allocation42]] %s4085_s28  ;;  %s4092_s0 = smov [#allocation7]  }
  0xf6   :  { %270 = sst [smem:[#allocation42 + $0x1]] %s4085_s28  ;;  %s334_s5 = sshll.u32 %s4092_s0, 4  ;;  %s335_s5 = int_to_ptr.vmem [resolvable:$true] %s334_s5 }
  0xf7   :  { %272 = sst [smem:[#allocation42 + $0x2]] %s4078_s25 }
  0xf8   :  { %274 = sst [smem:[#allocation42 + $0x3]] %s4076_s21 }
  0xf9   :  { %276 = sst [smem:[#allocation42 + $0x4]] %s4067_s17 }
  0xfa   :  { %278 = sst [smem:[#allocation42 + $0x5]] %s4075_s23 }
  0xfb   :  { %280 = sst [smem:[#allocation42 + $0x6]] %s4074_s13 }
  0xfc   :  { %282 = sst [smem:[#allocation42 + $0x7]] %s4076_s21 }
  0xfd   :  { %284 = sst [smem:[#allocation42 + $0x8]] %s4078_s25 }
  0xfe   :  { %286 = dma.general %s5255_s8, 8192, %s265_s1, %s4087_s7, %s4088_s2, [#allocation42], %s4352_s15, 0  }
  0xff   :  { %303 = sst [smem:[#allocation44]] %s4085_s28  ;;  %s4090_s8 = smov [#allocation12 + $0x4]  }
 0x100   :  { %305 = sst [smem:[#allocation44 + $0x1]] %s4085_s28  ;;  %s369_s1 = sshll.u32 %s4095_s19, 4  ;;  %s370_s1 = int_to_ptr.vmem [resolvable:$true] %s369_s1 }
 0x101   :  { %307 = sst [smem:[#allocation44 + $0x2]] %s4078_s25  ;;  %s4097_s7 = smov [#allocation47]  }
 0x102   :  { %309 = sst [smem:[#allocation44 + $0x3]] %s4076_s21 }
 0x103   :  { %311 = sst [smem:[#allocation44 + $0x4]] %s4067_s17 }
 0x104   :  { %313 = sst [smem:[#allocation44 + $0x5]] %s4075_s23 }
 0x105   :  { %315 = sst [smem:[#allocation44 + $0x6]] %s4074_s13 }
 0x106   :  { %317 = sst [smem:[#allocation44 + $0x7]] %s4076_s21 }
 0x107   :  { %319 = sst [smem:[#allocation44 + $0x8]] %s4078_s25 }
 0x108   :  { %321 = dma.general %s5257_s10, 16384, %s300_s26, %s4090_s8, %s4091_s24, [#allocation44], %s4352_s15, 0  }
 0x109   :  { %338 = sst [smem:[#allocation46]] %s4085_s28  ;;  %s4093_s10 = smov [#allocation12 + $0x5]  }
 0x10a   :  { %340 = sst [smem:[#allocation46 + $0x1]] %s4085_s28  ;;  %s4099_s26 = smov [#allocation10]  }
 0x10b   :  { %342 = sst [smem:[#allocation46 + $0x2]] %s4078_s25  ;;  %s435_s8 = sshll.u32 %s4099_s26, 4  ;;  %s436_s8 = int_to_ptr.vmem [resolvable:$true] %s435_s8 }
 0x10c   :  { %344 = sst [smem:[#allocation46 + $0x3]] %s4076_s21 }
 0x10d   :  { %346 = sst [smem:[#allocation46 + $0x4]] %s4067_s17 }
 0x10e   :  { %348 = sst [smem:[#allocation46 + $0x5]] %s4075_s23 }
 0x10f   :  { %350 = sst [smem:[#allocation46 + $0x6]] %s4074_s13 }
 0x110   :  { %352 = sst [smem:[#allocation46 + $0x7]] %s4076_s21 }
 0x111   :  { %354 = sst [smem:[#allocation46 + $0x8]] %s4078_s25 }
 0x112   :  { %356 = dma.general %s5259_s12, 16384, %s335_s5, %s4093_s10, %s4094_s9, [#allocation46], %s4352_s15, 0  }
 0x113   :  { %373 = sst [smem:[#allocation48]] %s4074_s13  ;;  %s4096_s12 = smov [#allocation12 + $0x6]  }
 0x114   :  { %375 = sst [smem:[#allocation48 + $0x1]] %s4074_s13  ;;  %s3984_s5 = scalar_lea.hbm %s5265_s18, 2048 }
 0x115   :  { %377 = sst [smem:[#allocation48 + $0x2]] %s4075_s23  ;;  %p3985_p4 = scmp.ne.s32.totalorder %s5265_s18, %s3984_s5 }
 0x116   :  { %379 = sst [smem:[#allocation48 + $0x3]] %s4076_s21  ;;  %p3988_p5 = scmp.lt.u32.totalorder %s3984_s5, %s5265_s18 }
 0x117   :  { %381 = sst [smem:[#allocation48 + $0x4]] %s4067_s17 }
 0x118   :  { %383 = sst [smem:[#allocation48 + $0x5]] %s4075_s23  ;;  %p3990_p6 = pnand %p3988_p5, %p3985_p4 }
 0x119   :  { %385 = sst [smem:[#allocation48 + $0x6]] %s4067_s17 }
 0x11a   :  { %387 = sst [smem:[#allocation48 + $0x7]] %s4076_s21 }
 0x11b   :  { %389 = sst [smem:[#allocation48 + $0x8]] %s4078_s25 }
 0x11c   :  { %391 = dma.general %s5261_s14, 8192, %s370_s1, %s4096_s12, %s4097_s7, [#allocation48], %s4352_s15, 0  }
 0x11d   :  { %408 = sst [smem:[#allocation50]] %s4074_s13  ;;  %s4100_s14 = smov [#allocation12 + $0x7]  }
 0x11e   :  { %410 = sst [smem:[#allocation50 + $0x1]] %s4074_s13  ;;  %s4101_s13 = smov [#allocation49]  }
 0x11f   :  { %412 = sst [smem:[#allocation50 + $0x2]] %s4075_s23 }
 0x120   :  { %414 = sst [smem:[#allocation50 + $0x3]] %s4076_s21 }
 0x121   :  { %416 = sst [smem:[#allocation50 + $0x4]] %s4067_s17 }
 0x122   :  { %418 = sst [smem:[#allocation50 + $0x5]] %s4075_s23 }
 0x123   :  { %420 = sst [smem:[#allocation50 + $0x6]] %s4067_s17 }
 0x124   :  { %422 = sst [smem:[#allocation50 + $0x7]] %s4076_s21 }
 0x125   :  { %424 = sst [smem:[#allocation50 + $0x8]] %s4078_s25 }
 0x126   :  { %426 = dma.general %s5263_s16, 4096, %s405_s4, %s4100_s14, %s4101_s13, [#allocation50], %s4352_s15, 0  }
 0x127   :  { %3993 = shalt.err (!%p3990_p6)  }
 0x128   :  { %s3994_s21 = scalar_lea.vmem %s436_s8, 2048  ;;  %p3999_p8 = scmp.lt.s32.totalorder %s436_s8, %s436_s8 }
 0x129   :  { %p3995_p7 = scmp.ne.s32.totalorder %s436_s8, %s3994_s21  ;;  %p4000_p9 = scmp.lt.s32.totalorder %s3994_s21, %s3994_s21 }
 0x12b   :  { %p4001_p10 = por %p4000_p9, %p3999_p8 }
 0x12d   :  { %p4002_p11 = pnand %p4001_p10, %p3995_p7 }
 0x12f   :  { %4005 = shalt.err (!%p4002_p11)  }
 0x130   :  { %438 = dma.hbm_to_vmem [thread:$0]  %s5265_s18, 2048, %s436_s8, [#allocation12 + $0x8]  ;;  %v4465_v0 = vld [vmem:[%s5267_s20] sm:$0xff]  ;;  %v4470_v1 = vld [vmem:[%s5267_s20 + $0x8] sm:$0xff]  ;;  %v4475_v2 = vld [vmem:[%s5267_s20 + $0x10] sm:$0xff] }
 0x131   :  { %v4480_v3 = vld [vmem:[%s5267_s20 + $0x18] sm:$0xff]  ;;  %v4485_v4 = vld [vmem:[%s5267_s20 + $0x20] sm:$0xff]  ;;  %v4490_v5 = vld [vmem:[%s5267_s20 + $0x28] sm:$0xff] }
 0x132   :  { %v4495_v6 = vld [vmem:[%s5267_s20 + $0x30] sm:$0xff]  ;;  %v4500_v7 = vld [vmem:[%s5267_s20 + $0x38] sm:$0xff]  ;;  %v509_v8 = vld [vmem:[#allocation15] sm:$0xff] }
 0x133   :  { %5289 = vst [vmem:[#allocation71_spill] sm:$0xff] %v4495_v6  ;;  %5290 = vst [vmem:[#allocation72_spill] sm:$0xff] %v4500_v7  ;;  %v510_v9 = vld [vmem:[#allocation15 + $0x8] sm:$0xff] }
 0x134   :  { %495 = vsyncadd [#allocation12 + $0x9], 1024  ;;  %s5291_s0 = sld [smem:[#allocation73_spill]]  ;;  %v503_v10 = vlaneseq  ;;  %v511_v11 = vmul.f32 %v509_v8, %v509_v8  ;;  %v512_v13 = vmul.f32 %v510_v9, %v510_v9 }
 0x136   :  { %v4508_v12 = vshrl.u32 %v503_v10, 7  ;;  %513 = vadd.xlane.f32.xlu0 %v511_v11 }
 0x138   :  { %v505_v14 = vadd.s32 8, %v4508_v12 }
 0x13a   :  { %p497_p12 = scmp.gt.s32.totalorder %s5291_s0, 1  ;;  %515 = vadd.xlane.f32.xlu0 %v512_v13 }
 0x13c   :  { %s5319_s0 = smov (!%p497_p12, %s5291_s0), 1 }
 0x13d   :  { %s499_s9 = scvt.s32.f32 %s5319_s0  ;;  %v506_v15 = vstv %s5319_s0 }
 0x13e   :  { %vm4512_vm0 = vcmp.lt.s32.totalorder %v4508_v12, %v506_v15  ;;  %vm4516_vm1 = vcmp.lt.s32.totalorder %v505_v14, %v506_v15 }
 0x13f   :  { %v500_v17 = vstv %s499_s9 }
 0x140   :  { %3682 = vrcp.f32 %v500_v17 }
 0x14a   :  { %v3683_v19 = vpop.eup %3682 }
 0x14b   :  { %3635 = vpush %v3683_v19 }
 0x17c   :  { %s4520_s20 = spop %3635 }
 0x1c3   :  { %v514_v20 = vpop.xlane.xlu0 %513 }
 0x1c4   :  { %3684 = vrsqrt.f32 %v514_v20  ;;  %vm517_vm2 = vcmp.gt.f32.partialorder %v514_v20, 0.0 }
 0x1c7   :  { %v516_v21 = vpop.xlane.xlu0 %515 }
 0x1c8   :  { %3686 = vrsqrt.f32 %v516_v21  ;;  %vm518_vm3 = vcmp.gt.f32.partialorder %v516_v21, 0.0 }
 0x1ce   :  { %v3685_v22 = vpop.eup %3684 }
 0x1cf   :  { %v521_v23 = vsel %vm517_vm2, %v3685_v22, 0.0 }
 0x1d0   :  { %v523_v24 = vmul.f32 %v521_v23, %v509_v8 }
 0x1d2   :  { %v3687_v25 = vpop.eup %3686 }
 0x1d3   :  { %v522_v26 = vsel %vm518_vm3, %v3687_v25, 0.0 }
 0x1d4   :  { %v524_v27 = vmul.f32 %v522_v26, %v510_v9 }
 0x1d5   :  { %4040 = dma.done.wait [#allocation12], 1024 }
 0x1d6   :  { %4041 = vsyncadd [#allocation12], 4294966272  ;;  %v5275_v28 = vmov 0.0   ;;  %vm4103_vm4 = vmmov 0   ;;  %v532_v29 = vld [vmem:[#allocation2] sm:$0xff]  ;;  %v533_v30 = vld [vmem:[#allocation2 + $0x8] sm:$0xff]  ;;  %v531_v37 = vpack.c.bf16 %v524_v27, %v523_v24  ;;  %v4533_v55 = vstv %s4520_s20 }
 0x1d7   :  { %3575 = vmatprep.subr.bf16.mxu0 %v5275_v28  ;;  %3591 = vmatprep.mubr.msk.bf16.mxu0 %vm4103_vm4, %v5275_v28  ;;  %v534_v31 = vld [vmem:[#allocation2 + $0x10] sm:$0xff]  ;;  %v535_v32 = vld [vmem:[#allocation2 + $0x18] sm:$0xff]  ;;  %v536_v33 = vld [vmem:[#allocation2 + $0x20] sm:$0xff]  ;;  %s5296_s21 = sld [smem:[#allocation76_spill]]  ;;  %v4541_v10 = vsub.s32 0, %v4508_v12 }
 0x1d8   :  { %3576 = vmatpush3.bf16.msra.mxu0 %v532_v29  ;;  %v537_v34 = vld [vmem:[#allocation2 + $0x28] sm:$0xff]  ;;  %v538_v35 = vld [vmem:[#allocation2 + $0x30] sm:$0xff]  ;;  %v539_v36 = vld [vmem:[#allocation2 + $0x38] sm:$0xff] }
 0x1d9   :  { %3577 = vmatprep.subr.bf16.mxu0 %v5275_v28 }
 0x1dc   :  { %3578 = vmatpush3.bf16.msra.mxu0 %v533_v30 }
 0x1dd   :  { %3579 = vmatprep.subr.bf16.mxu0 %v5275_v28  ;;  %v529_v9 = vld [vmem:[%s5296_s21] sm:$0x1]  ;;  %v530_v14 = vld [vmem:[%s5296_s21 + $0x1] sm:$0x1] }
 0x1e0   :  { %3580 = vmatpush3.bf16.msra.mxu0 %v534_v31 }
 0x1e1   :  { %3581 = vmatprep.subr.bf16.mxu0 %v5275_v28 }
 0x1e4   :  { %3582 = vmatpush3.bf16.msra.mxu0 %v535_v32 }
 0x1e5   :  { %3583 = vmatprep.subr.bf16.mxu0 %v5275_v28 }
 0x1e8   :  { %3584 = vmatpush3.bf16.msra.mxu0 %v536_v33 }
 0x1e9   :  { %3585 = vmatprep.subr.bf16.mxu0 %v5275_v28 }
 0x1ec   :  { %3586 = vmatpush3.bf16.msra.mxu0 %v537_v34 }
 0x1ed   :  { %3587 = vmatprep.subr.bf16.mxu0 %v5275_v28 }
 0x1f0   :  { %3588 = vmatpush3.bf16.msra.mxu0 %v538_v35 }
 0x1f1   :  { %3589 = vmatprep.subr.bf16.mxu0 %v5275_v28 }
 0x1f4   :  { %3590 = vmatpush3.bf16.msra.mxu0 %v539_v36 }
 0x1f7   :  { %3592 = vmatmul.mubr.bf16.vlgmr.msra.gmra.mrb[0].mxu0 %v531_v37 }
 0x2ca   :  { %v574_v38 = vpop.f32.mrb[0].mxu0 }
 0x2cb   :  { %v3593_v39 = vpop.f32.mrb[1].mxu0  ;;  %v590_v41 = vmul.f32 %v574_v38, %v574_v38 }
 0x2cc   :  { %v577_v40 = vpop.f32.mrb[2].mxu0 }
 0x2cd   :  { %v581_v42 = vadd.f32 %v577_v40, %v574_v38  ;;  %v591_v43 = vmul.f32 %v577_v40, %v577_v40  ;;  %v3594_v44 = vpop.f32.mrb[3].mxu0 }
 0x2cf   :  { %v582_v45 = vrot.slane %v581_v42, 4  ;;  %v592_v46 = vadd.f32 %v591_v43, %v590_v41 }
 0x2d1   :  { %v583_v47 = vadd.f32 %v582_v45, %v581_v42  ;;  %v593_v48 = vrot.slane %v592_v46, 4 }
 0x2d3   :  { %v584_v49 = vrot.slane %v583_v47, 2  ;;  %v594_v50 = vadd.f32 %v593_v48, %v592_v46 }
 0x2d5   :  { %v585_v51 = vadd.f32 %v584_v49, %v583_v47  ;;  %v595_v52 = vrot.slane %v594_v50, 2 }
 0x2d7   :  { %v586_v53 = vrot.slane %v585_v51, 1  ;;  %v596_v54 = vadd.f32 %v595_v52, %v594_v50 }
 0x2d9   :  { %v587_v56 = vadd.f32 %v586_v53, %v585_v51  ;;  %v597_v57 = vrot.slane %v596_v54, 1 }
 0x2db   :  { %v589_v58 = vmul.f32 %v4533_v55, %v587_v56  ;;  %v598_v59 = vadd.f32 %v597_v57, %v596_v54 }
 0x2dd   :  { %v599_v60 = vmul.f32 %v598_v59, %v4533_v55  ;;  %v600_v61 = vmul.f32 %v589_v58, %v589_v58 }
 0x2df   :  { %v601_v62 = vsub.f32 %v599_v60, %v600_v61 }
 0x2e1   :  { %v602_v63 = vmax.f32 %v601_v62, 0.0 }
 0x2e3   :  { %v603_v8 = vadd.f32 1e-05, %v602_v63 }
 0x2e5   :  { %3688 = vrsqrt.f32 %v603_v8 }
 0x2ef   :  { %v3689_v11 = vpop.eup %3688 }
 0x2f0   :  { %v605_v13 = vmul.f32 %v3689_v11, %v529_v9 }
 0x2f2   :  { %v606_v15 = vmul.f32 %v605_v13, %v589_v58  ;;  %v611_v17 = vrot.slane %v605_v13, %v4541_v10 }
 0x2f4   :  { %v607_v19 = vsub.f32 %v530_v14, %v606_v15  ;;  %v612_v20 = vmul.f32 %v611_v17, %v574_v38  ;;  %v613_v21 = vmul.f32 %v611_v17, %v577_v40 }
 0x2f6   :  { %v617_v22 = vrot.slane %v607_v19, %v4541_v10 }
 0x2f8   :  { %v618_v23 = vadd.f32 %v617_v22, %v612_v20  ;;  %v619_v24 = vadd.f32 %v617_v22, %v613_v21 }
 0x2fa   :  { %vm620_vm5 = vcmp.ge.f32.partialorder %v618_v23, 0.0  ;;  %vm621_vm6 = vcmp.ge.f32.partialorder %v619_v24, 0.0  ;;  %v622_v25 = vmul.f32 0.01, %v618_v23  ;;  %v623_v26 = vmul.f32 0.01, %v619_v24 }
 0x2fc   :  { %v624_v27 = vsel %vm620_vm5, %v618_v23, %v622_v25  ;;  %v625_v29 = vsel %vm621_vm6, %v619_v24, %v623_v26 }
 0x2fd   :  { %4042 = dma.done.wait [#allocation12 + $0x1], 2048 }
 0x2fe   :  { %4043 = vsyncadd [#allocation12 + $0x1], 4294965248  ;;  %v4104_v30 = vmov 0   ;;  %v640_v31 = vld [vmem:[#allocation3 + $0x8] sm:$0xff]  ;;  %v639_v32 = vld [vmem:[#allocation3] sm:$0xff]  ;;  %v3428_v47 = vpack.c.bf16 %v625_v29, %v624_v27 }
 0x2ff   :  { %687 = vmatprep.mubr.bf16.mxu1 %v4104_v30  ;;  %v642_v33 = vld [vmem:[#allocation3 + $0x18] sm:$0xff]  ;;  %655 = vmatprep.subr.bf16.mxu1 %v640_v31  ;;  %v641_v34 = vld [vmem:[#allocation3 + $0x10] sm:$0xff]  ;;  %v644_v35 = vld [vmem:[#allocation3 + $0x28] sm:$0xff] }
 0x300   :  { %656 = vmatpush1.bf16.msra.mxu1 %v639_v32  ;;  %v643_v36 = vld [vmem:[#allocation3 + $0x20] sm:$0xff]  ;;  %v646_v37 = vld [vmem:[#allocation3 + $0x38] sm:$0xff]  ;;  %v645_v38 = vld [vmem:[#allocation3 + $0x30] sm:$0xff] }
 0x301   :  { %657 = vmatprep.subr.bf16.mxu1 %v642_v33  ;;  %v648_v39 = vld [vmem:[#allocation3 + $0x48] sm:$0xff]  ;;  %v647_v40 = vld [vmem:[#allocation3 + $0x40] sm:$0xff]  ;;  %v650_v41 = vld [vmem:[#allocation3 + $0x58] sm:$0xff] }
 0x302   :  { %v649_v42 = vld [vmem:[#allocation3 + $0x50] sm:$0xff]  ;;  %v652_v43 = vld [vmem:[#allocation3 + $0x68] sm:$0xff]  ;;  %v651_v44 = vld [vmem:[#allocation3 + $0x60] sm:$0xff] }
 0x303   :  { %v654_v45 = vld [vmem:[#allocation3 + $0x78] sm:$0xff]  ;;  %v653_v46 = vld [vmem:[#allocation3 + $0x70] sm:$0xff]  ;;  %vm4552_vm7 = vmpackc.low %vm4516_vm1, %vm4512_vm0 }
 0x304   :  { %658 = vmatpush1.bf16.msra.mxu1 %v641_v34 }
 0x305   :  { %659 = vmatprep.subr.bf16.mxu1 %v644_v35 }
 0x308   :  { %660 = vmatpush1.bf16.msra.mxu1 %v643_v36 }
 0x309   :  { %661 = vmatprep.subr.bf16.mxu1 %v646_v37 }
 0x30c   :  { %662 = vmatpush1.bf16.msra.mxu1 %v645_v38 }
 0x30d   :  { %663 = vmatprep.subr.bf16.mxu1 %v648_v39 }
 0x310   :  { %664 = vmatpush1.bf16.msra.mxu1 %v647_v40 }
 0x311   :  { %665 = vmatprep.subr.bf16.mxu1 %v650_v41 }
 0x314   :  { %666 = vmatpush1.bf16.msra.mxu1 %v649_v42 }
 0x315   :  { %667 = vmatprep.subr.bf16.mxu1 %v652_v43 }
 0x318   :  { %668 = vmatpush1.bf16.msra.mxu1 %v651_v44 }
 0x319   :  { %669 = vmatprep.subr.bf16.mxu1 %v654_v45 }
 0x31c   :  { %670 = vmatpush1.bf16.msra.mxu1 %v653_v46 }
 0x31f   :  { %3429 = vmatmul.mubr.msk.bf16.vlgmr.msra.gmra.mrb[0].mxu1 %vm4552_vm7, %v3428_v47  ;;  %v4105_v47 = vmov 1966171168  }
 0x3f2   :  { %v4558_v49 = vpop.f32.mrb[0].mxu1 }
 0x3f3   :  { %v4560_v50 = vpop.f32.mrb[1].mxu1  ;;  %v714_v52 = vmul.f32 %v4558_v49, %v4558_v49 }
 0x3f4   :  { %v4562_v51 = vpop.f32.mrb[2].mxu1  ;;  %v715_v57 = vmul.f32 %v4560_v50, %v4560_v50 }
 0x3f5   :  { %v698_v53 = vadd.f32 %v4562_v51, %v4558_v49  ;;  %v716_v54 = vmul.f32 %v4562_v51, %v4562_v51  ;;  %v4570_v56 = vpop.f32.mrb[3].mxu1 }
 0x3f6   :  { %v705_v58 = vadd.f32 %v4570_v56, %v4560_v50  ;;  %v717_v59 = vmul.f32 %v4570_v56, %v4570_v56 }
 0x3f7   :  { %v699_v60 = vrot.slane %v698_v53, 4  ;;  %v718_v61 = vadd.f32 %v716_v54, %v714_v52  ;;  %v748_v52 = vunpack.c.l.s4 %v4105_v47 }
 0x3f8   :  { %v706_v62 = vrot.slane %v705_v58, 4  ;;  %v725_v63 = vadd.f32 %v717_v59, %v715_v57 }
 0x3f9   :  { %v700_v8 = vadd.f32 %v699_v60, %v698_v53  ;;  %v719_v9 = vrot.slane %v718_v61, 4  ;;  %v749_v53 = vunpack.c.0.s8 %v748_v52 }
 0x3fa   :  { %v707_v11 = vadd.f32 %v706_v62, %v705_v58  ;;  %v726_v13 = vrot.slane %v725_v63, 4 }
 0x3fb   :  { %v701_v14 = vrot.slane %v700_v8, 2  ;;  %v720_v15 = vadd.f32 %v719_v9, %v718_v61  ;;  %v4583_v57 = vsub.s32 %v749_v53, %v4508_v12  ;;  %v635_v61 = vld [vmem:[#allocation18] ss:$8 sm:$0x3] }
 0x3fc   :  { %v708_v17 = vrot.slane %v707_v11, 2  ;;  %v727_v19 = vadd.f32 %v726_v13, %v725_v63  ;;  %v4588_v63 = vsub.s32 1, %v4508_v12 }
 0x3fd   :  { %v702_v20 = vadd.f32 %v701_v14, %v700_v8  ;;  %v721_v21 = vrot.slane %v720_v15, 2 }
 0x3fe   :  { %v709_v22 = vadd.f32 %v708_v17, %v707_v11  ;;  %v728_v23 = vrot.slane %v727_v19, 2 }
 0x3ff   :  { %v703_v24 = vrot.slane %v702_v20, 1  ;;  %v722_v25 = vadd.f32 %v721_v21, %v720_v15 }
 0x400   :  { %v710_v26 = vrot.slane %v709_v22, 1  ;;  %v729_v27 = vadd.f32 %v728_v23, %v727_v19  ;;  %v637_v23 = vld [vmem:[#allocation18 + $0x1] ss:$8 sm:$0x3] }
 0x401   :  { %v704_v29 = vadd.f32 %v703_v24, %v702_v20  ;;  %v723_v30 = vrot.slane %v722_v25, 1 }
 0x402   :  { %v711_v31 = vadd.f32 %v710_v26, %v709_v22  ;;  %v730_v32 = vrot.slane %v729_v27, 1 }
 0x403   :  { %v712_v33 = vmul.f32 %v704_v29, %v4533_v55  ;;  %v724_v34 = vadd.f32 %v723_v30, %v722_v25 }
 0x404   :  { %v713_v35 = vmul.f32 %v711_v31, %v4533_v55  ;;  %v731_v36 = vadd.f32 %v730_v32, %v729_v27 }
 0x405   :  { %v732_v37 = vmul.f32 %v724_v34, %v4533_v55  ;;  %v734_v38 = vmul.f32 %v712_v33, %v712_v33 }
 0x406   :  { %v733_v39 = vmul.f32 %v731_v36, %v4533_v55  ;;  %v735_v40 = vmul.f32 %v713_v35, %v713_v35 }
 0x407   :  { %v736_v41 = vsub.f32 %v732_v37, %v734_v38 }
 0x408   :  { %v737_v42 = vsub.f32 %v733_v39, %v735_v40 }
 0x409   :  { %v738_v43 = vmax.f32 %v736_v41, 0.0 }
 0x40a   :  { %v739_v44 = vmax.f32 %v737_v42, 0.0 }
 0x40b   :  { %v740_v45 = vadd.f32 1e-05, %v738_v43 }
 0x40c   :  { %v741_v46 = vadd.f32 1e-05, %v739_v44 }
 0x40d   :  { %3690 = vrsqrt.f32 %v740_v45 }
 0x40e   :  { %3692 = vrsqrt.f32 %v741_v46 }
 0x417   :  { %v3691_v54 = vpop.eup %3690 }
 0x418   :  { %v3693_v58 = vpop.eup %3692 }
 0x419   :  { %v746_v59 = vcombine.low %v3691_v54, %v3693_v58 }
 0x41b   :  { %v753_v60 = vrot.slane %v746_v59, %v4583_v57 }
 0x41d   :  { %v760_v62 = vrot.slane %v753_v60, %v4583_v57 }
 0x41f   :  { %v762_v8 = vmul.f32 %v760_v62, %v635_v61 }
 0x421   :  { %v767_v9 = vrot.slane %v762_v8, %v4541_v10  ;;  %v771_v11 = vrot.slane %v762_v8, %v4588_v63 }
 0x423   :  { %v774_v13 = vmul.f32 %v767_v9, %v712_v33  ;;  %v775_v14 = vmul.f32 %v771_v11, %v713_v35  ;;  %v795_v15 = vmul.f32 %v767_v9, %v4558_v49  ;;  %v796_v17 = vmul.f32 %v771_v11, %v4560_v50 }
 0x424   :  { %v797_v19 = vmul.f32 %v767_v9, %v4562_v51  ;;  %v798_v20 = vmul.f32 %v771_v11, %v4570_v56 }
 0x425   :  { %v778_v21 = vcombine.low %v774_v13, %v775_v14 }
 0x427   :  { %v785_v22 = vrot.slane %v778_v21, %v4583_v57 }
 0x429   :  { %v792_v24 = vrot.slane %v785_v22, %v4583_v57 }
 0x42b   :  { %v794_v25 = vsub.f32 %v637_v23, %v792_v24 }
 0x42d   :  { %v803_v26 = vrot.slane %v794_v25, %v4541_v10  ;;  %v807_v27 = vrot.slane %v794_v25, %v4588_v63 }
 0x42f   :  { %v810_v29 = vadd.f32 %v803_v26, %v795_v15  ;;  %v811_v30 = vadd.f32 %v807_v27, %v796_v17  ;;  %v812_v49 = vadd.f32 %v803_v26, %v797_v19  ;;  %v813_v31 = vadd.f32 %v807_v27, %v798_v20 }
 0x431   :  { %vm814_vm8 = vcmp.ge.f32.partialorder %v810_v29, 0.0  ;;  %vm815_vm9 = vcmp.ge.f32.partialorder %v811_v30, 0.0  ;;  %vm816_vm10 = vcmp.ge.f32.partialorder %v812_v49, 0.0  ;;  %vm817_vm11 = vcmp.ge.f32.partialorder %v813_v31, 0.0 }
 0x432   :  { %v818_v50 = vmul.f32 0.01, %v810_v29  ;;  %v819_v51 = vmul.f32 0.01, %v811_v30  ;;  %v820_v56 = vmul.f32 0.01, %v812_v49 }
 0x433   :  { %v821_v32 = vmul.f32 0.01, %v813_v31 }
 0x434   :  { %v4600_v33 = vsel %vm814_vm8, %v810_v29, %v818_v50  ;;  %v4602_v34 = vsel %vm815_vm9, %v811_v30, %v819_v51  ;;  %v4604_v35 = vsel %vm816_vm10, %v812_v49, %v820_v56 }
 0x435   :  { %v4606_v36 = vsel %vm817_vm11, %v813_v31, %v821_v32  ;;  %v826_v37 = vsel %vm4512_vm0, %v4600_v33, 0.0  ;;  %v827_v38 = vsel %vm4512_vm0, %v4602_v34, 0.0  ;;  %v828_v39 = vsel %vm4516_vm1, %v4604_v35, 0.0 }
 0x436   :  { %v829_v40 = vsel %vm4516_vm1, %v4606_v36, 0.0 }
 0x437   :  { %4044 = dma.done.wait [#allocation12 + $0x2], 4096 }
 0x438   :  { %4045 = vsyncadd [#allocation12 + $0x2], 4294963200  ;;  %v3431_v41 = vpack.c.bf16 %v4606_v36, %v4602_v34  ;;  %v840_v42 = vld [vmem:[#allocation4 + $0x8] sm:$0xff]  ;;  %v839_v43 = vld [vmem:[#allocation4] sm:$0xff]  ;;  %v3434_v49 = vpack.c.bf16 %v4604_v35, %v4600_v33 }
 0x439   :  { %v842_v44 = vld [vmem:[#allocation4 + $0x18] sm:$0xff]  ;;  %871 = vmatprep.subr.bf16.mxu0 %v840_v42  ;;  %v841_v45 = vld [vmem:[#allocation4 + $0x10] sm:$0xff]  ;;  %v844_v46 = vld [vmem:[#allocation4 + $0x28] sm:$0xff] }
 0x43a   :  { %3432 = vmatprep.mubr.msk.bf16.mxu0 %vm4552_vm7, %v3431_v41  ;;  %872 = vmatpush1.bf16.msra.mxu0 %v839_v43  ;;  %v843_v47 = vld [vmem:[#allocation4 + $0x20] sm:$0xff]  ;;  %v846_v52 = vld [vmem:[#allocation4 + $0x38] sm:$0xff]  ;;  %v845_v53 = vld [vmem:[#allocation4 + $0x30] sm:$0xff] }
 0x43b   :  { %873 = vmatprep.subr.bf16.mxu0 %v842_v44  ;;  %v848_v54 = vld [vmem:[#allocation4 + $0x48] sm:$0xff]  ;;  %v847_v58 = vld [vmem:[#allocation4 + $0x40] sm:$0xff]  ;;  %v850_v59 = vld [vmem:[#allocation4 + $0x58] sm:$0xff] }
 0x43c   :  { %v849_v60 = vld [vmem:[#allocation4 + $0x50] sm:$0xff]  ;;  %v852_v61 = vld [vmem:[#allocation4 + $0x68] sm:$0xff]  ;;  %v851_v62 = vld [vmem:[#allocation4 + $0x60] sm:$0xff] }
 0x43d   :  { %v854_v8 = vld [vmem:[#allocation4 + $0x78] sm:$0xff]  ;;  %v853_v9 = vld [vmem:[#allocation4 + $0x70] sm:$0xff]  ;;  %v856_v11 = vld [vmem:[#allocation4 + $0x88] sm:$0xff] }
 0x43e   :  { %874 = vmatpush1.bf16.msra.mxu0 %v841_v45  ;;  %v855_v13 = vld [vmem:[#allocation4 + $0x80] sm:$0xff]  ;;  %v858_v14 = vld [vmem:[#allocation4 + $0x98] sm:$0xff]  ;;  %v857_v15 = vld [vmem:[#allocation4 + $0x90] sm:$0xff] }
 0x43f   :  { %875 = vmatprep.subr.bf16.mxu0 %v844_v46  ;;  %v860_v17 = vld [vmem:[#allocation4 + $0xa8] sm:$0xff]  ;;  %v859_v19 = vld [vmem:[#allocation4 + $0xa0] sm:$0xff]  ;;  %v862_v20 = vld [vmem:[#allocation4 + $0xb8] sm:$0xff] }
 0x440   :  { %v861_v21 = vld [vmem:[#allocation4 + $0xb0] sm:$0xff]  ;;  %v864_v22 = vld [vmem:[#allocation4 + $0xc8] sm:$0xff]  ;;  %v863_v23 = vld [vmem:[#allocation4 + $0xc0] sm:$0xff] }
 0x441   :  { %v866_v24 = vld [vmem:[#allocation4 + $0xd8] sm:$0xff]  ;;  %v865_v25 = vld [vmem:[#allocation4 + $0xd0] sm:$0xff]  ;;  %v868_v26 = vld [vmem:[#allocation4 + $0xe8] sm:$0xff] }
 0x442   :  { %876 = vmatpush1.bf16.msra.mxu0 %v843_v47  ;;  %v867_v27 = vld [vmem:[#allocation4 + $0xe0] sm:$0xff]  ;;  %v870_v29 = vld [vmem:[#allocation4 + $0xf8] sm:$0xff]  ;;  %v869_v30 = vld [vmem:[#allocation4 + $0xf0] sm:$0xff] }
 0x443   :  { %877 = vmatprep.subr.bf16.mxu0 %v846_v52 }
 0x446   :  { %878 = vmatpush1.bf16.msra.mxu0 %v845_v53 }
 0x447   :  { %879 = vmatprep.subr.bf16.mxu0 %v848_v54 }
 0x44a   :  { %880 = vmatpush1.bf16.msra.mxu0 %v847_v58 }
 0x44b   :  { %881 = vmatprep.subr.bf16.mxu0 %v850_v59 }
 0x44e   :  { %882 = vmatpush1.bf16.msra.mxu0 %v849_v60 }
 0x44f   :  { %883 = vmatprep.subr.bf16.mxu0 %v852_v61 }
 0x452   :  { %884 = vmatpush1.bf16.msra.mxu0 %v851_v62 }
 0x453   :  { %885 = vmatprep.subr.bf16.mxu0 %v854_v8 }
 0x456   :  { %886 = vmatpush1.bf16.msra.mxu0 %v853_v9 }
 0x457   :  { %887 = vmatprep.subr.bf16.mxu0 %v856_v11 }
 0x45a   :  { %888 = vmatpush1.bf16.msra.mxu0 %v855_v13 }
 0x45b   :  { %889 = vmatprep.subr.bf16.mxu0 %v858_v14 }
 0x45e   :  { %890 = vmatpush1.bf16.msra.mxu0 %v857_v15 }
 0x45f   :  { %891 = vmatprep.subr.bf16.mxu0 %v860_v17 }
 0x462   :  { %892 = vmatpush1.bf16.msra.mxu0 %v859_v19 }
 0x463   :  { %893 = vmatprep.subr.bf16.mxu0 %v862_v20 }
 0x466   :  { %894 = vmatpush1.bf16.msra.mxu0 %v861_v21 }
 0x467   :  { %895 = vmatprep.subr.bf16.mxu0 %v864_v22 }
 0x46a   :  { %896 = vmatpush1.bf16.msra.mxu0 %v863_v23 }
 0x46b   :  { %897 = vmatprep.subr.bf16.mxu0 %v866_v24 }
 0x46e   :  { %898 = vmatpush1.bf16.msra.mxu0 %v865_v25 }
 0x46f   :  { %899 = vmatprep.subr.bf16.mxu0 %v868_v26 }
 0x472   :  { %900 = vmatpush1.bf16.msra.mxu0 %v867_v27 }
 0x473   :  { %901 = vmatprep.subr.bf16.mxu0 %v870_v29 }
 0x476   :  { %902 = vmatpush1.bf16.msra.mxu0 %v869_v30 }
 0x479   :  { %3435 = vmatmul.mubr.msk.bf16.vlgmr.msra.gmra.mrb[4].mxu0 %vm4552_vm7, %v3434_v49 }
 0x54c   :  { %v905_v31 = vpop.f32.mrb[4].mxu0 }
 0x54d   :  { %v907_v50 = vpop.f32.mrb[5].mxu0  ;;  %v930_v56 = vmul.f32 %v905_v31, %v905_v31 }
 0x54e   :  { %v909_v51 = vpop.f32.mrb[6].mxu0  ;;  %v931_v43 = vmul.f32 %v907_v50, %v907_v50 }
 0x54f   :  { %v914_v32 = vadd.f32 %v909_v51, %v905_v31  ;;  %v932_v41 = vmul.f32 %v909_v51, %v909_v51  ;;  %v911_v42 = vpop.f32.mrb[7].mxu0 }
 0x550   :  { %v921_v44 = vadd.f32 %v911_v42, %v907_v50  ;;  %v933_v45 = vmul.f32 %v911_v42, %v911_v42 }
 0x551   :  { %v915_v46 = vrot.slane %v914_v32, 4  ;;  %v934_v47 = vadd.f32 %v932_v41, %v930_v56 }
 0x552   :  { %v922_v52 = vrot.slane %v921_v44, 4  ;;  %v941_v53 = vadd.f32 %v933_v45, %v931_v43 }
 0x553   :  { %v916_v54 = vadd.f32 %v915_v46, %v914_v32  ;;  %v935_v58 = vrot.slane %v934_v47, 4 }
 0x554   :  { %v923_v59 = vadd.f32 %v922_v52, %v921_v44  ;;  %v942_v60 = vrot.slane %v941_v53, 4 }
 0x555   :  { %v917_v61 = vrot.slane %v916_v54, 2  ;;  %v936_v62 = vadd.f32 %v935_v58, %v934_v47 }
 0x556   :  { %v924_v8 = vrot.slane %v923_v59, 2  ;;  %v943_v9 = vadd.f32 %v942_v60, %v941_v53  ;;  %v834_v60 = vld [vmem:[#allocation20] ss:$8 sm:$0x3] }
 0x557   :  { %v918_v11 = vadd.f32 %v917_v61, %v916_v54  ;;  %v937_v13 = vrot.slane %v936_v62, 2 }
 0x558   :  { %v925_v14 = vadd.f32 %v924_v8, %v923_v59  ;;  %v944_v15 = vrot.slane %v943_v9, 2 }
 0x559   :  { %v919_v17 = vrot.slane %v918_v11, 1  ;;  %v938_v19 = vadd.f32 %v937_v13, %v936_v62 }
 0x55a   :  { %v926_v20 = vrot.slane %v925_v14, 1  ;;  %v945_v21 = vadd.f32 %v944_v15, %v943_v9 }
 0x55b   :  { %v920_v22 = vadd.f32 %v919_v17, %v918_v11  ;;  %v939_v23 = vrot.slane %v938_v19, 1 }
 0x55c   :  { %v927_v24 = vadd.f32 %v926_v20, %v925_v14  ;;  %v946_v25 = vrot.slane %v945_v21, 1 }
 0x55d   :  { %v928_v26 = vmul.f32 %v920_v22, %v4533_v55  ;;  %v940_v27 = vadd.f32 %v939_v23, %v938_v19  ;;  %v836_v22 = vld [vmem:[#allocation20 + $0x1] ss:$8 sm:$0x3] }
 0x55e   :  { %v929_v29 = vmul.f32 %v927_v24, %v4533_v55  ;;  %v947_v30 = vadd.f32 %v946_v25, %v945_v21 }
 0x55f   :  { %v948_v49 = vmul.f32 %v940_v27, %v4533_v55  ;;  %v950_v56 = vmul.f32 %v928_v26, %v928_v26 }
 0x560   :  { %v949_v32 = vmul.f32 %v947_v30, %v4533_v55  ;;  %v951_v41 = vmul.f32 %v929_v29, %v929_v29 }
 0x561   :  { %v952_v43 = vsub.f32 %v948_v49, %v950_v56 }
 0x562   :  { %v953_v44 = vsub.f32 %v949_v32, %v951_v41 }
 0x563   :  { %v954_v45 = vmax.f32 %v952_v43, 0.0 }
 0x564   :  { %v955_v46 = vmax.f32 %v953_v44, 0.0 }
 0x565   :  { %v956_v47 = vadd.f32 1e-05, %v954_v45 }
 0x566   :  { %v957_v52 = vadd.f32 1e-05, %v955_v46 }
 0x567   :  { %3694 = vrsqrt.f32 %v956_v47 }
 0x568   :  { %3696 = vrsqrt.f32 %v957_v52 }
 0x571   :  { %v3695_v53 = vpop.eup %3694 }
 0x572   :  { %v3697_v54 = vpop.eup %3696 }
 0x573   :  { %v962_v58 = vcombine.low %v3695_v53, %v3697_v54 }
 0x575   :  { %v969_v59 = vrot.slane %v962_v58, %v4583_v57 }
 0x577   :  { %v976_v61 = vrot.slane %v969_v59, %v4583_v57 }
 0x579   :  { %v978_v62 = vmul.f32 %v976_v61, %v834_v60 }
 0x57b   :  { %v983_v8 = vrot.slane %v978_v62, %v4541_v10  ;;  %v987_v9 = vrot.slane %v978_v62, %v4588_v63 }
 0x57d   :  { %v990_v11 = vmul.f32 %v983_v8, %v928_v26  ;;  %v991_v13 = vmul.f32 %v987_v9, %v929_v29  ;;  %v1011_v14 = vmul.f32 %v983_v8, %v905_v31  ;;  %v1012_v15 = vmul.f32 %v987_v9, %v907_v50 }
 0x57e   :  { %v1013_v17 = vmul.f32 %v983_v8, %v909_v51  ;;  %v1014_v19 = vmul.f32 %v987_v9, %v911_v42 }
 0x57f   :  { %v994_v20 = vcombine.low %v990_v11, %v991_v13 }
 0x581   :  { %v1001_v21 = vrot.slane %v994_v20, %v4583_v57 }
 0x583   :  { %v1008_v23 = vrot.slane %v1001_v21, %v4583_v57 }
 0x585   :  { %v1010_v24 = vsub.f32 %v836_v22, %v1008_v23 }
 0x587   :  { %v1019_v25 = vrot.slane %v1010_v24, %v4541_v10  ;;  %v1023_v27 = vrot.slane %v1010_v24, %v4588_v63 }
 0x589   :  { %v1026_v30 = vadd.f32 %v1019_v25, %v1011_v14  ;;  %v1027_v49 = vadd.f32 %v1023_v27, %v1012_v15  ;;  %v1028_v56 = vadd.f32 %v1019_v25, %v1013_v17  ;;  %v1029_v26 = vadd.f32 %v1023_v27, %v1014_v19 }
 0x58b   :  { %vm1030_vm12 = vcmp.ge.f32.partialorder %v1026_v30, 0.0  ;;  %vm1031_vm13 = vcmp.ge.f32.partialorder %v1027_v49, 0.0  ;;  %vm1032_vm14 = vcmp.ge.f32.partialorder %v1028_v56, 0.0  ;;  %vm1033_vm15 = vcmp.ge.f32.partialorder %v1029_v26, 0.0 }
 0x58c   :  { %v1034_v31 = vmul.f32 0.01, %v1026_v30  ;;  %v1035_v50 = vmul.f32 0.01, %v1027_v49  ;;  %v1036_v51 = vmul.f32 0.01, %v1028_v56 }
 0x58d   :  { %v1037_v42 = vmul.f32 0.01, %v1029_v26 }
 0x58e   :  { %v1038_v29 = vsel %vm1030_vm12, %v1026_v30, %v1034_v31  ;;  %v1039_v32 = vsel %vm1031_vm13, %v1027_v49, %v1035_v50  ;;  %v1040_v41 = vsel %vm1032_vm14, %v1028_v56, %v1036_v51 }
 0x58f   :  { %v1041_v43 = vsel %vm1033_vm15, %v1029_v26, %v1037_v42  ;;  %v4644_v44 = vadd.f32 %v1038_v29, %v826_v37  ;;  %v1043_v45 = vadd.f32 %v1039_v32, %v827_v38  ;;  %v4654_v46 = vadd.f32 %v1040_v41, %v828_v39 }
 0x590   :  { %v1045_v47 = vadd.f32 %v1041_v43, %v829_v40 }
 0x591   :  { %4046 = dma.done.wait [#allocation12 + $0x3], 8192 }
 0x592   :  { %4047 = vsyncadd [#allocation12 + $0x3], 4294959104  ;;  %v3437_v33 = vpack.c.bf16 %v1045_v47, %v1043_v45  ;;  %v1059_v34 = vld [vmem:[#allocation5 + $0x8] sm:$0xff]  ;;  %v1061_v37 = vld [vmem:[#allocation5 + $0x18] sm:$0xff] }
 0x593   :  { %v1058_v38 = vld [vmem:[#allocation5] sm:$0xff]  ;;  %1122 = vmatprep.subr.bf16.mxu1 %v1059_v34  ;;  %1165 = vmatprep.subr.bf16.mxu0 %v1061_v37  ;;  %v1060_v35 = vld [vmem:[#allocation5 + $0x10] sm:$0xff]  ;;  %v1063_v39 = vld [vmem:[#allocation5 + $0x28] sm:$0xff] }
 0x594   :  { %3438 = vmatprep.mubr.msk.bf16.mxu1 %vm4552_vm7, %v3437_v33  ;;  %3444 = vmatprep.mubr.msk.bf16.mxu0 %vm4552_vm7, %v3437_v33  ;;  %v1065_v52 = vld [vmem:[#allocation5 + $0x38] sm:$0xff]  ;;  %v1062_v36 = vld [vmem:[#allocation5 + $0x20] sm:$0xff]  ;;  %v1064_v40 = vld [vmem:[#allocation5 + $0x30] sm:$0xff] }
 0x595   :  { %1123 = vmatpush1.bf16.msra.mxu1 %v1058_v38  ;;  %1166 = vmatpush1.bf16.msra.mxu0 %v1060_v35  ;;  %v1067_v53 = vld [vmem:[#allocation5 + $0x48] sm:$0xff]  ;;  %v1069_v54 = vld [vmem:[#allocation5 + $0x58] sm:$0xff]  ;;  %v1066_v58 = vld [vmem:[#allocation5 + $0x40] sm:$0xff] }
 0x596   :  { %1124 = vmatprep.subr.bf16.mxu1 %v1063_v39  ;;  %1167 = vmatprep.subr.bf16.mxu0 %v1065_v52  ;;  %v1068_v59 = vld [vmem:[#allocation5 + $0x50] sm:$0xff]  ;;  %v1071_v60 = vld [vmem:[#allocation5 + $0x68] sm:$0xff]  ;;  %v1073_v61 = vld [vmem:[#allocation5 + $0x78] sm:$0xff] }
 0x597   :  { %v1070_v62 = vld [vmem:[#allocation5 + $0x60] sm:$0xff]  ;;  %v1072_v8 = vld [vmem:[#allocation5 + $0x70] sm:$0xff]  ;;  %v1075_v9 = vld [vmem:[#allocation5 + $0x88] sm:$0xff] }
 0x598   :  { %v1077_v11 = vld [vmem:[#allocation5 + $0x98] sm:$0xff]  ;;  %v1074_v13 = vld [vmem:[#allocation5 + $0x80] sm:$0xff]  ;;  %v1076_v14 = vld [vmem:[#allocation5 + $0x90] sm:$0xff] }
 0x599   :  { %1125 = vmatpush1.bf16.msra.mxu1 %v1062_v36  ;;  %1168 = vmatpush1.bf16.msra.mxu0 %v1064_v40  ;;  %v1079_v15 = vld [vmem:[#allocation5 + $0xa8] sm:$0xff]  ;;  %v1081_v17 = vld [vmem:[#allocation5 + $0xb8] sm:$0xff]  ;;  %v1078_v19 = vld [vmem:[#allocation5 + $0xa0] sm:$0xff] }
 0x59a   :  { %1126 = vmatprep.subr.bf16.mxu1 %v1067_v53  ;;  %1169 = vmatprep.subr.bf16.mxu0 %v1069_v54  ;;  %v1080_v20 = vld [vmem:[#allocation5 + $0xb0] sm:$0xff]  ;;  %v1083_v21 = vld [vmem:[#allocation5 + $0xc8] sm:$0xff]  ;;  %v1085_v22 = vld [vmem:[#allocation5 + $0xd8] sm:$0xff] }
 0x59b   :  { %v1082_v23 = vld [vmem:[#allocation5 + $0xc0] sm:$0xff]  ;;  %v1084_v24 = vld [vmem:[#allocation5 + $0xd0] sm:$0xff]  ;;  %v1087_v25 = vld [vmem:[#allocation5 + $0xe8] sm:$0xff] }
 0x59c   :  { %v1089_v27 = vld [vmem:[#allocation5 + $0xf8] sm:$0xff]  ;;  %v1086_v30 = vld [vmem:[#allocation5 + $0xe0] sm:$0xff]  ;;  %v1088_v49 = vld [vmem:[#allocation5 + $0xf0] sm:$0xff] }
 0x59d   :  { %1127 = vmatpush1.bf16.msra.mxu1 %v1066_v58  ;;  %1170 = vmatpush1.bf16.msra.mxu0 %v1068_v59  ;;  %v1091_v56 = vld [vmem:[#allocation5 + $0x108] sm:$0xff]  ;;  %v1093_v26 = vld [vmem:[#allocation5 + $0x118] sm:$0xff]  ;;  %v1090_v31 = vld [vmem:[#allocation5 + $0x100] sm:$0xff] }
 0x59e   :  { %1128 = vmatprep.subr.bf16.mxu1 %v1071_v60  ;;  %1171 = vmatprep.subr.bf16.mxu0 %v1073_v61  ;;  %v1092_v50 = vld [vmem:[#allocation5 + $0x110] sm:$0xff]  ;;  %v1095_v51 = vld [vmem:[#allocation5 + $0x128] sm:$0xff]  ;;  %v1097_v42 = vld [vmem:[#allocation5 + $0x138] sm:$0xff] }
 0x59f   :  { %v1094_v29 = vld [vmem:[#allocation5 + $0x120] sm:$0xff]  ;;  %v1096_v32 = vld [vmem:[#allocation5 + $0x130] sm:$0xff]  ;;  %v1099_v41 = vld [vmem:[#allocation5 + $0x148] sm:$0xff] }
 0x5a0   :  { %v1101_v43 = vld [vmem:[#allocation5 + $0x158] sm:$0xff]  ;;  %v1098_v45 = vld [vmem:[#allocation5 + $0x140] sm:$0xff]  ;;  %v1100_v47 = vld [vmem:[#allocation5 + $0x150] sm:$0xff] }
 0x5a1   :  { %1129 = vmatpush1.bf16.msra.mxu1 %v1070_v62  ;;  %1172 = vmatpush1.bf16.msra.mxu0 %v1072_v8  ;;  %v1103_v33 = vld [vmem:[#allocation5 + $0x168] sm:$0xff]  ;;  %v1105_v34 = vld [vmem:[#allocation5 + $0x178] sm:$0xff]  ;;  %v1102_v37 = vld [vmem:[#allocation5 + $0x160] sm:$0xff] }
 0x5a2   :  { %1130 = vmatprep.subr.bf16.mxu1 %v1075_v9  ;;  %1173 = vmatprep.subr.bf16.mxu0 %v1077_v11  ;;  %v1104_v38 = vld [vmem:[#allocation5 + $0x170] sm:$0xff]  ;;  %v1107_v35 = vld [vmem:[#allocation5 + $0x188] sm:$0xff]  ;;  %v1109_v39 = vld [vmem:[#allocation5 + $0x198] sm:$0xff] }
 0x5a3   :  { %v1106_v52 = vld [vmem:[#allocation5 + $0x180] sm:$0xff]  ;;  %v1108_v36 = vld [vmem:[#allocation5 + $0x190] sm:$0xff]  ;;  %v1111_v40 = vld [vmem:[#allocation5 + $0x1a8] sm:$0xff] }
 0x5a4   :  { %v1113_v53 = vld [vmem:[#allocation5 + $0x1b8] sm:$0xff]  ;;  %v1110_v54 = vld [vmem:[#allocation5 + $0x1a0] sm:$0xff]  ;;  %v1112_v58 = vld [vmem:[#allocation5 + $0x1b0] sm:$0xff] }
 0x5a5   :  { %1131 = vmatpush1.bf16.msra.mxu1 %v1074_v13  ;;  %1174 = vmatpush1.bf16.msra.mxu0 %v1076_v14  ;;  %v1115_v59 = vld [vmem:[#allocation5 + $0x1c8] sm:$0xff]  ;;  %v1117_v60 = vld [vmem:[#allocation5 + $0x1d8] sm:$0xff]  ;;  %v1114_v61 = vld [vmem:[#allocation5 + $0x1c0] sm:$0xff]  ;;  %v3440_v14 = vpack.c.bf16 %v4654_v46, %v4644_v44 }
 0x5a6   :  { %1132 = vmatprep.subr.bf16.mxu1 %v1079_v15  ;;  %1175 = vmatprep.subr.bf16.mxu0 %v1081_v17  ;;  %v1116_v62 = vld [vmem:[#allocation5 + $0x1d0] sm:$0xff]  ;;  %v1119_v8 = vld [vmem:[#allocation5 + $0x1e8] sm:$0xff]  ;;  %v1121_v9 = vld [vmem:[#allocation5 + $0x1f8] sm:$0xff] }
 0x5a7   :  { %v1118_v11 = vld [vmem:[#allocation5 + $0x1e0] sm:$0xff]  ;;  %v1120_v13 = vld [vmem:[#allocation5 + $0x1f0] sm:$0xff] }
 0x5a9   :  { %1133 = vmatpush1.bf16.msra.mxu1 %v1078_v19  ;;  %1176 = vmatpush1.bf16.msra.mxu0 %v1080_v20 }
 0x5aa   :  { %1134 = vmatprep.subr.bf16.mxu1 %v1083_v21  ;;  %1177 = vmatprep.subr.bf16.mxu0 %v1085_v22 }
 0x5ad   :  { %1135 = vmatpush1.bf16.msra.mxu1 %v1082_v23  ;;  %1178 = vmatpush1.bf16.msra.mxu0 %v1084_v24 }
 0x5ae   :  { %1136 = vmatprep.subr.bf16.mxu1 %v1087_v25  ;;  %1179 = vmatprep.subr.bf16.mxu0 %v1089_v27 }
 0x5b1   :  { %1137 = vmatpush1.bf16.msra.mxu1 %v1086_v30  ;;  %1180 = vmatpush1.bf16.msra.mxu0 %v1088_v49 }
 0x5b2   :  { %1138 = vmatprep.subr.bf16.mxu1 %v1091_v56  ;;  %1181 = vmatprep.subr.bf16.mxu0 %v1093_v26 }
 0x5b5   :  { %1139 = vmatpush1.bf16.msra.mxu1 %v1090_v31  ;;  %1182 = vmatpush1.bf16.msra.mxu0 %v1092_v50 }
 0x5b6   :  { %1140 = vmatprep.subr.bf16.mxu1 %v1095_v51  ;;  %1183 = vmatprep.subr.bf16.mxu0 %v1097_v42 }
 0x5b9   :  { %1141 = vmatpush1.bf16.msra.mxu1 %v1094_v29  ;;  %1184 = vmatpush1.bf16.msra.mxu0 %v1096_v32 }
 0x5ba   :  { %1142 = vmatprep.subr.bf16.mxu1 %v1099_v41  ;;  %1185 = vmatprep.subr.bf16.mxu0 %v1101_v43 }
 0x5bd   :  { %1143 = vmatpush1.bf16.msra.mxu1 %v1098_v45  ;;  %1186 = vmatpush1.bf16.msra.mxu0 %v1100_v47 }
 0x5be   :  { %1144 = vmatprep.subr.bf16.mxu1 %v1103_v33  ;;  %1187 = vmatprep.subr.bf16.mxu0 %v1105_v34 }
 0x5c1   :  { %1145 = vmatpush1.bf16.msra.mxu1 %v1102_v37  ;;  %1188 = vmatpush1.bf16.msra.mxu0 %v1104_v38 }
 0x5c2   :  { %1146 = vmatprep.subr.bf16.mxu1 %v1107_v35  ;;  %1189 = vmatprep.subr.bf16.mxu0 %v1109_v39 }
 0x5c5   :  { %1147 = vmatpush1.bf16.msra.mxu1 %v1106_v52  ;;  %1190 = vmatpush1.bf16.msra.mxu0 %v1108_v36 }
 0x5c6   :  { %1148 = vmatprep.subr.bf16.mxu1 %v1111_v40  ;;  %1191 = vmatprep.subr.bf16.mxu0 %v1113_v53 }
 0x5c9   :  { %1149 = vmatpush1.bf16.msra.mxu1 %v1110_v54  ;;  %1192 = vmatpush1.bf16.msra.mxu0 %v1112_v58 }
 0x5ca   :  { %1150 = vmatprep.subr.bf16.mxu1 %v1115_v59  ;;  %1193 = vmatprep.subr.bf16.mxu0 %v1117_v60 }
 0x5cd   :  { %1151 = vmatpush1.bf16.msra.mxu1 %v1114_v61  ;;  %1194 = vmatpush1.bf16.msra.mxu0 %v1116_v62 }
 0x5ce   :  { %1152 = vmatprep.subr.bf16.mxu1 %v1119_v8  ;;  %1195 = vmatprep.subr.bf16.mxu0 %v1121_v9 }
 0x5d1   :  { %1153 = vmatpush1.bf16.msra.mxu1 %v1118_v11  ;;  %1196 = vmatpush1.bf16.msra.mxu0 %v1120_v13 }
 0x5d4   :  { %3441 = vmatmul.mubr.msk.bf16.vlgmr.msra.gmra.mrb[4].mxu1 %vm4552_vm7, %v3440_v14  ;;  %3447 = vmatmul.mubr.msk.bf16.vlgmr.msra.gmra.mrb[8].mxu0 %vm4552_vm7, %v3440_v14 }
 0x6a7   :  { %v4670_v15 = vpop.f32.mrb[4].mxu1  ;;  %v4672_v17 = vpop.f32.mrb[8].mxu0 }
 0x6a8   :  { %v4674_v19 = vpop.f32.mrb[5].mxu1  ;;  %v4676_v20 = vpop.f32.mrb[9].mxu0  ;;  %v1240_v21 = vmul.f32 %v4670_v15, %v4670_v15  ;;  %v1242_v44 = vmul.f32 %v4672_v17, %v4672_v17 }
 0x6a9   :  { %v1241_v46 = vmul.f32 %v4674_v19, %v4674_v19  ;;  %v1243_v22 = vmul.f32 %v4676_v20, %v4676_v20  ;;  %v4686_v23 = vpop.f32.mrb[6].mxu1  ;;  %v4688_v24 = vpop.f32.mrb[10].mxu0 }
 0x6aa   :  { %v1208_v25 = vadd.f32 %v4686_v23, %v4670_v15  ;;  %v1244_v27 = vmul.f32 %v4686_v23, %v4686_v23  ;;  %v1222_v30 = vadd.f32 %v4688_v24, %v4672_v17  ;;  %v1246_v49 = vmul.f32 %v4688_v24, %v4688_v24  ;;  %v4698_v56 = vpop.f32.mrb[7].mxu1  ;;  %v4700_v26 = vpop.f32.mrb[11].mxu0 }
 0x6ab   :  { %v1215_v31 = vadd.f32 %v4698_v56, %v4674_v19  ;;  %v1245_v50 = vmul.f32 %v4698_v56, %v4698_v56  ;;  %v1229_v51 = vadd.f32 %v4700_v26, %v4676_v20  ;;  %v1247_v42 = vmul.f32 %v4700_v26, %v4700_v26 }
 0x6ac   :  { %v1209_v29 = vrot.slane %v1208_v25, 4  ;;  %v1248_v32 = vadd.f32 %v1244_v27, %v1240_v21  ;;  %v1223_v41 = vrot.slane %v1222_v30, 4  ;;  %v1262_v43 = vadd.f32 %v1246_v49, %v1242_v44 }
 0x6ad   :  { %v1216_v45 = vrot.slane %v1215_v31, 4  ;;  %v1255_v47 = vadd.f32 %v1245_v50, %v1241_v46  ;;  %v1230_v33 = vrot.slane %v1229_v51, 4  ;;  %v1269_v34 = vadd.f32 %v1247_v42, %v1243_v22 }
 0x6ae   :  { %v1210_v37 = vadd.f32 %v1209_v29, %v1208_v25  ;;  %v1249_v38 = vrot.slane %v1248_v32, 4  ;;  %v1224_v35 = vadd.f32 %v1223_v41, %v1222_v30  ;;  %v1263_v39 = vrot.slane %v1262_v43, 4 }
 0x6af   :  { %v1217_v52 = vadd.f32 %v1216_v45, %v1215_v31  ;;  %v1256_v36 = vrot.slane %v1255_v47, 4  ;;  %v1231_v40 = vadd.f32 %v1230_v33, %v1229_v51  ;;  %v1270_v53 = vrot.slane %v1269_v34, 4 }
 0x6b0   :  { %v1211_v54 = vrot.slane %v1210_v37, 2  ;;  %v1250_v58 = vadd.f32 %v1249_v38, %v1248_v32  ;;  %v1225_v59 = vrot.slane %v1224_v35, 2  ;;  %v1264_v60 = vadd.f32 %v1263_v39, %v1262_v43 }
 0x6b1   :  { %v1218_v61 = vrot.slane %v1217_v52, 2  ;;  %v1257_v62 = vadd.f32 %v1256_v36, %v1255_v47  ;;  %v1232_v8 = vrot.slane %v1231_v40, 2  ;;  %v1271_v9 = vadd.f32 %v1270_v53, %v1269_v34 }
 0x6b2   :  { %v1212_v11 = vadd.f32 %v1211_v54, %v1210_v37  ;;  %v1251_v13 = vrot.slane %v1250_v58, 2  ;;  %v1226_v14 = vadd.f32 %v1225_v59, %v1224_v35  ;;  %v1265_v21 = vrot.slane %v1264_v60, 2 }
 0x6b3   :  { %v1219_v44 = vadd.f32 %v1218_v61, %v1217_v52  ;;  %v1258_v46 = vrot.slane %v1257_v62, 2  ;;  %v1233_v22 = vadd.f32 %v1232_v8, %v1231_v40  ;;  %v1272_v25 = vrot.slane %v1271_v9, 2 }
 0x6b4   :  { %v1213_v27 = vrot.slane %v1212_v11, 1  ;;  %v1252_v30 = vadd.f32 %v1251_v13, %v1250_v58  ;;  %v1227_v49 = vrot.slane %v1226_v14, 1  ;;  %v1266_v31 = vadd.f32 %v1265_v21, %v1264_v60 }
 0x6b5   :  { %v1220_v50 = vrot.slane %v1219_v44, 1  ;;  %v1259_v51 = vadd.f32 %v1258_v46, %v1257_v62  ;;  %v1234_v42 = vrot.slane %v1233_v22, 1  ;;  %v1273_v29 = vadd.f32 %v1272_v25, %v1271_v9 }
 0x6b6   :  { %v1214_v32 = vadd.f32 %v1213_v27, %v1212_v11  ;;  %v1253_v41 = vrot.slane %v1252_v30, 1  ;;  %v1228_v43 = vadd.f32 %v1227_v49, %v1226_v14  ;;  %v1267_v45 = vrot.slane %v1266_v31, 1 }
 0x6b7   :  { %v1221_v47 = vadd.f32 %v1220_v50, %v1219_v44  ;;  %v1260_v33 = vrot.slane %v1259_v51, 1  ;;  %v1235_v34 = vadd.f32 %v1234_v42, %v1233_v22  ;;  %v1274_v37 = vrot.slane %v1273_v29, 1 }
 0x6b8   :  { %v1236_v38 = vmul.f32 %v1214_v32, %v4533_v55  ;;  %v1254_v35 = vadd.f32 %v1253_v41, %v1252_v30  ;;  %v1238_v39 = vmul.f32 %v1228_v43, %v4533_v55  ;;  %v1268_v52 = vadd.f32 %v1267_v45, %v1266_v31 }
 0x6b9   :  { %v1237_v36 = vmul.f32 %v1221_v47, %v4533_v55  ;;  %v1261_v40 = vadd.f32 %v1260_v33, %v1259_v51  ;;  %v1239_v53 = vmul.f32 %v1235_v34, %v4533_v55  ;;  %v1275_v54 = vadd.f32 %v1274_v37, %v1273_v29  ;;  %v1053_v34 = vld [vmem:[#allocation21] ss:$8 sm:$0xf] }
 0x6ba   :  { %v1276_v58 = vmul.f32 %v1254_v35, %v4533_v55  ;;  %v1280_v59 = vmul.f32 %v1236_v38, %v1236_v38  ;;  %v1278_v60 = vmul.f32 %v1268_v52, %v4533_v55  ;;  %v1282_v61 = vmul.f32 %v1238_v39, %v1238_v39 }
 0x6bb   :  { %v1277_v62 = vmul.f32 %v1261_v40, %v4533_v55  ;;  %v1281_v8 = vmul.f32 %v1237_v36, %v1237_v36  ;;  %v1279_v9 = vmul.f32 %v1275_v54, %v4533_v55  ;;  %v1283_v11 = vmul.f32 %v1239_v53, %v1239_v53 }
 0x6bc   :  { %v1284_v13 = vsub.f32 %v1276_v58, %v1280_v59  ;;  %v1286_v14 = vsub.f32 %v1278_v60, %v1282_v61  ;;  %v4722_v35 = vsub.s32 2, %v4508_v12  ;;  %v4725_v52 = vsub.s32 3, %v4508_v12 }
 0x6bd   :  { %v1285_v21 = vsub.f32 %v1277_v62, %v1281_v8  ;;  %v1287_v44 = vsub.f32 %v1279_v9, %v1283_v11 }
 0x6be   :  { %v1288_v46 = vmax.f32 %v1284_v13, 0.0  ;;  %v1290_v22 = vmax.f32 %v1286_v14, 0.0 }
 0x6bf   :  { %v1289_v25 = vmax.f32 %v1285_v21, 0.0  ;;  %v1291_v27 = vmax.f32 %v1287_v44, 0.0 }
 0x6c0   :  { %v1292_v30 = vadd.f32 1e-05, %v1288_v46  ;;  %v1294_v49 = vadd.f32 1e-05, %v1290_v22 }
 0x6c1   :  { %v1293_v31 = vadd.f32 1e-05, %v1289_v25  ;;  %v1295_v50 = vadd.f32 1e-05, %v1291_v27 }
 0x6c2   :  { %3698 = vrsqrt.f32 %v1292_v30 }
 0x6c3   :  { %3700 = vrsqrt.f32 %v1294_v49 }
 0x6c4   :  { %3702 = vrsqrt.f32 %v1293_v31 }
 0x6c5   :  { %3704 = vrsqrt.f32 %v1295_v50 }
 0x6cc   :  { %v3699_v51 = vpop.eup %3698 }
 0x6cd   :  { %v3701_v42 = vpop.eup %3700 }
 0x6ce   :  { %v3703_v29 = vpop.eup %3702 }
 0x6cf   :  { %v3705_v32 = vpop.eup %3704  ;;  %v1304_v41 = vcombine.low %v3699_v51, %v3703_v29 }
 0x6d0   :  { %v1305_v43 = vcombine.low %v3701_v42, %v3705_v32 }
 0x6d1   :  { %v1312_v45 = vrot.slane %v1304_v41, %v4583_v57 }
 0x6d2   :  { %v1319_v47 = vrot.slane %v1305_v43, %v4583_v57 }
 0x6d4   :  { %v1320_v33 = vcombine.low %v1312_v45, %v1319_v47 }
 0x6d6   :  { %v1327_v37 = vrot.slane %v1320_v33, %v4583_v57 }
 0x6d8   :  { %v1329_v40 = vmul.f32 %v1327_v37, %v1053_v34 }
 0x6da   :  { %v1334_v54 = vrot.slane %v1329_v40, %v4541_v10  ;;  %v1338_v58 = vrot.slane %v1329_v40, %v4588_v63  ;;  %v1342_v59 = vrot.slane %v1329_v40, %v4722_v35  ;;  %v1346_v60 = vrot.slane %v1329_v40, %v4725_v52 }
 0x6dc   :  { %v1351_v61 = vmul.f32 %v1334_v54, %v1236_v38  ;;  %v1352_v62 = vmul.f32 %v1338_v58, %v1237_v36  ;;  %v1353_v8 = vmul.f32 %v1342_v59, %v1238_v39  ;;  %v1354_v9 = vmul.f32 %v1346_v60, %v1239_v53 }
 0x6dd   :  { %v1385_v11 = vmul.f32 %v1334_v54, %v4670_v15  ;;  %v1386_v13 = vmul.f32 %v1338_v58, %v4674_v19  ;;  %v1387_v12 = vmul.f32 %v1342_v59, %v4672_v17  ;;  %v1388_v14 = vmul.f32 %v1346_v60, %v4676_v20  ;;  %v1055_v19 = vld [vmem:[#allocation21 + $0x1] ss:$8 sm:$0xf] }
 0x6de   :  { %v1359_v21 = vcombine.low %v1351_v61, %v1352_v62  ;;  %v1360_v44 = vcombine.low %v1353_v8, %v1354_v9  ;;  %v1389_v46 = vmul.f32 %v1334_v54, %v4686_v23  ;;  %v1390_v22 = vmul.f32 %v1338_v58, %v4698_v56 }
 0x6df   :  { %v1391_v25 = vmul.f32 %v1342_v59, %v4688_v24  ;;  %v1392_v38 = vmul.f32 %v1346_v60, %v4700_v26 }
 0x6e0   :  { %v1367_v39 = vrot.slane %v1359_v21, %v4583_v57  ;;  %v1374_v15 = vrot.slane %v1360_v44, %v4583_v57 }
 0x6e2   :  { %v1375_v36 = vcombine.low %v1367_v39, %v1374_v15 }
 0x6e4   :  { %v1382_v17 = vrot.slane %v1375_v36, %v4583_v57 }
 0x6e6   :  { %v1384_v53 = vsub.f32 %v1055_v19, %v1382_v17 }
 0x6e8   :  { %v1397_v20 = vrot.slane %v1384_v53, %v4541_v10  ;;  %v1401_v27 = vrot.slane %v1384_v53, %v4588_v63  ;;  %v1405_v23 = vrot.slane %v1384_v53, %v4722_v35  ;;  %v1409_v56 = vrot.slane %v1384_v53, %v4725_v52 }
 0x6ea   :  { %v1414_v24 = vadd.f32 %v1397_v20, %v1385_v11  ;;  %v1415_v30 = vadd.f32 %v1401_v27, %v1386_v13  ;;  %v1416_v26 = vadd.f32 %v1405_v23, %v1387_v12  ;;  %v1417_v49 = vadd.f32 %v1409_v56, %v1388_v14 }
 0x6eb   :  { %v1418_v31 = vadd.f32 %v1397_v20, %v1389_v46  ;;  %v1419_v50 = vadd.f32 %v1401_v27, %v1390_v22  ;;  %v1420_v51 = vadd.f32 %v1405_v23, %v1391_v25  ;;  %v1421_v42 = vadd.f32 %v1409_v56, %v1392_v38 }
 0x6ec   :  { %vm1422_vm2 = vcmp.ge.f32.partialorder %v1414_v24, 0.0  ;;  %vm1423_vm3 = vcmp.ge.f32.partialorder %v1415_v30, 0.0  ;;  %vm1424_vm5 = vcmp.ge.f32.partialorder %v1416_v26, 0.0  ;;  %vm1425_vm6 = vcmp.ge.f32.partialorder %v1417_v49, 0.0 }
 0x6ed   :  { %vm1426_vm8 = vcmp.ge.f32.partialorder %v1418_v31, 0.0  ;;  %vm1427_vm9 = vcmp.ge.f32.partialorder %v1419_v50, 0.0  ;;  %vm1428_vm10 = vcmp.ge.f32.partialorder %v1420_v51, 0.0  ;;  %vm1429_vm11 = vcmp.ge.f32.partialorder %v1421_v42, 0.0 }
 0x6ee   :  { %v1430_v29 = vmul.f32 0.01, %v1414_v24  ;;  %v1431_v32 = vmul.f32 0.01, %v1415_v30  ;;  %v1432_v41 = vmul.f32 0.01, %v1416_v26 }
 0x6ef   :  { %v1433_v43 = vmul.f32 0.01, %v1417_v49  ;;  %v1434_v45 = vmul.f32 0.01, %v1418_v31  ;;  %v1435_v47 = vmul.f32 0.01, %v1419_v50 }
 0x6f0   :  { %v1436_v33 = vmul.f32 0.01, %v1420_v51  ;;  %v1437_v34 = vmul.f32 0.01, %v1421_v42  ;;  %v4747_v37 = vsel %vm1422_vm2, %v1414_v24, %v1430_v29  ;;  %v4750_v40 = vsel %vm1423_vm3, %v1415_v30, %v1431_v32 }
 0x6f1   :  { %v4753_v54 = vsel %vm1424_vm5, %v1416_v26, %v1432_v41  ;;  %v4756_v58 = vsel %vm1425_vm6, %v1417_v49, %v1433_v43  ;;  %v4759_v59 = vsel %vm1426_vm8, %v1418_v31, %v1434_v45  ;;  %v4762_v60 = vsel %vm1427_vm9, %v1419_v50, %v1435_v47 }
 0x6f2   :  { %v4765_v61 = vsel %vm1428_vm10, %v1420_v51, %v1436_v33  ;;  %v4768_v62 = vsel %vm1429_vm11, %v1421_v42, %v1437_v34 }
 0x6f3   :  { %4048 = dma.done.wait [#allocation12 + $0x4], 16384 }
 0x6f4   :  { %4049 = vsyncadd [#allocation12 + $0x4], 4294950912  ;;  %v3449_v46 = vpack.c.bf16 %v4762_v60, %v4750_v40  ;;  %v1466_v22 = vld [vmem:[#allocation6 + $0x8] sm:$0xff]  ;;  %v1468_v25 = vld [vmem:[#allocation6 + $0x18] sm:$0xff] }
 0x6f5   :  { %v1465_v38 = vld [vmem:[#allocation6] sm:$0xff]  ;;  %1593 = vmatprep.subr.bf16.mxu1 %v1466_v22  ;;  %1679 = vmatprep.subr.bf16.mxu0 %v1468_v25  ;;  %v1467_v39 = vld [vmem:[#allocation6 + $0x10] sm:$0xff]  ;;  %v1470_v15 = vld [vmem:[#allocation6 + $0x28] sm:$0xff] }
 0x6f6   :  { %3450 = vmatprep.mubr.msk.bf16.mxu1 %vm4552_vm7, %v3449_v46  ;;  %3462 = vmatprep.mubr.msk.bf16.mxu0 %vm4552_vm7, %v3449_v46  ;;  %v1472_v36 = vld [vmem:[#allocation6 + $0x38] sm:$0xff]  ;;  %v1469_v19 = vld [vmem:[#allocation6 + $0x20] sm:$0xff]  ;;  %v1471_v17 = vld [vmem:[#allocation6 + $0x30] sm:$0xff] }
 0x6f7   :  { %1594 = vmatpush1.bf16.msra.mxu1 %v1465_v38  ;;  %1680 = vmatpush1.bf16.msra.mxu0 %v1467_v39  ;;  %v1474_v53 = vld [vmem:[#allocation6 + $0x48] sm:$0xff]  ;;  %v1476_v20 = vld [vmem:[#allocation6 + $0x58] sm:$0xff]  ;;  %v1473_v27 = vld [vmem:[#allocation6 + $0x40] sm:$0xff] }
 0x6f8   :  { %1595 = vmatprep.subr.bf16.mxu1 %v1470_v15  ;;  %1681 = vmatprep.subr.bf16.mxu0 %v1472_v36  ;;  %v1475_v23 = vld [vmem:[#allocation6 + $0x50] sm:$0xff]  ;;  %v1478_v56 = vld [vmem:[#allocation6 + $0x68] sm:$0xff]  ;;  %v1480_v24 = vld [vmem:[#allocation6 + $0x78] sm:$0xff] }
 0x6f9   :  { %v1477_v30 = vld [vmem:[#allocation6 + $0x60] sm:$0xff]  ;;  %v1479_v26 = vld [vmem:[#allocation6 + $0x70] sm:$0xff]  ;;  %v1482_v49 = vld [vmem:[#allocation6 + $0x88] sm:$0xff] }
 0x6fa   :  { %v1484_v31 = vld [vmem:[#allocation6 + $0x98] sm:$0xff]  ;;  %v1481_v50 = vld [vmem:[#allocation6 + $0x80] sm:$0xff]  ;;  %v1483_v51 = vld [vmem:[#allocation6 + $0x90] sm:$0xff] }
 0x6fb   :  { %1596 = vmatpush1.bf16.msra.mxu1 %v1469_v19  ;;  %1682 = vmatpush1.bf16.msra.mxu0 %v1471_v17  ;;  %v1486_v42 = vld [vmem:[#allocation6 + $0xa8] sm:$0xff]  ;;  %v1488_v29 = vld [vmem:[#allocation6 + $0xb8] sm:$0xff]  ;;  %v1485_v32 = vld [vmem:[#allocation6 + $0xa0] sm:$0xff] }
 0x6fc   :  { %1597 = vmatprep.subr.bf16.mxu1 %v1474_v53  ;;  %1683 = vmatprep.subr.bf16.mxu0 %v1476_v20  ;;  %v1487_v41 = vld [vmem:[#allocation6 + $0xb0] sm:$0xff]  ;;  %v1490_v43 = vld [vmem:[#allocation6 + $0xc8] sm:$0xff]  ;;  %v1492_v45 = vld [vmem:[#allocation6 + $0xd8] sm:$0xff] }
 0x6fd   :  { %v1489_v47 = vld [vmem:[#allocation6 + $0xc0] sm:$0xff]  ;;  %v1491_v33 = vld [vmem:[#allocation6 + $0xd0] sm:$0xff]  ;;  %v1494_v34 = vld [vmem:[#allocation6 + $0xe8] sm:$0xff] }
 0x6fe   :  { %v1496_v46 = vld [vmem:[#allocation6 + $0xf8] sm:$0xff]  ;;  %v1493_v22 = vld [vmem:[#allocation6 + $0xe0] sm:$0xff]  ;;  %v1495_v25 = vld [vmem:[#allocation6 + $0xf0] sm:$0xff] }
 0x6ff   :  { %1598 = vmatpush1.bf16.msra.mxu1 %v1473_v27  ;;  %1684 = vmatpush1.bf16.msra.mxu0 %v1475_v23  ;;  %v1498_v38 = vld [vmem:[#allocation6 + $0x108] sm:$0xff]  ;;  %v1500_v39 = vld [vmem:[#allocation6 + $0x118] sm:$0xff]  ;;  %v1497_v15 = vld [vmem:[#allocation6 + $0x100] sm:$0xff] }
 0x700   :  { %1599 = vmatprep.subr.bf16.mxu1 %v1478_v56  ;;  %1685 = vmatprep.subr.bf16.mxu0 %v1480_v24  ;;  %v1499_v36 = vld [vmem:[#allocation6 + $0x110] sm:$0xff]  ;;  %v1502_v19 = vld [vmem:[#allocation6 + $0x128] sm:$0xff]  ;;  %v1504_v17 = vld [vmem:[#allocation6 + $0x138] sm:$0xff] }
 0x701   :  { %v1501_v53 = vld [vmem:[#allocation6 + $0x120] sm:$0xff]  ;;  %v1503_v20 = vld [vmem:[#allocation6 + $0x130] sm:$0xff]  ;;  %v1506_v27 = vld [vmem:[#allocation6 + $0x148] sm:$0xff] }
 0x702   :  { %v1508_v23 = vld [vmem:[#allocation6 + $0x158] sm:$0xff]  ;;  %v1505_v56 = vld [vmem:[#allocation6 + $0x140] sm:$0xff]  ;;  %v1507_v24 = vld [vmem:[#allocation6 + $0x150] sm:$0xff] }
 0x703   :  { %1600 = vmatpush1.bf16.msra.mxu1 %v1477_v30  ;;  %1686 = vmatpush1.bf16.msra.mxu0 %v1479_v26  ;;  %v1510_v30 = vld [vmem:[#allocation6 + $0x168] sm:$0xff]  ;;  %v1512_v26 = vld [vmem:[#allocation6 + $0x178] sm:$0xff] }
 0x704   :  { %1601 = vmatprep.subr.bf16.mxu1 %v1482_v49  ;;  %1687 = vmatprep.subr.bf16.mxu0 %v1484_v31  ;;  %v1509_v49 = vld [vmem:[#allocation6 + $0x160] sm:$0xff]  ;;  %v1511_v31 = vld [vmem:[#allocation6 + $0x170] sm:$0xff] }
 0x707   :  { %1602 = vmatpush1.bf16.msra.mxu1 %v1481_v50  ;;  %1688 = vmatpush1.bf16.msra.mxu0 %v1483_v51  ;;  %v1514_v50 = vld [vmem:[#allocation6 + $0x188] sm:$0xff]  ;;  %v1516_v51 = vld [vmem:[#allocation6 + $0x198] sm:$0xff] }
 0x708   :  { %1603 = vmatprep.subr.bf16.mxu1 %v1486_v42  ;;  %1689 = vmatprep.subr.bf16.mxu0 %v1488_v29  ;;  %v1513_v42 = vld [vmem:[#allocation6 + $0x180] sm:$0xff]  ;;  %v1515_v29 = vld [vmem:[#allocation6 + $0x190] sm:$0xff] }
 0x70b   :  { %1604 = vmatpush1.bf16.msra.mxu1 %v1485_v32  ;;  %1690 = vmatpush1.bf16.msra.mxu0 %v1487_v41  ;;  %v1518_v32 = vld [vmem:[#allocation6 + $0x1a8] sm:$0xff]  ;;  %v1520_v41 = vld [vmem:[#allocation6 + $0x1b8] sm:$0xff] }
 0x70c   :  { %1605 = vmatprep.subr.bf16.mxu1 %v1490_v43  ;;  %1691 = vmatprep.subr.bf16.mxu0 %v1492_v45  ;;  %v1517_v43 = vld [vmem:[#allocation6 + $0x1a0] sm:$0xff]  ;;  %v1519_v45 = vld [vmem:[#allocation6 + $0x1b0] sm:$0xff] }
 0x70f   :  { %1606 = vmatpush1.bf16.msra.mxu1 %v1489_v47  ;;  %1692 = vmatpush1.bf16.msra.mxu0 %v1491_v33  ;;  %v1522_v47 = vld [vmem:[#allocation6 + $0x1c8] sm:$0xff]  ;;  %v1524_v33 = vld [vmem:[#allocation6 + $0x1d8] sm:$0xff] }
 0x710   :  { %1607 = vmatprep.subr.bf16.mxu1 %v1494_v34  ;;  %1693 = vmatprep.subr.bf16.mxu0 %v1496_v46  ;;  %v1521_v34 = vld [vmem:[#allocation6 + $0x1c0] sm:$0xff]  ;;  %v1523_v46 = vld [vmem:[#allocation6 + $0x1d0] sm:$0xff] }
 0x713   :  { %1608 = vmatpush1.bf16.msra.mxu1 %v1493_v22  ;;  %1694 = vmatpush1.bf16.msra.mxu0 %v1495_v25  ;;  %v1526_v22 = vld [vmem:[#allocation6 + $0x1e8] sm:$0xff]  ;;  %v1528_v25 = vld [vmem:[#allocation6 + $0x1f8] sm:$0xff] }
 0x714   :  { %1609 = vmatprep.subr.bf16.mxu1 %v1498_v38  ;;  %1695 = vmatprep.subr.bf16.mxu0 %v1500_v39  ;;  %v1525_v38 = vld [vmem:[#allocation6 + $0x1e0] sm:$0xff]  ;;  %v1527_v39 = vld [vmem:[#allocation6 + $0x1f0] sm:$0xff] }
 0x717   :  { %1610 = vmatpush1.bf16.msra.mxu1 %v1497_v15  ;;  %1696 = vmatpush1.bf16.msra.mxu0 %v1499_v36  ;;  %v1530_v15 = vld [vmem:[#allocation6 + $0x208] sm:$0xff]  ;;  %v1532_v36 = vld [vmem:[#allocation6 + $0x218] sm:$0xff] }
 0x718   :  { %1611 = vmatprep.subr.bf16.mxu1 %v1502_v19  ;;  %1697 = vmatprep.subr.bf16.mxu0 %v1504_v17  ;;  %v3452_v19 = vpack.c.bf16 %v4759_v59, %v4747_v37  ;;  %v1529_v17 = vld [vmem:[#allocation6 + $0x200] sm:$0xff] }
 0x71b   :  { %1612 = vmatpush1.bf16.msra.mxu1 %v1501_v53  ;;  %1698 = vmatpush1.bf16.msra.mxu0 %v1503_v20  ;;  %v1531_v53 = vld [vmem:[#allocation6 + $0x210] sm:$0xff]  ;;  %v1534_v20 = vld [vmem:[#allocation6 + $0x228] sm:$0xff] }
 0x71c   :  { %1613 = vmatprep.subr.bf16.mxu1 %v1506_v27  ;;  %1699 = vmatprep.subr.bf16.mxu0 %v1508_v23  ;;  %v1536_v27 = vld [vmem:[#allocation6 + $0x238] sm:$0xff]  ;;  %v3455_v23 = vpack.c.bf16 %v4768_v62, %v4756_v58 }
 0x71f   :  { %1614 = vmatpush1.bf16.msra.mxu1 %v1505_v56  ;;  %1700 = vmatpush1.bf16.msra.mxu0 %v1507_v24  ;;  %v1533_v56 = vld [vmem:[#allocation6 + $0x220] sm:$0xff]  ;;  %v1535_v24 = vld [vmem:[#allocation6 + $0x230] sm:$0xff] }
 0x720   :  { %1615 = vmatprep.subr.bf16.mxu1 %v1510_v30  ;;  %1701 = vmatprep.subr.bf16.mxu0 %v1512_v26  ;;  %v1538_v30 = vld [vmem:[#allocation6 + $0x248] sm:$0xff]  ;;  %v1540_v26 = vld [vmem:[#allocation6 + $0x258] sm:$0xff] }
 0x723   :  { %1616 = vmatpush1.bf16.msra.mxu1 %v1509_v49  ;;  %1702 = vmatpush1.bf16.msra.mxu0 %v1511_v31  ;;  %v1537_v49 = vld [vmem:[#allocation6 + $0x240] sm:$0xff]  ;;  %v1539_v31 = vld [vmem:[#allocation6 + $0x250] sm:$0xff] }
 0x724   :  { %1617 = vmatprep.subr.bf16.mxu1 %v1514_v50  ;;  %1703 = vmatprep.subr.bf16.mxu0 %v1516_v51  ;;  %v1542_v50 = vld [vmem:[#allocation6 + $0x268] sm:$0xff]  ;;  %v1544_v51 = vld [vmem:[#allocation6 + $0x278] sm:$0xff] }
 0x727   :  { %1618 = vmatpush1.bf16.msra.mxu1 %v1513_v42  ;;  %1704 = vmatpush1.bf16.msra.mxu0 %v1515_v29  ;;  %v1541_v42 = vld [vmem:[#allocation6 + $0x260] sm:$0xff]  ;;  %v1543_v29 = vld [vmem:[#allocation6 + $0x270] sm:$0xff] }
 0x728   :  { %1619 = vmatprep.subr.bf16.mxu1 %v1518_v32  ;;  %1705 = vmatprep.subr.bf16.mxu0 %v1520_v41  ;;  %v1546_v32 = vld [vmem:[#allocation6 + $0x288] sm:$0xff]  ;;  %v1548_v41 = vld [vmem:[#allocation6 + $0x298] sm:$0xff] }
 0x72b   :  { %1620 = vmatpush1.bf16.msra.mxu1 %v1517_v43  ;;  %1706 = vmatpush1.bf16.msra.mxu0 %v1519_v45  ;;  %v1545_v43 = vld [vmem:[#allocation6 + $0x280] sm:$0xff]  ;;  %v1547_v45 = vld [vmem:[#allocation6 + $0x290] sm:$0xff] }
 0x72c   :  { %1621 = vmatprep.subr.bf16.mxu1 %v1522_v47  ;;  %1707 = vmatprep.subr.bf16.mxu0 %v1524_v33  ;;  %v1550_v47 = vld [vmem:[#allocation6 + $0x2a8] sm:$0xff]  ;;  %v1552_v33 = vld [vmem:[#allocation6 + $0x2b8] sm:$0xff] }
 0x72f   :  { %1622 = vmatpush1.bf16.msra.mxu1 %v1521_v34  ;;  %1708 = vmatpush1.bf16.msra.mxu0 %v1523_v46  ;;  %v1549_v34 = vld [vmem:[#allocation6 + $0x2a0] sm:$0xff]  ;;  %v1551_v46 = vld [vmem:[#allocation6 + $0x2b0] sm:$0xff] }
 0x730   :  { %1623 = vmatprep.subr.bf16.mxu1 %v1526_v22  ;;  %1709 = vmatprep.subr.bf16.mxu0 %v1528_v25  ;;  %v1554_v22 = vld [vmem:[#allocation6 + $0x2c8] sm:$0xff]  ;;  %v1556_v25 = vld [vmem:[#allocation6 + $0x2d8] sm:$0xff] }
 0x733   :  { %1624 = vmatpush1.bf16.msra.mxu1 %v1525_v38  ;;  %1710 = vmatpush1.bf16.msra.mxu0 %v1527_v39  ;;  %v1553_v38 = vld [vmem:[#allocation6 + $0x2c0] sm:$0xff]  ;;  %v1555_v39 = vld [vmem:[#allocation6 + $0x2d0] sm:$0xff] }
 0x734   :  { %1636 = vmatprep.subr.bf16.mxu1 %v1530_v15  ;;  %1722 = vmatprep.subr.bf16.mxu0 %v1532_v36  ;;  %v1558_v15 = vld [vmem:[#allocation6 + $0x2e8] sm:$0xff]  ;;  %v1560_v36 = vld [vmem:[#allocation6 + $0x2f8] sm:$0xff] }
 0x736   :  { %3453 = vmatmul.mubr.msk.bf16.vlgmr.msra.gmra.mrb[8].mxu1 %vm4552_vm7, %v3452_v19  ;;  %3465 = vmatmul.mubr.msk.bf16.vlgmr.msra.gmra.mrb[12].mxu0 %vm4552_vm7, %v3452_v19  ;;  %v1557_v19 = vld [vmem:[#allocation6 + $0x2e0] sm:$0xff] }
 0x737   :  { %1637 = vmatpush1.bf16.msra.mxu1 %v1529_v17  ;;  %1723 = vmatpush1.bf16.msra.mxu0 %v1531_v53  ;;  %v1559_v17 = vld [vmem:[#allocation6 + $0x2f0] sm:$0xff]  ;;  %v1562_v53 = vld [vmem:[#allocation6 + $0x308] sm:$0xff] }
 0x738   :  { %1638 = vmatprep.subr.bf16.mxu1 %v1534_v20  ;;  %1724 = vmatprep.subr.bf16.mxu0 %v1536_v27  ;;  %v1564_v20 = vld [vmem:[#allocation6 + $0x318] sm:$0xff]  ;;  %v1561_v27 = vld [vmem:[#allocation6 + $0x300] sm:$0xff] }
 0x739   :  { %3456 = vmatprep.mubr.msk.bf16.mxu1 %vm4552_vm7, %v3455_v23  ;;  %3468 = vmatprep.mubr.msk.bf16.mxu0 %vm4552_vm7, %v3455_v23  ;;  %v1563_v23 = vld [vmem:[#allocation6 + $0x310] sm:$0xff] }
 0x73b   :  { %1639 = vmatpush1.bf16.msra.mxu1 %v1533_v56  ;;  %1725 = vmatpush1.bf16.msra.mxu0 %v1535_v24  ;;  %v1566_v56 = vld [vmem:[#allocation6 + $0x328] sm:$0xff]  ;;  %v1568_v24 = vld [vmem:[#allocation6 + $0x338] sm:$0xff] }
 0x73c   :  { %1640 = vmatprep.subr.bf16.mxu1 %v1538_v30  ;;  %1726 = vmatprep.subr.bf16.mxu0 %v1540_v26  ;;  %v1565_v30 = vld [vmem:[#allocation6 + $0x320] sm:$0xff]  ;;  %v1567_v26 = vld [vmem:[#allocation6 + $0x330] sm:$0xff] }
 0x73f   :  { %1641 = vmatpush1.bf16.msra.mxu1 %v1537_v49  ;;  %1727 = vmatpush1.bf16.msra.mxu0 %v1539_v31  ;;  %v1570_v49 = vld [vmem:[#allocation6 + $0x348] sm:$0xff]  ;;  %v1572_v31 = vld [vmem:[#allocation6 + $0x358] sm:$0xff] }
 0x740   :  { %1642 = vmatprep.subr.bf16.mxu1 %v1542_v50  ;;  %1728 = vmatprep.subr.bf16.mxu0 %v1544_v51  ;;  %v1569_v50 = vld [vmem:[#allocation6 + $0x340] sm:$0xff]  ;;  %v1571_v51 = vld [vmem:[#allocation6 + $0x350] sm:$0xff] }
 0x743   :  { %1643 = vmatpush1.bf16.msra.mxu1 %v1541_v42  ;;  %1729 = vmatpush1.bf16.msra.mxu0 %v1543_v29  ;;  %v1574_v42 = vld [vmem:[#allocation6 + $0x368] sm:$0xff]  ;;  %v1576_v29 = vld [vmem:[#allocation6 + $0x378] sm:$0xff] }
 0x744   :  { %1644 = vmatprep.subr.bf16.mxu1 %v1546_v32  ;;  %1730 = vmatprep.subr.bf16.mxu0 %v1548_v41  ;;  %v1573_v32 = vld [vmem:[#allocation6 + $0x360] sm:$0xff]  ;;  %v1575_v41 = vld [vmem:[#allocation6 + $0x370] sm:$0xff] }
 0x747   :  { %1645 = vmatpush1.bf16.msra.mxu1 %v1545_v43  ;;  %1731 = vmatpush1.bf16.msra.mxu0 %v1547_v45  ;;  %v1578_v43 = vld [vmem:[#allocation6 + $0x388] sm:$0xff]  ;;  %v1580_v45 = vld [vmem:[#allocation6 + $0x398] sm:$0xff] }
 0x748   :  { %1646 = vmatprep.subr.bf16.mxu1 %v1550_v47  ;;  %1732 = vmatprep.subr.bf16.mxu0 %v1552_v33  ;;  %v1577_v47 = vld [vmem:[#allocation6 + $0x380] sm:$0xff]  ;;  %v1579_v33 = vld [vmem:[#allocation6 + $0x390] sm:$0xff] }
 0x74b   :  { %1647 = vmatpush1.bf16.msra.mxu1 %v1549_v34  ;;  %1733 = vmatpush1.bf16.msra.mxu0 %v1551_v46  ;;  %v1582_v34 = vld [vmem:[#allocation6 + $0x3a8] sm:$0xff]  ;;  %v1584_v46 = vld [vmem:[#allocation6 + $0x3b8] sm:$0xff] }
 0x74c   :  { %1648 = vmatprep.subr.bf16.mxu1 %v1554_v22  ;;  %1734 = vmatprep.subr.bf16.mxu0 %v1556_v25  ;;  %v1581_v22 = vld [vmem:[#allocation6 + $0x3a0] sm:$0xff]  ;;  %v1583_v25 = vld [vmem:[#allocation6 + $0x3b0] sm:$0xff] }
 0x74f   :  { %1649 = vmatpush1.bf16.msra.mxu1 %v1553_v38  ;;  %1735 = vmatpush1.bf16.msra.mxu0 %v1555_v39  ;;  %v1586_v38 = vld [vmem:[#allocation6 + $0x3c8] sm:$0xff]  ;;  %v1588_v39 = vld [vmem:[#allocation6 + $0x3d8] sm:$0xff] }
 0x750   :  { %1650 = vmatprep.subr.bf16.mxu1 %v1558_v15  ;;  %1736 = vmatprep.subr.bf16.mxu0 %v1560_v36  ;;  %v1585_v15 = vld [vmem:[#allocation6 + $0x3c0] sm:$0xff]  ;;  %v1587_v36 = vld [vmem:[#allocation6 + $0x3d0] sm:$0xff] }
 0x753   :  { %1651 = vmatpush1.bf16.msra.mxu1 %v1557_v19  ;;  %1737 = vmatpush1.bf16.msra.mxu0 %v1559_v17  ;;  %v1590_v19 = vld [vmem:[#allocation6 + $0x3e8] sm:$0xff]  ;;  %v1592_v17 = vld [vmem:[#allocation6 + $0x3f8] sm:$0xff] }
 0x754   :  { %1652 = vmatprep.subr.bf16.mxu1 %v1562_v53  ;;  %1738 = vmatprep.subr.bf16.mxu0 %v1564_v20  ;;  %v1589_v53 = vld [vmem:[#allocation6 + $0x3e0] sm:$0xff]  ;;  %v1591_v20 = vld [vmem:[#allocation6 + $0x3f0] sm:$0xff] }
 0x757   :  { %1653 = vmatpush1.bf16.msra.mxu1 %v1561_v27  ;;  %1739 = vmatpush1.bf16.msra.mxu0 %v1563_v23  ;;  %v3458_v27 = vpack.c.bf16 %v4765_v61, %v4753_v54 }
 0x758   :  { %1654 = vmatprep.subr.bf16.mxu1 %v1566_v56  ;;  %1740 = vmatprep.subr.bf16.mxu0 %v1568_v24 }
 0x75b   :  { %1655 = vmatpush1.bf16.msra.mxu1 %v1565_v30  ;;  %1741 = vmatpush1.bf16.msra.mxu0 %v1567_v26 }
 0x75c   :  { %1656 = vmatprep.subr.bf16.mxu1 %v1570_v49  ;;  %1742 = vmatprep.subr.bf16.mxu0 %v1572_v31 }
 0x75f   :  { %1657 = vmatpush1.bf16.msra.mxu1 %v1569_v50  ;;  %1743 = vmatpush1.bf16.msra.mxu0 %v1571_v51 }
 0x760   :  { %1658 = vmatprep.subr.bf16.mxu1 %v1574_v42  ;;  %1744 = vmatprep.subr.bf16.mxu0 %v1576_v29 }
 0x763   :  { %1659 = vmatpush1.bf16.msra.mxu1 %v1573_v32  ;;  %1745 = vmatpush1.bf16.msra.mxu0 %v1575_v41 }
 0x764   :  { %1660 = vmatprep.subr.bf16.mxu1 %v1578_v43  ;;  %1746 = vmatprep.subr.bf16.mxu0 %v1580_v45 }
 0x767   :  { %1661 = vmatpush1.bf16.msra.mxu1 %v1577_v47  ;;  %1747 = vmatpush1.bf16.msra.mxu0 %v1579_v33 }
 0x768   :  { %1662 = vmatprep.subr.bf16.mxu1 %v1582_v34  ;;  %1748 = vmatprep.subr.bf16.mxu0 %v1584_v46 }
 0x76b   :  { %1663 = vmatpush1.bf16.msra.mxu1 %v1581_v22  ;;  %1749 = vmatpush1.bf16.msra.mxu0 %v1583_v25 }
 0x76c   :  { %1664 = vmatprep.subr.bf16.mxu1 %v1586_v38  ;;  %1750 = vmatprep.subr.bf16.mxu0 %v1588_v39 }
 0x76f   :  { %1665 = vmatpush1.bf16.msra.mxu1 %v1585_v15  ;;  %1751 = vmatpush1.bf16.msra.mxu0 %v1587_v36 }
 0x770   :  { %1666 = vmatprep.subr.bf16.mxu1 %v1590_v19  ;;  %1752 = vmatprep.subr.bf16.mxu0 %v1592_v17 }
 0x773   :  { %1667 = vmatpush1.bf16.msra.mxu1 %v1589_v53  ;;  %1753 = vmatpush1.bf16.msra.mxu0 %v1591_v20 }
 0x776   :  { %3459 = vmatmul.mubr.msk.bf16.vlgmr.msra.gmra.mrb[8].mxu1 %vm4552_vm7, %v3458_v27  ;;  %3471 = vmatmul.mubr.msk.bf16.vlgmr.msra.gmra.mrb[12].mxu0 %vm4552_vm7, %v3458_v27 }
 0x849   :  { %v4818_v23 = vpop.f32.mrb[8].mxu1  ;;  %v4820_v56 = vpop.f32.mrb[12].mxu0 }
 0x84a   :  { %v4822_v24 = vpop.f32.mrb[9].mxu1  ;;  %v4824_v30 = vpop.f32.mrb[13].mxu0  ;;  %v1797_v26 = vmul.f32 %v4818_v23, %v4818_v23  ;;  %v1799_v49 = vmul.f32 %v4820_v56, %v4820_v56 }
 0x84b   :  { %v1798_v31 = vmul.f32 %v4822_v24, %v4822_v24  ;;  %v1800_v50 = vmul.f32 %v4824_v30, %v4824_v30  ;;  %v4834_v51 = vpop.f32.mrb[10].mxu1  ;;  %v4836_v42 = vpop.f32.mrb[14].mxu0 }
 0x84c   :  { %v1765_v29 = vadd.f32 %v4834_v51, %v4818_v23  ;;  %v1801_v32 = vmul.f32 %v4834_v51, %v4834_v51  ;;  %v1779_v41 = vadd.f32 %v4836_v42, %v4820_v56  ;;  %v1803_v43 = vmul.f32 %v4836_v42, %v4836_v42  ;;  %v4846_v45 = vpop.f32.mrb[11].mxu1  ;;  %v4848_v47 = vpop.f32.mrb[15].mxu0 }
 0x84d   :  { %v1772_v33 = vadd.f32 %v4846_v45, %v4822_v24  ;;  %v1802_v34 = vmul.f32 %v4846_v45, %v4846_v45  ;;  %v1786_v46 = vadd.f32 %v4848_v47, %v4824_v30  ;;  %v1804_v22 = vmul.f32 %v4848_v47, %v4848_v47 }
 0x84e   :  { %v1766_v25 = vrot.slane %v1765_v29, 4  ;;  %v1805_v38 = vadd.f32 %v1801_v32, %v1797_v26  ;;  %v1780_v39 = vrot.slane %v1779_v41, 4  ;;  %v1819_v15 = vadd.f32 %v1803_v43, %v1799_v49 }
 0x84f   :  { %v1773_v36 = vrot.slane %v1772_v33, 4  ;;  %v1812_v19 = vadd.f32 %v1802_v34, %v1798_v31  ;;  %v1787_v17 = vrot.slane %v1786_v46, 4  ;;  %v1826_v53 = vadd.f32 %v1804_v22, %v1800_v50 }
 0x850   :  { %v1767_v20 = vadd.f32 %v1766_v25, %v1765_v29  ;;  %v1806_v27 = vrot.slane %v1805_v38, 4  ;;  %v1781_v28 = vadd.f32 %v1780_v39, %v1779_v41  ;;  %v1820_v44 = vrot.slane %v1819_v15, 4 }
 0x851   :  { %v1774_v21 = vadd.f32 %v1773_v36, %v1772_v33  ;;  %v1813_v14 = vrot.slane %v1812_v19, 4  ;;  %v1788_v12 = vadd.f32 %v1787_v17, %v1786_v46  ;;  %v1827_v13 = vrot.slane %v1826_v53, 4 }
 0x852   :  { %v1768_v11 = vrot.slane %v1767_v20, 2  ;;  %v1807_v9 = vadd.f32 %v1806_v27, %v1805_v38  ;;  %v1782_v8 = vrot.slane %v1781_v28, 2  ;;  %v1821_v7 = vadd.f32 %v1820_v44, %v1819_v15 }
 0x853   :  { %v1775_v6 = vrot.slane %v1774_v21, 2  ;;  %v1814_v26 = vadd.f32 %v1813_v14, %v1812_v19  ;;  %v1789_v32 = vrot.slane %v1788_v12, 2  ;;  %v1828_v49 = vadd.f32 %v1827_v13, %v1826_v53 }
 0x854   :  { %v1769_v43 = vadd.f32 %v1768_v11, %v1767_v20  ;;  %v1808_v31 = vrot.slane %v1807_v9, 2  ;;  %v1783_v34 = vadd.f32 %v1782_v8, %v1781_v28  ;;  %v1822_v50 = vrot.slane %v1821_v7, 2 }
 0x855   :  { %v1776_v29 = vadd.f32 %v1775_v6, %v1774_v21  ;;  %v1815_v22 = vrot.slane %v1814_v26, 2  ;;  %v1790_v41 = vadd.f32 %v1789_v32, %v1788_v12  ;;  %v1829_v25 = vrot.slane %v1828_v49, 2 }
 0x856   :  { %v1770_v33 = vrot.slane %v1769_v43, 1  ;;  %v1809_v39 = vadd.f32 %v1808_v31, %v1807_v9  ;;  %v1784_v46 = vrot.slane %v1783_v34, 1  ;;  %v1823_v36 = vadd.f32 %v1822_v50, %v1821_v7 }
 0x857   :  { %v1777_v17 = vrot.slane %v1776_v29, 1  ;;  %v1816_v38 = vadd.f32 %v1815_v22, %v1814_v26  ;;  %v1791_v27 = vrot.slane %v1790_v41, 1  ;;  %v1830_v44 = vadd.f32 %v1829_v25, %v1828_v49 }
 0x858   :  { %v1771_v15 = vadd.f32 %v1770_v33, %v1769_v43  ;;  %v1810_v14 = vrot.slane %v1809_v39, 1  ;;  %v1785_v19 = vadd.f32 %v1784_v46, %v1783_v34  ;;  %v1824_v13 = vrot.slane %v1823_v36, 1 }
 0x859   :  { %v1778_v11 = vadd.f32 %v1777_v17, %v1776_v29  ;;  %v1817_v53 = vrot.slane %v1816_v38, 1  ;;  %v1792_v28 = vadd.f32 %v1791_v27, %v1790_v41  ;;  %v1831_v8 = vrot.slane %v1830_v44, 1 }
 0x85a   :  { %v1793_v6 = vmul.f32 %v1771_v15, %v4533_v55  ;;  %v1811_v12 = vadd.f32 %v1810_v14, %v1809_v39  ;;  %v1795_v21 = vmul.f32 %v1785_v19, %v4533_v55  ;;  %v1825_v9 = vadd.f32 %v1824_v13, %v1823_v36 }
 0x85b   :  { %v1794_v7 = vmul.f32 %v1778_v11, %v4533_v55  ;;  %v1818_v20 = vadd.f32 %v1817_v53, %v1816_v38  ;;  %v1796_v26 = vmul.f32 %v1792_v28, %v4533_v55  ;;  %v1832_v32 = vadd.f32 %v1831_v8, %v1830_v44 }
 0x85c   :  { %v1833_v49 = vmul.f32 %v1811_v12, %v4533_v55  ;;  %v1837_v43 = vmul.f32 %v1793_v6, %v1793_v6  ;;  %v1835_v31 = vmul.f32 %v1825_v9, %v4533_v55  ;;  %v1839_v34 = vmul.f32 %v1795_v21, %v1795_v21 }
 0x85d   :  { %v1834_v50 = vmul.f32 %v1818_v20, %v4533_v55  ;;  %v1838_v29 = vmul.f32 %v1794_v7, %v1794_v7  ;;  %v1836_v22 = vmul.f32 %v1832_v32, %v4533_v55  ;;  %v1840_v41 = vmul.f32 %v1796_v26, %v1796_v26 }
 0x85e   :  { %v1841_v25 = vsub.f32 %v1833_v49, %v1837_v43  ;;  %v1843_v33 = vsub.f32 %v1835_v31, %v1839_v34  ;;  %v1458_v49 = vld [vmem:[#allocation23] ss:$8 sm:$0xf] }
 0x85f   :  { %v1842_v39 = vsub.f32 %v1834_v50, %v1838_v29  ;;  %v1844_v46 = vsub.f32 %v1836_v22, %v1840_v41 }
 0x860   :  { %v1845_v36 = vmax.f32 %v1841_v25, 0.0  ;;  %v1847_v17 = vmax.f32 %v1843_v33, 0.0 }
 0x861   :  { %v1846_v38 = vmax.f32 %v1842_v39, 0.0  ;;  %v1848_v27 = vmax.f32 %v1844_v46, 0.0 }
 0x862   :  { %v1849_v44 = vadd.f32 1e-05, %v1845_v36  ;;  %v1851_v15 = vadd.f32 1e-05, %v1847_v17 }
 0x863   :  { %v1850_v14 = vadd.f32 1e-05, %v1846_v38  ;;  %v1852_v19 = vadd.f32 1e-05, %v1848_v27 }
 0x864   :  { %3706 = vrsqrt.f32 %v1849_v44 }
 0x865   :  { %3708 = vrsqrt.f32 %v1851_v15 }
 0x866   :  { %3710 = vrsqrt.f32 %v1850_v14 }
 0x867   :  { %3712 = vrsqrt.f32 %v1852_v19 }
 0x86e   :  { %v3707_v13 = vpop.eup %3706 }
 0x86f   :  { %v3709_v11 = vpop.eup %3708 }
 0x870   :  { %v3711_v53 = vpop.eup %3710 }
 0x871   :  { %v3713_v28 = vpop.eup %3712  ;;  %v1861_v8 = vcombine.low %v3707_v13, %v3711_v53 }
 0x872   :  { %v1862_v12 = vcombine.low %v3709_v11, %v3713_v28 }
 0x873   :  { %v1869_v9 = vrot.slane %v1861_v8, %v4583_v57 }
 0x874   :  { %v1876_v20 = vrot.slane %v1862_v12, %v4583_v57 }
 0x876   :  { %v1877_v32 = vcombine.low %v1869_v9, %v1876_v20 }
 0x878   :  { %v1884_v43 = vrot.slane %v1877_v32, %v4583_v57 }
 0x87a   :  { %v1886_v31 = vmul.f32 %v1884_v43, %v1458_v49 }
 0x87c   :  { %v1891_v34 = vrot.slane %v1886_v31, %v4541_v10  ;;  %v1895_v50 = vrot.slane %v1886_v31, %v4588_v63  ;;  %v1899_v29 = vrot.slane %v1886_v31, %v4722_v35  ;;  %v1903_v22 = vrot.slane %v1886_v31, %v4725_v52 }
 0x87e   :  { %v1908_v41 = vmul.f32 %v1891_v34, %v1793_v6  ;;  %v1909_v25 = vmul.f32 %v1895_v50, %v1794_v7  ;;  %v1910_v33 = vmul.f32 %v1899_v29, %v1795_v21  ;;  %v1911_v39 = vmul.f32 %v1903_v22, %v1796_v26 }
 0x87f   :  { %v1942_v46 = vmul.f32 %v1891_v34, %v4818_v23  ;;  %v1943_v36 = vmul.f32 %v1895_v50, %v4822_v24  ;;  %v1944_v17 = vmul.f32 %v1899_v29, %v4820_v56  ;;  %v1945_v38 = vmul.f32 %v1903_v22, %v4824_v30  ;;  %v1460_v24 = vld [vmem:[#allocation23 + $0x1] ss:$8 sm:$0xf] }
 0x880   :  { %v1916_v27 = vcombine.low %v1908_v41, %v1909_v25  ;;  %v1917_v44 = vcombine.low %v1910_v33, %v1911_v39  ;;  %v1946_v15 = vmul.f32 %v1891_v34, %v4834_v51  ;;  %v1947_v14 = vmul.f32 %v1895_v50, %v4846_v45 }
 0x881   :  { %v1948_v19 = vmul.f32 %v1899_v29, %v4836_v42  ;;  %v1949_v6 = vmul.f32 %v1903_v22, %v4848_v47 }
 0x882   :  { %v1924_v21 = vrot.slane %v1916_v27, %v4583_v57  ;;  %v1931_v23 = vrot.slane %v1917_v44, %v4583_v57  ;;  %v5300_v44 = vsel %vm4512_vm0, %v4750_v40, 0.0  ;;  %v5304_v40 = vsel %vm4516_vm1, %v4762_v60, 0.0 }
 0x884   :  { %v1932_v7 = vcombine.low %v1924_v21, %v1931_v23 }
 0x886   :  { %v1939_v56 = vrot.slane %v1932_v7, %v4583_v57 }
 0x888   :  { %v1941_v26 = vsub.f32 %v1460_v24, %v1939_v56 }
 0x88a   :  { %v1954_v30 = vrot.slane %v1941_v26, %v4541_v10  ;;  %v1958_v13 = vrot.slane %v1941_v26, %v4588_v63  ;;  %v1962_v51 = vrot.slane %v1941_v26, %v4722_v35  ;;  %v1966_v45 = vrot.slane %v1941_v26, %v4725_v52 }
 0x88c   :  { %v1971_v42 = vadd.f32 %v1954_v30, %v1942_v46  ;;  %v1972_v11 = vadd.f32 %v1958_v13, %v1943_v36  ;;  %v1973_v47 = vadd.f32 %v1962_v51, %v1944_v17  ;;  %v1974_v53 = vadd.f32 %v1966_v45, %v1945_v38 }
 0x88d   :  { %v1975_v28 = vadd.f32 %v1954_v30, %v1946_v15  ;;  %v1976_v8 = vadd.f32 %v1958_v13, %v1947_v14  ;;  %v1977_v12 = vadd.f32 %v1962_v51, %v1948_v19  ;;  %v1978_v9 = vadd.f32 %v1966_v45, %v1949_v6 }
 0x88e   :  { %vm1979_vm12 = vcmp.ge.f32.partialorder %v1971_v42, 0.0  ;;  %vm1980_vm13 = vcmp.ge.f32.partialorder %v1972_v11, 0.0  ;;  %vm1981_vm14 = vcmp.ge.f32.partialorder %v1973_v47, 0.0  ;;  %vm1982_vm15 = vcmp.ge.f32.partialorder %v1974_v53, 0.0 }
 0x88f   :  { %vm1983_vm2 = vcmp.ge.f32.partialorder %v1975_v28, 0.0  ;;  %vm1984_vm3 = vcmp.ge.f32.partialorder %v1976_v8, 0.0  ;;  %vm1985_vm5 = vcmp.ge.f32.partialorder %v1977_v12, 0.0  ;;  %vm1986_vm6 = vcmp.ge.f32.partialorder %v1978_v9, 0.0 }
 0x890   :  { %v1987_v20 = vmul.f32 0.01, %v1971_v42  ;;  %v1988_v32 = vmul.f32 0.01, %v1972_v11  ;;  %v1989_v49 = vmul.f32 0.01, %v1973_v47 }
 0x891   :  { %v1990_v43 = vmul.f32 0.01, %v1974_v53  ;;  %v1991_v31 = vmul.f32 0.01, %v1975_v28  ;;  %v1992_v34 = vmul.f32 0.01, %v1976_v8 }
 0x892   :  { %v1993_v50 = vmul.f32 0.01, %v1977_v12  ;;  %v1994_v29 = vmul.f32 0.01, %v1978_v9  ;;  %v1995_v22 = vsel %vm1979_vm12, %v1971_v42, %v1987_v20  ;;  %v1996_v41 = vsel %vm1980_vm13, %v1972_v11, %v1988_v32 }
 0x893   :  { %v1997_v25 = vsel %vm1981_vm14, %v1973_v47, %v1989_v49  ;;  %v1998_v33 = vsel %vm1982_vm15, %v1974_v53, %v1990_v43  ;;  %v1999_v39 = vsel %vm1983_vm2, %v1975_v28, %v1991_v31  ;;  %v2000_v46 = vsel %vm1984_vm3, %v1976_v8, %v1992_v34 }
 0x894   :  { %v2001_v36 = vsel %vm1985_vm5, %v1977_v12, %v1993_v50  ;;  %v2002_v17 = vsel %vm1986_vm6, %v1978_v9, %v1994_v29  ;;  %v5299_v38 = vsel %vm4512_vm0, %v4747_v37, 0.0  ;;  %v4906_v15 = vadd.f32 %v1996_v41, %v5300_v44 }
 0x895   :  { %v4900_v27 = vadd.f32 %v1995_v22, %v5299_v38  ;;  %v5301_v14 = vsel %vm4512_vm0, %v4753_v54, 0.0  ;;  %v5302_v6 = vsel %vm4512_vm0, %v4756_v58, 0.0  ;;  %v5303_v37 = vsel %vm4516_vm1, %v4759_v59, 0.0 }
 0x896   :  { %v4912_v19 = vadd.f32 %v1997_v25, %v5301_v14  ;;  %v4918_v21 = vadd.f32 %v1998_v33, %v5302_v6  ;;  %v4924_v23 = vadd.f32 %v1999_v39, %v5303_v37  ;;  %v4930_v7 = vadd.f32 %v2000_v46, %v5304_v40 }
 0x897   :  { %v5305_v54 = vsel %vm4516_vm1, %v4765_v61, 0.0  ;;  %v5306_v58 = vsel %vm4516_vm1, %v4768_v62, 0.0 }
 0x898   :  { %v4936_v24 = vadd.f32 %v2001_v36, %v5305_v54  ;;  %v4942_v56 = vadd.f32 %v2002_v17, %v5306_v58 }
 0x899   :  { %4050 = dma.done.wait [#allocation12 + $0x5], 16384 }
 0x89a   :  { %4051 = vsyncadd [#allocation12 + $0x5], 4294950912  ;;  %v3473_v45 = vpack.c.bf16 %v4930_v7, %v4906_v15  ;;  %v2029_v42 = vld [vmem:[#allocation7 + $0x8] sm:$0xff]  ;;  %v2031_v11 = vld [vmem:[#allocation7 + $0x18] sm:$0xff] }
 0x89b   :  { %v2028_v47 = vld [vmem:[#allocation7] sm:$0xff]  ;;  %2156 = vmatprep.subr.bf16.mxu1 %v2029_v42  ;;  %2242 = vmatprep.subr.bf16.mxu0 %v2031_v11  ;;  %v2030_v53 = vld [vmem:[#allocation7 + $0x10] sm:$0xff]  ;;  %v2033_v28 = vld [vmem:[#allocation7 + $0x28] sm:$0xff] }
 0x89c   :  { %3474 = vmatprep.mubr.msk.bf16.mxu1 %vm4552_vm7, %v3473_v45  ;;  %3486 = vmatprep.mubr.msk.bf16.mxu0 %vm4552_vm7, %v3473_v45  ;;  %v2035_v8 = vld [vmem:[#allocation7 + $0x38] sm:$0xff]  ;;  %v2032_v12 = vld [vmem:[#allocation7 + $0x20] sm:$0xff]  ;;  %v2034_v9 = vld [vmem:[#allocation7 + $0x30] sm:$0xff] }
 0x89d   :  { %2157 = vmatpush1.bf16.msra.mxu1 %v2028_v47  ;;  %2243 = vmatpush1.bf16.msra.mxu0 %v2030_v53  ;;  %v2037_v20 = vld [vmem:[#allocation7 + $0x48] sm:$0xff]  ;;  %v2039_v32 = vld [vmem:[#allocation7 + $0x58] sm:$0xff]  ;;  %v2036_v49 = vld [vmem:[#allocation7 + $0x40] sm:$0xff] }
 0x89e   :  { %2158 = vmatprep.subr.bf16.mxu1 %v2033_v28  ;;  %2244 = vmatprep.subr.bf16.mxu0 %v2035_v8  ;;  %v2038_v43 = vld [vmem:[#allocation7 + $0x50] sm:$0xff]  ;;  %v2041_v31 = vld [vmem:[#allocation7 + $0x68] sm:$0xff]  ;;  %v2043_v34 = vld [vmem:[#allocation7 + $0x78] sm:$0xff] }
 0x89f   :  { %v2040_v50 = vld [vmem:[#allocation7 + $0x60] sm:$0xff]  ;;  %v2042_v29 = vld [vmem:[#allocation7 + $0x70] sm:$0xff]  ;;  %v2045_v22 = vld [vmem:[#allocation7 + $0x88] sm:$0xff] }
 0x8a0   :  { %v2047_v41 = vld [vmem:[#allocation7 + $0x98] sm:$0xff]  ;;  %v2044_v25 = vld [vmem:[#allocation7 + $0x80] sm:$0xff]  ;;  %v2046_v33 = vld [vmem:[#allocation7 + $0x90] sm:$0xff] }
 0x8a1   :  { %2159 = vmatpush1.bf16.msra.mxu1 %v2032_v12  ;;  %2245 = vmatpush1.bf16.msra.mxu0 %v2034_v9  ;;  %v2049_v39 = vld [vmem:[#allocation7 + $0xa8] sm:$0xff]  ;;  %v2051_v46 = vld [vmem:[#allocation7 + $0xb8] sm:$0xff]  ;;  %v2048_v36 = vld [vmem:[#allocation7 + $0xa0] sm:$0xff] }
 0x8a2   :  { %2160 = vmatprep.subr.bf16.mxu1 %v2037_v20  ;;  %2246 = vmatprep.subr.bf16.mxu0 %v2039_v32  ;;  %v2050_v17 = vld [vmem:[#allocation7 + $0xb0] sm:$0xff]  ;;  %v2053_v38 = vld [vmem:[#allocation7 + $0xc8] sm:$0xff]  ;;  %v2055_v44 = vld [vmem:[#allocation7 + $0xd8] sm:$0xff] }
 0x8a3   :  { %v2052_v14 = vld [vmem:[#allocation7 + $0xc0] sm:$0xff]  ;;  %v2054_v6 = vld [vmem:[#allocation7 + $0xd0] sm:$0xff]  ;;  %v2057_v37 = vld [vmem:[#allocation7 + $0xe8] sm:$0xff] }
 0x8a4   :  { %v2059_v40 = vld [vmem:[#allocation7 + $0xf8] sm:$0xff]  ;;  %v2056_v54 = vld [vmem:[#allocation7 + $0xe0] sm:$0xff]  ;;  %v2058_v58 = vld [vmem:[#allocation7 + $0xf0] sm:$0xff] }
 0x8a5   :  { %2161 = vmatpush1.bf16.msra.mxu1 %v2036_v49  ;;  %2247 = vmatpush1.bf16.msra.mxu0 %v2038_v43  ;;  %v2061_v45 = vld [vmem:[#allocation7 + $0x108] sm:$0xff]  ;;  %v2063_v42 = vld [vmem:[#allocation7 + $0x118] sm:$0xff]  ;;  %v2060_v11 = vld [vmem:[#allocation7 + $0x100] sm:$0xff] }
 0x8a6   :  { %2162 = vmatprep.subr.bf16.mxu1 %v2041_v31  ;;  %2248 = vmatprep.subr.bf16.mxu0 %v2043_v34  ;;  %v2062_v47 = vld [vmem:[#allocation7 + $0x110] sm:$0xff]  ;;  %v2065_v53 = vld [vmem:[#allocation7 + $0x128] sm:$0xff]  ;;  %v2067_v28 = vld [vmem:[#allocation7 + $0x138] sm:$0xff] }
 0x8a7   :  { %v2064_v8 = vld [vmem:[#allocation7 + $0x120] sm:$0xff]  ;;  %v2066_v12 = vld [vmem:[#allocation7 + $0x130] sm:$0xff]  ;;  %v2069_v9 = vld [vmem:[#allocation7 + $0x148] sm:$0xff] }
 0x8a8   :  { %v2071_v20 = vld [vmem:[#allocation7 + $0x158] sm:$0xff]  ;;  %v2068_v32 = vld [vmem:[#allocation7 + $0x140] sm:$0xff]  ;;  %v2070_v49 = vld [vmem:[#allocation7 + $0x150] sm:$0xff] }
 0x8a9   :  { %2163 = vmatpush1.bf16.msra.mxu1 %v2040_v50  ;;  %2249 = vmatpush1.bf16.msra.mxu0 %v2042_v29  ;;  %v2073_v43 = vld [vmem:[#allocation7 + $0x168] sm:$0xff]  ;;  %v2075_v31 = vld [vmem:[#allocation7 + $0x178] sm:$0xff]  ;;  %v2072_v34 = vld [vmem:[#allocation7 + $0x160] sm:$0xff] }
 0x8aa   :  { %2164 = vmatprep.subr.bf16.mxu1 %v2045_v22  ;;  %2250 = vmatprep.subr.bf16.mxu0 %v2047_v41  ;;  %v2074_v50 = vld [vmem:[#allocation7 + $0x170] sm:$0xff]  ;;  %v2077_v29 = vld [vmem:[#allocation7 + $0x188] sm:$0xff]  ;;  %v2079_v22 = vld [vmem:[#allocation7 + $0x198] sm:$0xff] }
 0x8ab   :  { %v2076_v41 = vld [vmem:[#allocation7 + $0x180] sm:$0xff] }
 0x8ad   :  { %2165 = vmatpush1.bf16.msra.mxu1 %v2044_v25  ;;  %2251 = vmatpush1.bf16.msra.mxu0 %v2046_v33  ;;  %v2078_v25 = vld [vmem:[#allocation7 + $0x190] sm:$0xff]  ;;  %v2081_v33 = vld [vmem:[#allocation7 + $0x1a8] sm:$0xff] }
 0x8ae   :  { %2166 = vmatprep.subr.bf16.mxu1 %v2049_v39  ;;  %2252 = vmatprep.subr.bf16.mxu0 %v2051_v46  ;;  %v2083_v39 = vld [vmem:[#allocation7 + $0x1b8] sm:$0xff]  ;;  %v2080_v46 = vld [vmem:[#allocation7 + $0x1a0] sm:$0xff] }
 0x8b1   :  { %2167 = vmatpush1.bf16.msra.mxu1 %v2048_v36  ;;  %2253 = vmatpush1.bf16.msra.mxu0 %v2050_v17  ;;  %v2082_v36 = vld [vmem:[#allocation7 + $0x1b0] sm:$0xff]  ;;  %v2085_v17 = vld [vmem:[#allocation7 + $0x1c8] sm:$0xff] }
 0x8b2   :  { %2168 = vmatprep.subr.bf16.mxu1 %v2053_v38  ;;  %2254 = vmatprep.subr.bf16.mxu0 %v2055_v44  ;;  %v2087_v38 = vld [vmem:[#allocation7 + $0x1d8] sm:$0xff]  ;;  %v2084_v44 = vld [vmem:[#allocation7 + $0x1c0] sm:$0xff] }
 0x8b5   :  { %2169 = vmatpush1.bf16.msra.mxu1 %v2052_v14  ;;  %2255 = vmatpush1.bf16.msra.mxu0 %v2054_v6  ;;  %v2086_v14 = vld [vmem:[#allocation7 + $0x1d0] sm:$0xff]  ;;  %v2089_v6 = vld [vmem:[#allocation7 + $0x1e8] sm:$0xff] }
 0x8b6   :  { %2170 = vmatprep.subr.bf16.mxu1 %v2057_v37  ;;  %2256 = vmatprep.subr.bf16.mxu0 %v2059_v40  ;;  %v2091_v37 = vld [vmem:[#allocation7 + $0x1f8] sm:$0xff]  ;;  %v2088_v40 = vld [vmem:[#allocation7 + $0x1e0] sm:$0xff] }
 0x8b9   :  { %2171 = vmatpush1.bf16.msra.mxu1 %v2056_v54  ;;  %2257 = vmatpush1.bf16.msra.mxu0 %v2058_v58  ;;  %v2090_v54 = vld [vmem:[#allocation7 + $0x1f0] sm:$0xff]  ;;  %v2093_v58 = vld [vmem:[#allocation7 + $0x208] sm:$0xff] }
 0x8ba   :  { %2172 = vmatprep.subr.bf16.mxu1 %v2061_v45  ;;  %2258 = vmatprep.subr.bf16.mxu0 %v2063_v42  ;;  %v2095_v45 = vld [vmem:[#allocation7 + $0x218] sm:$0xff]  ;;  %v3476_v42 = vpack.c.bf16 %v4924_v23, %v4900_v27 }
 0x8bd   :  { %2173 = vmatpush1.bf16.msra.mxu1 %v2060_v11  ;;  %2259 = vmatpush1.bf16.msra.mxu0 %v2062_v47  ;;  %v2092_v11 = vld [vmem:[#allocation7 + $0x200] sm:$0xff]  ;;  %v2094_v47 = vld [vmem:[#allocation7 + $0x210] sm:$0xff] }
 0x8be   :  { %2174 = vmatprep.subr.bf16.mxu1 %v2065_v53  ;;  %2260 = vmatprep.subr.bf16.mxu0 %v2067_v28  ;;  %v2097_v53 = vld [vmem:[#allocation7 + $0x228] sm:$0xff]  ;;  %v2099_v28 = vld [vmem:[#allocation7 + $0x238] sm:$0xff] }
 0x8c1   :  { %2175 = vmatpush1.bf16.msra.mxu1 %v2064_v8  ;;  %2261 = vmatpush1.bf16.msra.mxu0 %v2066_v12  ;;  %v3479_v8 = vpack.c.bf16 %v4942_v56, %v4918_v21  ;;  %v2096_v12 = vld [vmem:[#allocation7 + $0x220] sm:$0xff] }
 0x8c2   :  { %2176 = vmatprep.subr.bf16.mxu1 %v2069_v9  ;;  %2262 = vmatprep.subr.bf16.mxu0 %v2071_v20  ;;  %v2098_v9 = vld [vmem:[#allocation7 + $0x230] sm:$0xff]  ;;  %v2101_v20 = vld [vmem:[#allocation7 + $0x248] sm:$0xff] }
 0x8c5   :  { %2177 = vmatpush1.bf16.msra.mxu1 %v2068_v32  ;;  %2263 = vmatpush1.bf16.msra.mxu0 %v2070_v49  ;;  %v2103_v32 = vld [vmem:[#allocation7 + $0x258] sm:$0xff]  ;;  %v2100_v49 = vld [vmem:[#allocation7 + $0x240] sm:$0xff] }
 0x8c6   :  { %2178 = vmatprep.subr.bf16.mxu1 %v2073_v43  ;;  %2264 = vmatprep.subr.bf16.mxu0 %v2075_v31  ;;  %v2102_v43 = vld [vmem:[#allocation7 + $0x250] sm:$0xff]  ;;  %v2105_v31 = vld [vmem:[#allocation7 + $0x268] sm:$0xff] }
 0x8c9   :  { %2179 = vmatpush1.bf16.msra.mxu1 %v2072_v34  ;;  %2265 = vmatpush1.bf16.msra.mxu0 %v2074_v50  ;;  %v2107_v34 = vld [vmem:[#allocation7 + $0x278] sm:$0xff]  ;;  %v2104_v50 = vld [vmem:[#allocation7 + $0x260] sm:$0xff] }
 0x8ca   :  { %2180 = vmatprep.subr.bf16.mxu1 %v2077_v29  ;;  %2266 = vmatprep.subr.bf16.mxu0 %v2079_v22  ;;  %v2106_v29 = vld [vmem:[#allocation7 + $0x270] sm:$0xff]  ;;  %v2109_v22 = vld [vmem:[#allocation7 + $0x288] sm:$0xff] }
 0x8cd   :  { %2181 = vmatpush1.bf16.msra.mxu1 %v2076_v41  ;;  %2267 = vmatpush1.bf16.msra.mxu0 %v2078_v25  ;;  %v2111_v41 = vld [vmem:[#allocation7 + $0x298] sm:$0xff]  ;;  %v2108_v25 = vld [vmem:[#allocation7 + $0x280] sm:$0xff] }
 0x8ce   :  { %2182 = vmatprep.subr.bf16.mxu1 %v2081_v33  ;;  %2268 = vmatprep.subr.bf16.mxu0 %v2083_v39  ;;  %v2110_v33 = vld [vmem:[#allocation7 + $0x290] sm:$0xff]  ;;  %v2113_v39 = vld [vmem:[#allocation7 + $0x2a8] sm:$0xff] }
 0x8d1   :  { %2183 = vmatpush1.bf16.msra.mxu1 %v2080_v46  ;;  %2269 = vmatpush1.bf16.msra.mxu0 %v2082_v36  ;;  %v2115_v46 = vld [vmem:[#allocation7 + $0x2b8] sm:$0xff]  ;;  %v2112_v36 = vld [vmem:[#allocation7 + $0x2a0] sm:$0xff] }
 0x8d2   :  { %2184 = vmatprep.subr.bf16.mxu1 %v2085_v17  ;;  %2270 = vmatprep.subr.bf16.mxu0 %v2087_v38  ;;  %v2114_v17 = vld [vmem:[#allocation7 + $0x2b0] sm:$0xff]  ;;  %v2117_v38 = vld [vmem:[#allocation7 + $0x2c8] sm:$0xff] }
 0x8d5   :  { %2185 = vmatpush1.bf16.msra.mxu1 %v2084_v44  ;;  %2271 = vmatpush1.bf16.msra.mxu0 %v2086_v14  ;;  %v2119_v44 = vld [vmem:[#allocation7 + $0x2d8] sm:$0xff]  ;;  %v2116_v14 = vld [vmem:[#allocation7 + $0x2c0] sm:$0xff] }
 0x8d6   :  { %2186 = vmatprep.subr.bf16.mxu1 %v2089_v6  ;;  %2272 = vmatprep.subr.bf16.mxu0 %v2091_v37  ;;  %v2118_v6 = vld [vmem:[#allocation7 + $0x2d0] sm:$0xff]  ;;  %v2121_v37 = vld [vmem:[#allocation7 + $0x2e8] sm:$0xff] }
 0x8d9   :  { %2187 = vmatpush1.bf16.msra.mxu1 %v2088_v40  ;;  %2273 = vmatpush1.bf16.msra.mxu0 %v2090_v54  ;;  %v2123_v40 = vld [vmem:[#allocation7 + $0x2f8] sm:$0xff]  ;;  %v2120_v54 = vld [vmem:[#allocation7 + $0x2e0] sm:$0xff] }
 0x8da   :  { %2199 = vmatprep.subr.bf16.mxu1 %v2093_v58  ;;  %2285 = vmatprep.subr.bf16.mxu0 %v2095_v45  ;;  %v2122_v58 = vld [vmem:[#allocation7 + $0x2f0] sm:$0xff]  ;;  %v2125_v45 = vld [vmem:[#allocation7 + $0x308] sm:$0xff] }
 0x8dc   :  { %3477 = vmatmul.mubr.msk.bf16.vlgmr.msra.gmra.mrb[12].mxu1 %vm4552_vm7, %v3476_v42  ;;  %3489 = vmatmul.mubr.msk.bf16.vlgmr.msra.gmra.mrb[16].mxu0 %vm4552_vm7, %v3476_v42  ;;  %v2127_v42 = vld [vmem:[#allocation7 + $0x318] sm:$0xff] }
 0x8dd   :  { %2200 = vmatpush1.bf16.msra.mxu1 %v2092_v11  ;;  %2286 = vmatpush1.bf16.msra.mxu0 %v2094_v47  ;;  %v2124_v11 = vld [vmem:[#allocation7 + $0x300] sm:$0xff]  ;;  %v2126_v47 = vld [vmem:[#allocation7 + $0x310] sm:$0xff] }
 0x8de   :  { %2201 = vmatprep.subr.bf16.mxu1 %v2097_v53  ;;  %2287 = vmatprep.subr.bf16.mxu0 %v2099_v28  ;;  %v2129_v53 = vld [vmem:[#allocation7 + $0x328] sm:$0xff]  ;;  %v2131_v28 = vld [vmem:[#allocation7 + $0x338] sm:$0xff] }
 0x8df   :  { %3480 = vmatprep.mubr.msk.bf16.mxu1 %vm4552_vm7, %v3479_v8  ;;  %3492 = vmatprep.mubr.msk.bf16.mxu0 %vm4552_vm7, %v3479_v8  ;;  %v2128_v8 = vld [vmem:[#allocation7 + $0x320] sm:$0xff] }
 0x8e1   :  { %2202 = vmatpush1.bf16.msra.mxu1 %v2096_v12  ;;  %2288 = vmatpush1.bf16.msra.mxu0 %v2098_v9  ;;  %v2130_v12 = vld [vmem:[#allocation7 + $0x330] sm:$0xff]  ;;  %v2133_v9 = vld [vmem:[#allocation7 + $0x348] sm:$0xff] }
 0x8e2   :  { %2203 = vmatprep.subr.bf16.mxu1 %v2101_v20  ;;  %2289 = vmatprep.subr.bf16.mxu0 %v2103_v32  ;;  %v2135_v20 = vld [vmem:[#allocation7 + $0x358] sm:$0xff]  ;;  %v2132_v32 = vld [vmem:[#allocation7 + $0x340] sm:$0xff] }
 0x8e5   :  { %2204 = vmatpush1.bf16.msra.mxu1 %v2100_v49  ;;  %2290 = vmatpush1.bf16.msra.mxu0 %v2102_v43  ;;  %v2134_v49 = vld [vmem:[#allocation7 + $0x350] sm:$0xff]  ;;  %v2137_v43 = vld [vmem:[#allocation7 + $0x368] sm:$0xff] }
 0x8e6   :  { %2205 = vmatprep.subr.bf16.mxu1 %v2105_v31  ;;  %2291 = vmatprep.subr.bf16.mxu0 %v2107_v34  ;;  %v2139_v31 = vld [vmem:[#allocation7 + $0x378] sm:$0xff]  ;;  %v2136_v34 = vld [vmem:[#allocation7 + $0x360] sm:$0xff] }
 0x8e9   :  { %2206 = vmatpush1.bf16.msra.mxu1 %v2104_v50  ;;  %2292 = vmatpush1.bf16.msra.mxu0 %v2106_v29  ;;  %v2138_v50 = vld [vmem:[#allocation7 + $0x370] sm:$0xff]  ;;  %v2141_v29 = vld [vmem:[#allocation7 + $0x388] sm:$0xff] }
 0x8ea   :  { %2207 = vmatprep.subr.bf16.mxu1 %v2109_v22  ;;  %2293 = vmatprep.subr.bf16.mxu0 %v2111_v41  ;;  %v2143_v22 = vld [vmem:[#allocation7 + $0x398] sm:$0xff]  ;;  %v2140_v41 = vld [vmem:[#allocation7 + $0x380] sm:$0xff] }
 0x8ed   :  { %2208 = vmatpush1.bf16.msra.mxu1 %v2108_v25  ;;  %2294 = vmatpush1.bf16.msra.mxu0 %v2110_v33  ;;  %v2142_v25 = vld [vmem:[#allocation7 + $0x390] sm:$0xff]  ;;  %v2145_v33 = vld [vmem:[#allocation7 + $0x3a8] sm:$0xff] }
 0x8ee   :  { %2209 = vmatprep.subr.bf16.mxu1 %v2113_v39  ;;  %2295 = vmatprep.subr.bf16.mxu0 %v2115_v46  ;;  %v2147_v39 = vld [vmem:[#allocation7 + $0x3b8] sm:$0xff]  ;;  %v2144_v46 = vld [vmem:[#allocation7 + $0x3a0] sm:$0xff] }
 0x8f1   :  { %2210 = vmatpush1.bf16.msra.mxu1 %v2112_v36  ;;  %2296 = vmatpush1.bf16.msra.mxu0 %v2114_v17  ;;  %v2146_v36 = vld [vmem:[#allocation7 + $0x3b0] sm:$0xff]  ;;  %v2149_v17 = vld [vmem:[#allocation7 + $0x3c8] sm:$0xff] }
 0x8f2   :  { %2211 = vmatprep.subr.bf16.mxu1 %v2117_v38  ;;  %2297 = vmatprep.subr.bf16.mxu0 %v2119_v44  ;;  %v2151_v38 = vld [vmem:[#allocation7 + $0x3d8] sm:$0xff]  ;;  %v2148_v44 = vld [vmem:[#allocation7 + $0x3c0] sm:$0xff] }
 0x8f5   :  { %2212 = vmatpush1.bf16.msra.mxu1 %v2116_v14  ;;  %2298 = vmatpush1.bf16.msra.mxu0 %v2118_v6  ;;  %v2150_v14 = vld [vmem:[#allocation7 + $0x3d0] sm:$0xff]  ;;  %v2153_v6 = vld [vmem:[#allocation7 + $0x3e8] sm:$0xff] }
 0x8f6   :  { %2213 = vmatprep.subr.bf16.mxu1 %v2121_v37  ;;  %2299 = vmatprep.subr.bf16.mxu0 %v2123_v40  ;;  %v2155_v37 = vld [vmem:[#allocation7 + $0x3f8] sm:$0xff]  ;;  %v2152_v40 = vld [vmem:[#allocation7 + $0x3e0] sm:$0xff] }
 0x8f9   :  { %2214 = vmatpush1.bf16.msra.mxu1 %v2120_v54  ;;  %2300 = vmatpush1.bf16.msra.mxu0 %v2122_v58  ;;  %v2154_v54 = vld [vmem:[#allocation7 + $0x3f0] sm:$0xff]  ;;  %v3482_v58 = vpack.c.bf16 %v4936_v24, %v4912_v19 }
 0x8fa   :  { %2215 = vmatprep.subr.bf16.mxu1 %v2125_v45  ;;  %2301 = vmatprep.subr.bf16.mxu0 %v2127_v42 }
 0x8fd   :  { %2216 = vmatpush1.bf16.msra.mxu1 %v2124_v11  ;;  %2302 = vmatpush1.bf16.msra.mxu0 %v2126_v47 }
 0x8fe   :  { %2217 = vmatprep.subr.bf16.mxu1 %v2129_v53  ;;  %2303 = vmatprep.subr.bf16.mxu0 %v2131_v28 }
 0x901   :  { %2218 = vmatpush1.bf16.msra.mxu1 %v2128_v8  ;;  %2304 = vmatpush1.bf16.msra.mxu0 %v2130_v12 }
 0x902   :  { %2219 = vmatprep.subr.bf16.mxu1 %v2133_v9  ;;  %2305 = vmatprep.subr.bf16.mxu0 %v2135_v20 }
 0x905   :  { %2220 = vmatpush1.bf16.msra.mxu1 %v2132_v32  ;;  %2306 = vmatpush1.bf16.msra.mxu0 %v2134_v49 }
 0x906   :  { %2221 = vmatprep.subr.bf16.mxu1 %v2137_v43  ;;  %2307 = vmatprep.subr.bf16.mxu0 %v2139_v31 }
 0x909   :  { %2222 = vmatpush1.bf16.msra.mxu1 %v2136_v34  ;;  %2308 = vmatpush1.bf16.msra.mxu0 %v2138_v50 }
 0x90a   :  { %2223 = vmatprep.subr.bf16.mxu1 %v2141_v29  ;;  %2309 = vmatprep.subr.bf16.mxu0 %v2143_v22 }
 0x90d   :  { %2224 = vmatpush1.bf16.msra.mxu1 %v2140_v41  ;;  %2310 = vmatpush1.bf16.msra.mxu0 %v2142_v25 }
 0x90e   :  { %2225 = vmatprep.subr.bf16.mxu1 %v2145_v33  ;;  %2311 = vmatprep.subr.bf16.mxu0 %v2147_v39 }
 0x911   :  { %2226 = vmatpush1.bf16.msra.mxu1 %v2144_v46  ;;  %2312 = vmatpush1.bf16.msra.mxu0 %v2146_v36 }
 0x912   :  { %2227 = vmatprep.subr.bf16.mxu1 %v2149_v17  ;;  %2313 = vmatprep.subr.bf16.mxu0 %v2151_v38 }
 0x915   :  { %2228 = vmatpush1.bf16.msra.mxu1 %v2148_v44  ;;  %2314 = vmatpush1.bf16.msra.mxu0 %v2150_v14 }
 0x916   :  { %2229 = vmatprep.subr.bf16.mxu1 %v2153_v6  ;;  %2315 = vmatprep.subr.bf16.mxu0 %v2155_v37 }
 0x919   :  { %2230 = vmatpush1.bf16.msra.mxu1 %v2152_v40  ;;  %2316 = vmatpush1.bf16.msra.mxu0 %v2154_v54 }
 0x91c   :  { %3483 = vmatmul.mubr.msk.bf16.vlgmr.msra.gmra.mrb[12].mxu1 %vm4552_vm7, %v3482_v58  ;;  %3495 = vmatmul.mubr.msk.bf16.vlgmr.msra.gmra.mrb[16].mxu0 %vm4552_vm7, %v3482_v58 }
 0x9ef   :  { %v4992_v45 = vpop.f32.mrb[12].mxu1  ;;  %v4994_v42 = vpop.f32.mrb[16].mxu0 }
 0x9f0   :  { %v4996_v11 = vpop.f32.mrb[13].mxu1  ;;  %v4998_v47 = vpop.f32.mrb[17].mxu0  ;;  %v2360_v53 = vmul.f32 %v4992_v45, %v4992_v45  ;;  %v2362_v28 = vmul.f32 %v4994_v42, %v4994_v42 }
 0x9f1   :  { %v2361_v8 = vmul.f32 %v4996_v11, %v4996_v11  ;;  %v2363_v12 = vmul.f32 %v4998_v47, %v4998_v47  ;;  %v5008_v9 = vpop.f32.mrb[14].mxu1  ;;  %v5010_v20 = vpop.f32.mrb[18].mxu0 }
 0x9f2   :  { %v2328_v32 = vadd.f32 %v5008_v9, %v4992_v45  ;;  %v2364_v49 = vmul.f32 %v5008_v9, %v5008_v9  ;;  %v2342_v43 = vadd.f32 %v5010_v20, %v4994_v42  ;;  %v2366_v31 = vmul.f32 %v5010_v20, %v5010_v20  ;;  %v5020_v34 = vpop.f32.mrb[15].mxu1  ;;  %v5022_v50 = vpop.f32.mrb[19].mxu0 }
 0x9f3   :  { %v2335_v29 = vadd.f32 %v5020_v34, %v4996_v11  ;;  %v2365_v22 = vmul.f32 %v5020_v34, %v5020_v34  ;;  %v2349_v41 = vadd.f32 %v5022_v50, %v4998_v47  ;;  %v2367_v25 = vmul.f32 %v5022_v50, %v5022_v50 }
 0x9f4   :  { %v2329_v33 = vrot.slane %v2328_v32, 4  ;;  %v2368_v39 = vadd.f32 %v2364_v49, %v2360_v53  ;;  %v2343_v46 = vrot.slane %v2342_v43, 4  ;;  %v2382_v36 = vadd.f32 %v2366_v31, %v2362_v28 }
 0x9f5   :  { %v2336_v17 = vrot.slane %v2335_v29, 4  ;;  %v2375_v38 = vadd.f32 %v2365_v22, %v2361_v8  ;;  %v2350_v44 = vrot.slane %v2349_v41, 4  ;;  %v2389_v14 = vadd.f32 %v2367_v25, %v2363_v12 }
 0x9f6   :  { %v2330_v6 = vadd.f32 %v2329_v33, %v2328_v32  ;;  %v2369_v37 = vrot.slane %v2368_v39, 4  ;;  %v2344_v40 = vadd.f32 %v2343_v46, %v2342_v43  ;;  %v2383_v54 = vrot.slane %v2382_v36, 4 }
 0x9f7   :  { %v2337_v58 = vadd.f32 %v2336_v17, %v2335_v29  ;;  %v2376_v51 = vrot.slane %v2375_v38, 4  ;;  %v2351_v13 = vadd.f32 %v2350_v44, %v2349_v41  ;;  %v2390_v30 = vrot.slane %v2389_v14, 4 }
 0x9f8   :  { %v2331_v62 = vrot.slane %v2330_v6, 2  ;;  %v2370_v26 = vadd.f32 %v2369_v37, %v2368_v39  ;;  %v2345_v61 = vrot.slane %v2344_v40, 2  ;;  %v2384_v60 = vadd.f32 %v2383_v54, %v2382_v36 }
 0x9f9   :  { %v2338_v59 = vrot.slane %v2337_v58, 2  ;;  %v2377_v53 = vadd.f32 %v2376_v51, %v2375_v38  ;;  %v2352_v49 = vrot.slane %v2351_v13, 2  ;;  %v2391_v28 = vadd.f32 %v2390_v30, %v2389_v14 }
 0x9fa   :  { %v2332_v31 = vadd.f32 %v2331_v62, %v2330_v6  ;;  %v2371_v8 = vrot.slane %v2370_v26, 2  ;;  %v2346_v22 = vadd.f32 %v2345_v61, %v2344_v40  ;;  %v2385_v12 = vrot.slane %v2384_v60, 2 }
 0x9fb   :  { %v2339_v32 = vadd.f32 %v2338_v59, %v2337_v58  ;;  %v2378_v25 = vrot.slane %v2377_v53, 2  ;;  %v2353_v43 = vadd.f32 %v2352_v49, %v2351_v13  ;;  %v2392_v33 = vrot.slane %v2391_v28, 2 }
 0x9fc   :  { %v2333_v29 = vrot.slane %v2332_v31, 1  ;;  %v2372_v46 = vadd.f32 %v2371_v8, %v2370_v26  ;;  %v2347_v41 = vrot.slane %v2346_v22, 1  ;;  %v2386_v17 = vadd.f32 %v2385_v12, %v2384_v60 }
 0x9fd   :  { %v2340_v44 = vrot.slane %v2339_v32, 1  ;;  %v2379_v39 = vadd.f32 %v2378_v25, %v2377_v53  ;;  %v2354_v37 = vrot.slane %v2353_v43, 1  ;;  %v2393_v36 = vadd.f32 %v2392_v33, %v2391_v28 }
 0x9fe   :  { %v2334_v54 = vadd.f32 %v2333_v29, %v2332_v31  ;;  %v2373_v51 = vrot.slane %v2372_v46, 1  ;;  %v2348_v38 = vadd.f32 %v2347_v41, %v2346_v22  ;;  %v2387_v30 = vrot.slane %v2386_v17, 1 }
 0x9ff   :  { %v2341_v62 = vadd.f32 %v2340_v44, %v2339_v32  ;;  %v2380_v14 = vrot.slane %v2379_v39, 1  ;;  %v2355_v61 = vadd.f32 %v2354_v37, %v2353_v43  ;;  %v2394_v6 = vrot.slane %v2393_v36, 1 }
 0xa00   :  { %v2356_v59 = vmul.f32 %v2334_v54, %v4533_v55  ;;  %v2374_v13 = vadd.f32 %v2373_v51, %v2372_v46  ;;  %v2358_v40 = vmul.f32 %v2348_v38, %v4533_v55  ;;  %v2388_v26 = vadd.f32 %v2387_v30, %v2386_v17 }
 0xa01   :  { %v2357_v60 = vmul.f32 %v2341_v62, %v4533_v55  ;;  %v2381_v58 = vadd.f32 %v2380_v14, %v2379_v39  ;;  %v2359_v53 = vmul.f32 %v2355_v61, %v4533_v55  ;;  %v2395_v49 = vadd.f32 %v2394_v6, %v2393_v36 }
 0xa02   :  { %v2396_v28 = vmul.f32 %v2374_v13, %v4533_v55  ;;  %v2400_v31 = vmul.f32 %v2356_v59, %v2356_v59  ;;  %v2398_v8 = vmul.f32 %v2388_v26, %v4533_v55  ;;  %v2402_v22 = vmul.f32 %v2358_v40, %v2358_v40 }
 0xa03   :  { %v2397_v12 = vmul.f32 %v2381_v58, %v4533_v55  ;;  %v2401_v32 = vmul.f32 %v2357_v60, %v2357_v60  ;;  %v2399_v25 = vmul.f32 %v2395_v49, %v4533_v55  ;;  %v2403_v43 = vmul.f32 %v2359_v53, %v2359_v53 }
 0xa04   :  { %v2404_v33 = vsub.f32 %v2396_v28, %v2400_v31  ;;  %v2406_v29 = vsub.f32 %v2398_v8, %v2402_v22  ;;  %v2021_v28 = vld [vmem:[#allocation24] ss:$8 sm:$0xf] }
 0xa05   :  { %v2405_v46 = vsub.f32 %v2397_v12, %v2401_v32  ;;  %v2407_v41 = vsub.f32 %v2399_v25, %v2403_v43 }
 0xa06   :  { %v2408_v17 = vmax.f32 %v2404_v33, 0.0  ;;  %v2410_v44 = vmax.f32 %v2406_v29, 0.0 }
 0xa07   :  { %v2409_v39 = vmax.f32 %v2405_v46, 0.0  ;;  %v2411_v37 = vmax.f32 %v2407_v41, 0.0 }
 0xa08   :  { %v2412_v36 = vadd.f32 1e-05, %v2408_v17  ;;  %v2414_v54 = vadd.f32 1e-05, %v2410_v44 }
 0xa09   :  { %v2413_v51 = vadd.f32 1e-05, %v2409_v39  ;;  %v2415_v38 = vadd.f32 1e-05, %v2411_v37 }
 0xa0a   :  { %3714 = vrsqrt.f32 %v2412_v36 }
 0xa0b   :  { %3716 = vrsqrt.f32 %v2414_v54 }
 0xa0c   :  { %3718 = vrsqrt.f32 %v2413_v51 }
 0xa0d   :  { %3720 = vrsqrt.f32 %v2415_v38 }
 0xa14   :  { %v3715_v30 = vpop.eup %3714 }
 0xa15   :  { %v3717_v62 = vpop.eup %3716 }
 0xa16   :  { %v3719_v14 = vpop.eup %3718 }
 0xa17   :  { %v3721_v61 = vpop.eup %3720  ;;  %v2424_v6 = vcombine.low %v3715_v30, %v3719_v14 }
 0xa18   :  { %v2425_v13 = vcombine.low %v3717_v62, %v3721_v61 }
 0xa19   :  { %v2432_v26 = vrot.slane %v2424_v6, %v4583_v57 }
 0xa1a   :  { %v2439_v58 = vrot.slane %v2425_v13, %v4583_v57 }
 0xa1c   :  { %v2440_v49 = vcombine.low %v2432_v26, %v2439_v58 }
 0xa1e   :  { %v2447_v31 = vrot.slane %v2440_v49, %v4583_v57 }
 0xa20   :  { %v2449_v8 = vmul.f32 %v2447_v31, %v2021_v28 }
 0xa22   :  { %v2454_v22 = vrot.slane %v2449_v8, %v4541_v10  ;;  %v2458_v12 = vrot.slane %v2449_v8, %v4588_v63  ;;  %v2462_v32 = vrot.slane %v2449_v8, %v4722_v35  ;;  %v2466_v25 = vrot.slane %v2449_v8, %v4725_v52 }
 0xa24   :  { %v2471_v43 = vmul.f32 %v2454_v22, %v2356_v59  ;;  %v2472_v33 = vmul.f32 %v2458_v12, %v2357_v60  ;;  %v2473_v29 = vmul.f32 %v2462_v32, %v2358_v40  ;;  %v2474_v46 = vmul.f32 %v2466_v25, %v2359_v53 }
 0xa25   :  { %v2505_v41 = vmul.f32 %v2454_v22, %v4992_v45  ;;  %v2506_v17 = vmul.f32 %v2458_v12, %v4996_v11  ;;  %v2507_v44 = vmul.f32 %v2462_v32, %v4994_v42  ;;  %v2508_v39 = vmul.f32 %v2466_v25, %v4998_v47  ;;  %v2023_v11 = vld [vmem:[#allocation24 + $0x1] ss:$8 sm:$0xf] }
 0xa26   :  { %v2479_v37 = vcombine.low %v2471_v43, %v2472_v33  ;;  %v2480_v36 = vcombine.low %v2473_v29, %v2474_v46  ;;  %v2509_v54 = vmul.f32 %v2454_v22, %v5008_v9  ;;  %v2510_v51 = vmul.f32 %v2458_v12, %v5020_v34 }
 0xa27   :  { %v2511_v38 = vmul.f32 %v2462_v32, %v5010_v20  ;;  %v2512_v59 = vmul.f32 %v2466_v25, %v5022_v50 }
 0xa28   :  { %v2487_v40 = vrot.slane %v2479_v37, %v4583_v57  ;;  %v2494_v45 = vrot.slane %v2480_v36, %v4583_v57  ;;  %v5309_v36 = vsel %vm4512_vm0, %v4912_v19, 0.0  ;;  %v5313_v19 = vsel %vm4516_vm1, %v4936_v24, 0.0 }
 0xa2a   :  { %v2495_v60 = vcombine.low %v2487_v40, %v2494_v45 }
 0xa2c   :  { %v2502_v42 = vrot.slane %v2495_v60, %v4583_v57 }
 0xa2e   :  { %v2504_v53 = vsub.f32 %v2023_v11, %v2502_v42 }
 0xa30   :  { %v2517_v47 = vrot.slane %v2504_v53, %v4541_v10  ;;  %v2521_v30 = vrot.slane %v2504_v53, %v4588_v63  ;;  %v2525_v9 = vrot.slane %v2504_v53, %v4722_v35  ;;  %v2529_v34 = vrot.slane %v2504_v53, %v4725_v52 }
 0xa32   :  { %v2534_v20 = vadd.f32 %v2517_v47, %v2505_v41  ;;  %v2535_v62 = vadd.f32 %v2521_v30, %v2506_v17  ;;  %v2536_v50 = vadd.f32 %v2525_v9, %v2507_v44  ;;  %v2537_v14 = vadd.f32 %v2529_v34, %v2508_v39 }
 0xa33   :  { %v2538_v61 = vadd.f32 %v2517_v47, %v2509_v54  ;;  %v2539_v6 = vadd.f32 %v2521_v30, %v2510_v51  ;;  %v2540_v13 = vadd.f32 %v2525_v9, %v2511_v38  ;;  %v2541_v26 = vadd.f32 %v2529_v34, %v2512_v59 }
 0xa34   :  { %vm2542_vm8 = vcmp.ge.f32.partialorder %v2534_v20, 0.0  ;;  %vm2543_vm9 = vcmp.ge.f32.partialorder %v2535_v62, 0.0  ;;  %vm2544_vm10 = vcmp.ge.f32.partialorder %v2536_v50, 0.0  ;;  %vm2545_vm11 = vcmp.ge.f32.partialorder %v2537_v14, 0.0 }
 0xa35   :  { %vm2546_vm12 = vcmp.ge.f32.partialorder %v2538_v61, 0.0  ;;  %vm2547_vm13 = vcmp.ge.f32.partialorder %v2539_v6, 0.0  ;;  %vm2548_vm14 = vcmp.ge.f32.partialorder %v2540_v13, 0.0  ;;  %vm2549_vm15 = vcmp.ge.f32.partialorder %v2541_v26, 0.0 }
 0xa36   :  { %v2550_v58 = vmul.f32 0.01, %v2534_v20  ;;  %v2551_v35 = vmul.f32 0.01, %v2535_v62  ;;  %v2552_v49 = vmul.f32 0.01, %v2536_v50 }
 0xa37   :  { %v2553_v52 = vmul.f32 0.01, %v2537_v14  ;;  %v2554_v28 = vmul.f32 0.01, %v2538_v61  ;;  %v2555_v31 = vmul.f32 0.01, %v2539_v6 }
 0xa38   :  { %v2556_v8 = vmul.f32 0.01, %v2540_v13  ;;  %v2557_v22 = vmul.f32 0.01, %v2541_v26  ;;  %v2558_v12 = vsel %vm2542_vm8, %v2534_v20, %v2550_v58  ;;  %v2559_v32 = vsel %vm2543_vm9, %v2535_v62, %v2551_v35 }
 0xa39   :  { %v2560_v25 = vsel %vm2544_vm10, %v2536_v50, %v2552_v49  ;;  %v2561_v43 = vsel %vm2545_vm11, %v2537_v14, %v2553_v52  ;;  %v2562_v33 = vsel %vm2546_vm12, %v2538_v61, %v2554_v28  ;;  %v2563_v29 = vsel %vm2547_vm13, %v2539_v6, %v2555_v31 }
 0xa3a   :  { %v2564_v46 = vsel %vm2548_vm14, %v2540_v13, %v2556_v8  ;;  %v2565_v41 = vsel %vm2549_vm15, %v2541_v26, %v2557_v22  ;;  %v5307_v17 = vsel %vm4512_vm0, %v4900_v27, 0.0  ;;  %v5308_v39 = vsel %vm4512_vm0, %v4906_v15, 0.0 }
 0xa3b   :  { %v5074_v44 = vadd.f32 %v2558_v12, %v5307_v17  ;;  %v2567_v37 = vadd.f32 %v2559_v32, %v5308_v39  ;;  %v5084_v54 = vadd.f32 %v2560_v25, %v5309_v36  ;;  %v5310_v51 = vsel %vm4512_vm0, %v4918_v21, 0.0 }
 0xa3c   :  { %v5090_v38 = vadd.f32 %v2561_v43, %v5310_v51  ;;  %v5311_v27 = vsel %vm4516_vm1, %v4924_v23, 0.0  ;;  %v5312_v15 = vsel %vm4516_vm1, %v4930_v7, 0.0  ;;  %v5106_v45 = vadd.f32 %v2564_v46, %v5313_v19 }
 0xa3d   :  { %v5096_v59 = vadd.f32 %v2562_v33, %v5311_v27  ;;  %v2571_v40 = vadd.f32 %v2563_v29, %v5312_v15  ;;  %v5314_v21 = vsel %vm4516_vm1, %v4942_v56, 0.0 }
 0xa3e   :  { %v5112_v60 = vadd.f32 %v2565_v41, %v5314_v21 }
 0xa3f   :  { %4052 = dma.done.wait [#allocation12 + $0x6], 8192 }
 0xa40   :  { %4053 = vsyncadd [#allocation12 + $0x6], 4294959104  ;;  %v3497_v23 = vpack.c.bf16 %v2571_v40, %v2567_v37  ;;  %v2593_v7 = vld [vmem:[#allocation8 + $0x8] sm:$0xff]  ;;  %v2592_v11 = vld [vmem:[#allocation8] sm:$0xff]  ;;  %v3500_v41 = vpack.c.bf16 %v5096_v59, %v5074_v44  ;;  %v3503_v17 = vpack.c.bf16 %v5112_v60, %v5090_v38 }
 0xa41   :  { %v2595_v42 = vld [vmem:[#allocation8 + $0x18] sm:$0xff]  ;;  %2656 = vmatprep.subr.bf16.mxu1 %v2593_v7  ;;  %v2594_v24 = vld [vmem:[#allocation8 + $0x10] sm:$0xff]  ;;  %v2597_v53 = vld [vmem:[#allocation8 + $0x28] sm:$0xff] }
 0xa42   :  { %3498 = vmatprep.mubr.msk.bf16.mxu1 %vm4552_vm7, %v3497_v23  ;;  %2657 = vmatpush1.bf16.msra.mxu1 %v2592_v11  ;;  %v2596_v47 = vld [vmem:[#allocation8 + $0x20] sm:$0xff]  ;;  %v2599_v56 = vld [vmem:[#allocation8 + $0x38] sm:$0xff]  ;;  %v2598_v30 = vld [vmem:[#allocation8 + $0x30] sm:$0xff] }
 0xa43   :  { %2658 = vmatprep.subr.bf16.mxu1 %v2595_v42  ;;  %v2601_v9 = vld [vmem:[#allocation8 + $0x48] sm:$0xff]  ;;  %v2600_v34 = vld [vmem:[#allocation8 + $0x40] sm:$0xff]  ;;  %v2603_v20 = vld [vmem:[#allocation8 + $0x58] sm:$0xff] }
 0xa44   :  { %v2602_v62 = vld [vmem:[#allocation8 + $0x50] sm:$0xff]  ;;  %v2605_v50 = vld [vmem:[#allocation8 + $0x68] sm:$0xff]  ;;  %v2604_v14 = vld [vmem:[#allocation8 + $0x60] sm:$0xff] }
 0xa45   :  { %v2607_v61 = vld [vmem:[#allocation8 + $0x78] sm:$0xff]  ;;  %v2606_v6 = vld [vmem:[#allocation8 + $0x70] sm:$0xff]  ;;  %v2609_v13 = vld [vmem:[#allocation8 + $0x88] sm:$0xff] }
 0xa46   :  { %2659 = vmatpush1.bf16.msra.mxu1 %v2594_v24  ;;  %v2608_v26 = vld [vmem:[#allocation8 + $0x80] sm:$0xff]  ;;  %v2611_v58 = vld [vmem:[#allocation8 + $0x98] sm:$0xff]  ;;  %v2610_v35 = vld [vmem:[#allocation8 + $0x90] sm:$0xff] }
 0xa47   :  { %2660 = vmatprep.subr.bf16.mxu1 %v2597_v53  ;;  %v2613_v49 = vld [vmem:[#allocation8 + $0xa8] sm:$0xff]  ;;  %v2612_v52 = vld [vmem:[#allocation8 + $0xa0] sm:$0xff]  ;;  %v2615_v28 = vld [vmem:[#allocation8 + $0xb8] sm:$0xff] }
 0xa48   :  { %v2614_v31 = vld [vmem:[#allocation8 + $0xb0] sm:$0xff]  ;;  %v2617_v8 = vld [vmem:[#allocation8 + $0xc8] sm:$0xff]  ;;  %v2616_v22 = vld [vmem:[#allocation8 + $0xc0] sm:$0xff] }
 0xa49   :  { %v2619_v12 = vld [vmem:[#allocation8 + $0xd8] sm:$0xff]  ;;  %v2618_v32 = vld [vmem:[#allocation8 + $0xd0] sm:$0xff]  ;;  %v2621_v25 = vld [vmem:[#allocation8 + $0xe8] sm:$0xff] }
 0xa4a   :  { %2661 = vmatpush1.bf16.msra.mxu1 %v2596_v47  ;;  %v2620_v43 = vld [vmem:[#allocation8 + $0xe0] sm:$0xff]  ;;  %v2623_v33 = vld [vmem:[#allocation8 + $0xf8] sm:$0xff]  ;;  %v2622_v29 = vld [vmem:[#allocation8 + $0xf0] sm:$0xff] }
 0xa4b   :  { %2662 = vmatprep.subr.bf16.mxu1 %v2599_v56  ;;  %v2625_v46 = vld [vmem:[#allocation8 + $0x108] sm:$0xff]  ;;  %v2624_v39 = vld [vmem:[#allocation8 + $0x100] sm:$0xff]  ;;  %v2627_v37 = vld [vmem:[#allocation8 + $0x118] sm:$0xff] }
 0xa4c   :  { %v2626_v36 = vld [vmem:[#allocation8 + $0x110] sm:$0xff]  ;;  %v2629_v51 = vld [vmem:[#allocation8 + $0x128] sm:$0xff]  ;;  %v2628_v44 = vld [vmem:[#allocation8 + $0x120] sm:$0xff] }
 0xa4d   :  { %v2631_v27 = vld [vmem:[#allocation8 + $0x138] sm:$0xff]  ;;  %v2630_v38 = vld [vmem:[#allocation8 + $0x130] sm:$0xff]  ;;  %v2633_v59 = vld [vmem:[#allocation8 + $0x148] sm:$0xff] }
 0xa4e   :  { %2663 = vmatpush1.bf16.msra.mxu1 %v2598_v30  ;;  %v2632_v15 = vld [vmem:[#allocation8 + $0x140] sm:$0xff]  ;;  %v2635_v40 = vld [vmem:[#allocation8 + $0x158] sm:$0xff]  ;;  %v2634_v19 = vld [vmem:[#allocation8 + $0x150] sm:$0xff] }
 0xa4f   :  { %2664 = vmatprep.subr.bf16.mxu1 %v2601_v9  ;;  %v2637_v21 = vld [vmem:[#allocation8 + $0x168] sm:$0xff]  ;;  %v2636_v60 = vld [vmem:[#allocation8 + $0x160] sm:$0xff]  ;;  %v2639_v23 = vld [vmem:[#allocation8 + $0x178] sm:$0xff] }
 0xa50   :  { %v2638_v7 = vld [vmem:[#allocation8 + $0x170] sm:$0xff]  ;;  %v2641_v11 = vld [vmem:[#allocation8 + $0x188] sm:$0xff]  ;;  %v2640_v42 = vld [vmem:[#allocation8 + $0x180] sm:$0xff] }
 0xa51   :  { %v2643_v24 = vld [vmem:[#allocation8 + $0x198] sm:$0xff]  ;;  %v2642_v53 = vld [vmem:[#allocation8 + $0x190] sm:$0xff]  ;;  %v2645_v47 = vld [vmem:[#allocation8 + $0x1a8] sm:$0xff] }
 0xa52   :  { %2665 = vmatpush1.bf16.msra.mxu1 %v2600_v34  ;;  %v2644_v56 = vld [vmem:[#allocation8 + $0x1a0] sm:$0xff]  ;;  %v2647_v30 = vld [vmem:[#allocation8 + $0x1b8] sm:$0xff]  ;;  %v2646_v9 = vld [vmem:[#allocation8 + $0x1b0] sm:$0xff] }
 0xa53   :  { %2666 = vmatprep.subr.bf16.mxu1 %v2603_v20  ;;  %v2649_v34 = vld [vmem:[#allocation8 + $0x1c8] sm:$0xff]  ;;  %v2648_v20 = vld [vmem:[#allocation8 + $0x1c0] sm:$0xff] }
 0xa56   :  { %2667 = vmatpush1.bf16.msra.mxu1 %v2602_v62  ;;  %v2651_v62 = vld [vmem:[#allocation8 + $0x1d8] sm:$0xff] }
 0xa57   :  { %2668 = vmatprep.subr.bf16.mxu1 %v2605_v50  ;;  %v2650_v50 = vld [vmem:[#allocation8 + $0x1d0] sm:$0xff] }
 0xa5a   :  { %2669 = vmatpush1.bf16.msra.mxu1 %v2604_v14  ;;  %v2653_v14 = vld [vmem:[#allocation8 + $0x1e8] sm:$0xff] }
 0xa5b   :  { %2670 = vmatprep.subr.bf16.mxu1 %v2607_v61  ;;  %v2652_v61 = vld [vmem:[#allocation8 + $0x1e0] sm:$0xff] }
 0xa5e   :  { %2671 = vmatpush1.bf16.msra.mxu1 %v2606_v6  ;;  %v2655_v6 = vld [vmem:[#allocation8 + $0x1f8] sm:$0xff] }
 0xa5f   :  { %2672 = vmatprep.subr.bf16.mxu1 %v2609_v13  ;;  %v2654_v13 = vld [vmem:[#allocation8 + $0x1f0] sm:$0xff] }
 0xa62   :  { %2673 = vmatpush1.bf16.msra.mxu1 %v2608_v26  ;;  %v3506_v26 = vpack.c.bf16 %v5106_v45, %v5084_v54 }
 0xa63   :  { %2674 = vmatprep.subr.bf16.mxu1 %v2611_v58 }
 0xa66   :  { %2675 = vmatpush1.bf16.msra.mxu1 %v2610_v35 }
 0xa67   :  { %2676 = vmatprep.subr.bf16.mxu1 %v2613_v49 }
 0xa6a   :  { %2677 = vmatpush1.bf16.msra.mxu1 %v2612_v52 }
 0xa6b   :  { %2678 = vmatprep.subr.bf16.mxu1 %v2615_v28 }
 0xa6e   :  { %2679 = vmatpush1.bf16.msra.mxu1 %v2614_v31 }
 0xa6f   :  { %2680 = vmatprep.subr.bf16.mxu1 %v2617_v8 }
 0xa72   :  { %2681 = vmatpush1.bf16.msra.mxu1 %v2616_v22 }
 0xa73   :  { %2682 = vmatprep.subr.bf16.mxu1 %v2619_v12 }
 0xa76   :  { %2683 = vmatpush1.bf16.msra.mxu1 %v2618_v32 }
 0xa77   :  { %2684 = vmatprep.subr.bf16.mxu1 %v2621_v25 }
 0xa7a   :  { %2685 = vmatpush1.bf16.msra.mxu1 %v2620_v43 }
 0xa7b   :  { %2686 = vmatprep.subr.bf16.mxu1 %v2623_v33 }
 0xa7e   :  { %2687 = vmatpush1.bf16.msra.mxu1 %v2622_v29 }
 0xa7f   :  { %2699 = vmatprep.subr.bf16.mxu1 %v2625_v46 }
 0xa81   :  { %3501 = vmatmul.mubr.msk.bf16.vlgmr.msra.gmra.mrb[16].mxu1 %vm4552_vm7, %v3500_v41 }
 0xa82   :  { %2700 = vmatpush1.bf16.msra.mxu1 %v2624_v39  ;;  %3504 = vmatprep.mubr.msk.bf16.mxu1 %vm4552_vm7, %v3503_v17 }
 0xa83   :  { %2701 = vmatprep.subr.bf16.mxu1 %v2627_v37 }
 0xa86   :  { %2702 = vmatpush1.bf16.msra.mxu1 %v2626_v36 }
 0xa87   :  { %2703 = vmatprep.subr.bf16.mxu1 %v2629_v51 }
 0xa8a   :  { %2704 = vmatpush1.bf16.msra.mxu1 %v2628_v44 }
 0xa8b   :  { %2705 = vmatprep.subr.bf16.mxu1 %v2631_v27 }
 0xa8e   :  { %2706 = vmatpush1.bf16.msra.mxu1 %v2630_v38 }
 0xa8f   :  { %2707 = vmatprep.subr.bf16.mxu1 %v2633_v59 }
 0xa92   :  { %2708 = vmatpush1.bf16.msra.mxu1 %v2632_v15 }
 0xa93   :  { %2709 = vmatprep.subr.bf16.mxu1 %v2635_v40 }
 0xa96   :  { %2710 = vmatpush1.bf16.msra.mxu1 %v2634_v19 }
 0xa97   :  { %2711 = vmatprep.subr.bf16.mxu1 %v2637_v21 }
 0xa9a   :  { %2712 = vmatpush1.bf16.msra.mxu1 %v2636_v60 }
 0xa9b   :  { %2713 = vmatprep.subr.bf16.mxu1 %v2639_v23 }
 0xa9e   :  { %2714 = vmatpush1.bf16.msra.mxu1 %v2638_v7 }
 0xa9f   :  { %2715 = vmatprep.subr.bf16.mxu1 %v2641_v11 }
 0xaa2   :  { %2716 = vmatpush1.bf16.msra.mxu1 %v2640_v42 }
 0xaa3   :  { %2717 = vmatprep.subr.bf16.mxu1 %v2643_v24 }
 0xaa6   :  { %2718 = vmatpush1.bf16.msra.mxu1 %v2642_v53 }
 0xaa7   :  { %2719 = vmatprep.subr.bf16.mxu1 %v2645_v47 }
 0xaaa   :  { %2720 = vmatpush1.bf16.msra.mxu1 %v2644_v56 }
 0xaab   :  { %2721 = vmatprep.subr.bf16.mxu1 %v2647_v30 }
 0xaae   :  { %2722 = vmatpush1.bf16.msra.mxu1 %v2646_v9 }
 0xaaf   :  { %2723 = vmatprep.subr.bf16.mxu1 %v2649_v34 }
 0xab2   :  { %2724 = vmatpush1.bf16.msra.mxu1 %v2648_v20 }
 0xab3   :  { %2725 = vmatprep.subr.bf16.mxu1 %v2651_v62 }
 0xab6   :  { %2726 = vmatpush1.bf16.msra.mxu1 %v2650_v50 }
 0xab7   :  { %2727 = vmatprep.subr.bf16.mxu1 %v2653_v14 }
 0xaba   :  { %2728 = vmatpush1.bf16.msra.mxu1 %v2652_v61 }
 0xabb   :  { %2729 = vmatprep.subr.bf16.mxu1 %v2655_v6 }
 0xabe   :  { %2730 = vmatpush1.bf16.msra.mxu1 %v2654_v13 }
 0xac1   :  { %3507 = vmatmul.mubr.msk.bf16.vlgmr.msra.gmra.mrb[16].mxu1 %vm4552_vm7, %v3506_v26 }
 0xb94   :  { %v2733_v58 = vpop.f32.mrb[16].mxu1 }
 0xb95   :  { %v2735_v35 = vpop.f32.mrb[17].mxu1  ;;  %v2758_v52 = vmul.f32 %v2733_v58, %v2733_v58 }
 0xb96   :  { %v2737_v49 = vpop.f32.mrb[18].mxu1  ;;  %v2759_v22 = vmul.f32 %v2735_v35, %v2735_v35 }
 0xb97   :  { %v2742_v28 = vadd.f32 %v2737_v49, %v2733_v58  ;;  %v2760_v31 = vmul.f32 %v2737_v49, %v2737_v49  ;;  %v2739_v8 = vpop.f32.mrb[19].mxu1 }
 0xb98   :  { %v2749_v12 = vadd.f32 %v2739_v8, %v2735_v35  ;;  %v2761_v32 = vmul.f32 %v2739_v8, %v2739_v8 }
 0xb99   :  { %v2743_v25 = vrot.slane %v2742_v28, 4  ;;  %v2762_v43 = vadd.f32 %v2760_v31, %v2758_v52 }
 0xb9a   :  { %v2750_v33 = vrot.slane %v2749_v12, 4  ;;  %v2769_v29 = vadd.f32 %v2761_v32, %v2759_v22 }
 0xb9b   :  { %v2744_v46 = vadd.f32 %v2743_v25, %v2742_v28  ;;  %v2763_v54 = vrot.slane %v2762_v43, 4  ;;  %v2585_v28 = vld [vmem:[#allocation26] ss:$8 sm:$0x3] }
 0xb9c   :  { %v2751_v45 = vadd.f32 %v2750_v33, %v2749_v12  ;;  %v2770_v41 = vrot.slane %v2769_v29, 4 }
 0xb9d   :  { %v2745_v17 = vrot.slane %v2744_v46, 2  ;;  %v2764_v39 = vadd.f32 %v2763_v54, %v2762_v43 }
 0xb9e   :  { %v2752_v37 = vrot.slane %v2751_v45, 2  ;;  %v2771_v36 = vadd.f32 %v2770_v41, %v2769_v29 }
 0xb9f   :  { %v2746_v51 = vadd.f32 %v2745_v17, %v2744_v46  ;;  %v2765_v44 = vrot.slane %v2764_v39, 2  ;;  %v2587_v17 = vld [vmem:[#allocation26 + $0x1] ss:$8 sm:$0x3] }
 0xba0   :  { %v2753_v27 = vadd.f32 %v2752_v37, %v2751_v45  ;;  %v2772_v38 = vrot.slane %v2771_v36, 2 }
 0xba1   :  { %v2747_v59 = vrot.slane %v2746_v51, 1  ;;  %v2766_v15 = vadd.f32 %v2765_v44, %v2764_v39 }
 0xba2   :  { %v2754_v40 = vrot.slane %v2753_v27, 1  ;;  %v2773_v19 = vadd.f32 %v2772_v38, %v2771_v36 }
 0xba3   :  { %v2748_v21 = vadd.f32 %v2747_v59, %v2746_v51  ;;  %v2767_v60 = vrot.slane %v2766_v15, 1 }
 0xba4   :  { %v2755_v23 = vadd.f32 %v2754_v40, %v2753_v27  ;;  %v2774_v7 = vrot.slane %v2773_v19, 1 }
 0xba5   :  { %v2756_v11 = vmul.f32 %v2748_v21, %v4533_v55  ;;  %v2768_v42 = vadd.f32 %v2767_v60, %v2766_v15 }
 0xba6   :  { %v2757_v24 = vmul.f32 %v2755_v23, %v4533_v55  ;;  %v2775_v53 = vadd.f32 %v2774_v7, %v2773_v19 }
 0xba7   :  { %v2776_v47 = vmul.f32 %v2768_v42, %v4533_v55  ;;  %v2778_v56 = vmul.f32 %v2756_v11, %v2756_v11 }
 0xba8   :  { %v2777_v30 = vmul.f32 %v2775_v53, %v4533_v55  ;;  %v2779_v9 = vmul.f32 %v2757_v24, %v2757_v24 }
 0xba9   :  { %v2780_v34 = vsub.f32 %v2776_v47, %v2778_v56 }
 0xbaa   :  { %v2781_v20 = vsub.f32 %v2777_v30, %v2779_v9 }
 0xbab   :  { %v2782_v62 = vmax.f32 %v2780_v34, 0.0 }
 0xbac   :  { %v2783_v50 = vmax.f32 %v2781_v20, 0.0 }
 0xbad   :  { %v2784_v14 = vadd.f32 1e-05, %v2782_v62 }
 0xbae   :  { %v2785_v61 = vadd.f32 1e-05, %v2783_v50 }
 0xbaf   :  { %3722 = vrsqrt.f32 %v2784_v14 }
 0xbb0   :  { %3724 = vrsqrt.f32 %v2785_v61 }
 0xbb9   :  { %v3723_v6 = vpop.eup %3722 }
 0xbba   :  { %v3725_v13 = vpop.eup %3724 }
 0xbbb   :  { %v2790_v26 = vcombine.low %v3723_v6, %v3725_v13 }
 0xbbd   :  { %v2797_v52 = vrot.slane %v2790_v26, %v4583_v57 }
 0xbbf   :  { %v2804_v31 = vrot.slane %v2797_v52, %v4583_v57 }
 0xbc1   :  { %v2806_v22 = vmul.f32 %v2804_v31, %v2585_v28 }
 0xbc3   :  { %v2811_v12 = vrot.slane %v2806_v22, %v4541_v10  ;;  %v2815_v32 = vrot.slane %v2806_v22, %v4588_v63 }
 0xbc5   :  { %v2818_v25 = vmul.f32 %v2811_v12, %v2756_v11  ;;  %v2819_v43 = vmul.f32 %v2815_v32, %v2757_v24  ;;  %v2839_v33 = vmul.f32 %v2811_v12, %v2733_v58  ;;  %v2840_v29 = vmul.f32 %v2815_v32, %v2735_v35 }
 0xbc6   :  { %v2841_v46 = vmul.f32 %v2811_v12, %v2737_v49  ;;  %v2842_v54 = vmul.f32 %v2815_v32, %v2739_v8 }
 0xbc7   :  { %v2822_v45 = vcombine.low %v2818_v25, %v2819_v43 }
 0xbc9   :  { %v2829_v41 = vrot.slane %v2822_v45, %v4583_v57 }
 0xbcb   :  { %v2836_v39 = vrot.slane %v2829_v41, %v4583_v57 }
 0xbcd   :  { %v2838_v37 = vsub.f32 %v2587_v17, %v2836_v39 }
 0xbcf   :  { %v2847_v36 = vrot.slane %v2838_v37, %v4541_v10  ;;  %v2851_v51 = vrot.slane %v2838_v37, %v4588_v63 }
 0xbd1   :  { %v2854_v44 = vadd.f32 %v2847_v36, %v2839_v33  ;;  %v2855_v27 = vadd.f32 %v2851_v51, %v2840_v29  ;;  %v2856_v38 = vadd.f32 %v2847_v36, %v2841_v46  ;;  %v2857_v59 = vadd.f32 %v2851_v51, %v2842_v54 }
 0xbd3   :  { %vm2858_vm2 = vcmp.ge.f32.partialorder %v2854_v44, 0.0  ;;  %vm2859_vm3 = vcmp.ge.f32.partialorder %v2855_v27, 0.0  ;;  %vm2860_vm5 = vcmp.ge.f32.partialorder %v2856_v38, 0.0  ;;  %vm2861_vm6 = vcmp.ge.f32.partialorder %v2857_v59, 0.0 }
 0xbd4   :  { %v2862_v58 = vmul.f32 0.01, %v2854_v44  ;;  %v2863_v35 = vmul.f32 0.01, %v2855_v27  ;;  %v2864_v49 = vmul.f32 0.01, %v2856_v38 }
 0xbd5   :  { %v2865_v8 = vmul.f32 0.01, %v2857_v59 }
 0xbd6   :  { %v5140_v15 = vsel %vm2858_vm2, %v2854_v44, %v2862_v58  ;;  %v5142_v40 = vsel %vm2859_vm3, %v2855_v27, %v2863_v35  ;;  %v5144_v19 = vsel %vm2860_vm5, %v2856_v38, %v2864_v49 }
 0xbd7   :  { %v5146_v21 = vsel %vm2861_vm6, %v2857_v59, %v2865_v8  ;;  %v2870_v60 = vsel %vm4512_vm0, %v5140_v15, 0.0  ;;  %v2871_v23 = vsel %vm4512_vm0, %v5142_v40, 0.0  ;;  %v2872_v7 = vsel %vm4516_vm1, %v5144_v19, 0.0 }
 0xbd8   :  { %v2873_v11 = vsel %vm4516_vm1, %v5146_v21, 0.0 }
 0xbd9   :  { %4054 = dma.done.wait [#allocation12 + $0x7], 4096 }
 0xbda   :  { %4055 = vsyncadd [#allocation12 + $0x7], 4294963200  ;;  %v3509_v42 = vpack.c.bf16 %v5146_v21, %v5142_v40  ;;  %v2882_v24 = vld [vmem:[#allocation9 + $0x8] sm:$0xff]  ;;  %v2881_v53 = vld [vmem:[#allocation9] sm:$0xff]  ;;  %v3512_v36 = vpack.c.bf16 %v5144_v19, %v5140_v15 }
 0xbdb   :  { %v2884_v47 = vld [vmem:[#allocation9 + $0x18] sm:$0xff]  ;;  %2913 = vmatprep.subr.bf16.mxu0 %v2882_v24  ;;  %v2883_v56 = vld [vmem:[#allocation9 + $0x10] sm:$0xff]  ;;  %v2886_v30 = vld [vmem:[#allocation9 + $0x28] sm:$0xff] }
 0xbdc   :  { %3510 = vmatprep.mubr.msk.bf16.mxu0 %vm4552_vm7, %v3509_v42  ;;  %2914 = vmatpush1.bf16.msra.mxu0 %v2881_v53  ;;  %v2885_v9 = vld [vmem:[#allocation9 + $0x20] sm:$0xff]  ;;  %v2888_v34 = vld [vmem:[#allocation9 + $0x38] sm:$0xff]  ;;  %v2887_v20 = vld [vmem:[#allocation9 + $0x30] sm:$0xff] }
 0xbdd   :  { %2915 = vmatprep.subr.bf16.mxu0 %v2884_v47  ;;  %v2890_v62 = vld [vmem:[#allocation9 + $0x48] sm:$0xff]  ;;  %v2889_v50 = vld [vmem:[#allocation9 + $0x40] sm:$0xff]  ;;  %v2892_v14 = vld [vmem:[#allocation9 + $0x58] sm:$0xff] }
 0xbde   :  { %v2891_v61 = vld [vmem:[#allocation9 + $0x50] sm:$0xff]  ;;  %v2894_v6 = vld [vmem:[#allocation9 + $0x68] sm:$0xff]  ;;  %v2893_v13 = vld [vmem:[#allocation9 + $0x60] sm:$0xff] }
 0xbdf   :  { %v2896_v26 = vld [vmem:[#allocation9 + $0x78] sm:$0xff]  ;;  %v2895_v52 = vld [vmem:[#allocation9 + $0x70] sm:$0xff]  ;;  %v2898_v28 = vld [vmem:[#allocation9 + $0x88] sm:$0xff] }
 0xbe0   :  { %2916 = vmatpush1.bf16.msra.mxu0 %v2883_v56  ;;  %v2897_v31 = vld [vmem:[#allocation9 + $0x80] sm:$0xff]  ;;  %v2900_v22 = vld [vmem:[#allocation9 + $0x98] sm:$0xff]  ;;  %v2899_v12 = vld [vmem:[#allocation9 + $0x90] sm:$0xff] }
 0xbe1   :  { %2917 = vmatprep.subr.bf16.mxu0 %v2886_v30  ;;  %v2902_v32 = vld [vmem:[#allocation9 + $0xa8] sm:$0xff]  ;;  %v2901_v25 = vld [vmem:[#allocation9 + $0xa0] sm:$0xff]  ;;  %v2904_v43 = vld [vmem:[#allocation9 + $0xb8] sm:$0xff] }
 0xbe2   :  { %v2903_v33 = vld [vmem:[#allocation9 + $0xb0] sm:$0xff]  ;;  %v2906_v29 = vld [vmem:[#allocation9 + $0xc8] sm:$0xff]  ;;  %v2905_v46 = vld [vmem:[#allocation9 + $0xc0] sm:$0xff] }
 0xbe3   :  { %v2908_v54 = vld [vmem:[#allocation9 + $0xd8] sm:$0xff]  ;;  %v2907_v45 = vld [vmem:[#allocation9 + $0xd0] sm:$0xff]  ;;  %v2910_v41 = vld [vmem:[#allocation9 + $0xe8] sm:$0xff] }
 0xbe4   :  { %2918 = vmatpush1.bf16.msra.mxu0 %v2885_v9  ;;  %v2909_v17 = vld [vmem:[#allocation9 + $0xe0] sm:$0xff]  ;;  %v2912_v39 = vld [vmem:[#allocation9 + $0xf8] sm:$0xff]  ;;  %v2911_v37 = vld [vmem:[#allocation9 + $0xf0] sm:$0xff] }
 0xbe5   :  { %2919 = vmatprep.subr.bf16.mxu0 %v2888_v34 }
 0xbe8   :  { %2920 = vmatpush1.bf16.msra.mxu0 %v2887_v20 }
 0xbe9   :  { %2921 = vmatprep.subr.bf16.mxu0 %v2890_v62 }
 0xbec   :  { %2922 = vmatpush1.bf16.msra.mxu0 %v2889_v50 }
 0xbed   :  { %2923 = vmatprep.subr.bf16.mxu0 %v2892_v14 }
 0xbf0   :  { %2924 = vmatpush1.bf16.msra.mxu0 %v2891_v61 }
 0xbf1   :  { %2925 = vmatprep.subr.bf16.mxu0 %v2894_v6 }
 0xbf4   :  { %2926 = vmatpush1.bf16.msra.mxu0 %v2893_v13 }
 0xbf5   :  { %2927 = vmatprep.subr.bf16.mxu0 %v2896_v26 }
 0xbf8   :  { %2928 = vmatpush1.bf16.msra.mxu0 %v2895_v52 }
 0xbf9   :  { %2929 = vmatprep.subr.bf16.mxu0 %v2898_v28 }
 0xbfc   :  { %2930 = vmatpush1.bf16.msra.mxu0 %v2897_v31 }
 0xbfd   :  { %2931 = vmatprep.subr.bf16.mxu0 %v2900_v22 }
 0xc00   :  { %2932 = vmatpush1.bf16.msra.mxu0 %v2899_v12 }
 0xc01   :  { %2933 = vmatprep.subr.bf16.mxu0 %v2902_v32 }
 0xc04   :  { %2934 = vmatpush1.bf16.msra.mxu0 %v2901_v25 }
 0xc05   :  { %2935 = vmatprep.subr.bf16.mxu0 %v2904_v43 }
 0xc08   :  { %2936 = vmatpush1.bf16.msra.mxu0 %v2903_v33 }
 0xc09   :  { %2937 = vmatprep.subr.bf16.mxu0 %v2906_v29 }
 0xc0c   :  { %2938 = vmatpush1.bf16.msra.mxu0 %v2905_v46 }
 0xc0d   :  { %2939 = vmatprep.subr.bf16.mxu0 %v2908_v54 }
 0xc10   :  { %2940 = vmatpush1.bf16.msra.mxu0 %v2907_v45 }
 0xc11   :  { %2941 = vmatprep.subr.bf16.mxu0 %v2910_v41 }
 0xc14   :  { %2942 = vmatpush1.bf16.msra.mxu0 %v2909_v17 }
 0xc15   :  { %2943 = vmatprep.subr.bf16.mxu0 %v2912_v39 }
 0xc18   :  { %2944 = vmatpush1.bf16.msra.mxu0 %v2911_v37 }
 0xc1b   :  { %3513 = vmatmul.mubr.msk.bf16.vlgmr.msra.gmra.mrb[20].mxu0 %vm4552_vm7, %v3512_v36 }
 0xcee   :  { %v2947_v51 = vpop.f32.mrb[20].mxu0 }
 0xcef   :  { %v2949_v44 = vpop.f32.mrb[21].mxu0  ;;  %v2972_v38 = vmul.f32 %v2947_v51, %v2947_v51 }
 0xcf0   :  { %v2951_v27 = vpop.f32.mrb[22].mxu0  ;;  %v2973_v49 = vmul.f32 %v2949_v44, %v2949_v44 }
 0xcf1   :  { %v2956_v59 = vadd.f32 %v2951_v27, %v2947_v51  ;;  %v2974_v58 = vmul.f32 %v2951_v27, %v2951_v27  ;;  %v2953_v35 = vpop.f32.mrb[23].mxu0 }
 0xcf2   :  { %v2963_v8 = vadd.f32 %v2953_v35, %v2949_v44  ;;  %v2975_v42 = vmul.f32 %v2953_v35, %v2953_v35 }
 0xcf3   :  { %v2957_v24 = vrot.slane %v2956_v59, 4  ;;  %v2976_v53 = vadd.f32 %v2974_v58, %v2972_v38 }
 0xcf4   :  { %v2964_v47 = vrot.slane %v2963_v8, 4  ;;  %v2983_v56 = vadd.f32 %v2975_v42, %v2973_v49 }
 0xcf5   :  { %v2958_v30 = vadd.f32 %v2957_v24, %v2956_v59  ;;  %v2977_v9 = vrot.slane %v2976_v53, 4 }
 0xcf6   :  { %v2965_v34 = vadd.f32 %v2964_v47, %v2963_v8  ;;  %v2984_v20 = vrot.slane %v2983_v56, 4 }
 0xcf7   :  { %v2959_v62 = vrot.slane %v2958_v30, 2  ;;  %v2978_v50 = vadd.f32 %v2977_v9, %v2976_v53 }
 0xcf8   :  { %v2966_v14 = vrot.slane %v2965_v34, 2  ;;  %v2985_v61 = vadd.f32 %v2984_v20, %v2983_v56  ;;  %v2876_v56 = vld [vmem:[#allocation27] ss:$8 sm:$0x3] }
 0xcf9   :  { %v2960_v6 = vadd.f32 %v2959_v62, %v2958_v30  ;;  %v2979_v13 = vrot.slane %v2978_v50, 2 }
 0xcfa   :  { %v2967_v26 = vadd.f32 %v2966_v14, %v2965_v34  ;;  %v2986_v52 = vrot.slane %v2985_v61, 2 }
 0xcfb   :  { %v2961_v28 = vrot.slane %v2960_v6, 1  ;;  %v2980_v31 = vadd.f32 %v2979_v13, %v2978_v50 }
 0xcfc   :  { %v2968_v22 = vrot.slane %v2967_v26, 1  ;;  %v2987_v12 = vadd.f32 %v2986_v52, %v2985_v61 }
 0xcfd   :  { %v2962_v32 = vadd.f32 %v2961_v28, %v2960_v6  ;;  %v2981_v25 = vrot.slane %v2980_v31, 1  ;;  %v2878_v28 = vld [vmem:[#allocation27 + $0x1] ss:$8 sm:$0x3] }
 0xcfe   :  { %v2969_v43 = vadd.f32 %v2968_v22, %v2967_v26  ;;  %v2988_v33 = vrot.slane %v2987_v12, 1 }
 0xcff   :  { %v2970_v29 = vmul.f32 %v2962_v32, %v4533_v55  ;;  %v2982_v46 = vadd.f32 %v2981_v25, %v2980_v31 }
 0xd00   :  { %v2971_v54 = vmul.f32 %v2969_v43, %v4533_v55  ;;  %v2989_v45 = vadd.f32 %v2988_v33, %v2987_v12 }
 0xd01   :  { %v2990_v41 = vmul.f32 %v2982_v46, %v4533_v55  ;;  %v2992_v17 = vmul.f32 %v2970_v29, %v2970_v29 }
 0xd02   :  { %v2991_v39 = vmul.f32 %v2989_v45, %v4533_v55  ;;  %v2993_v37 = vmul.f32 %v2971_v54, %v2971_v54 }
 0xd03   :  { %v2994_v36 = vsub.f32 %v2990_v41, %v2992_v17 }
 0xd04   :  { %v2995_v38 = vsub.f32 %v2991_v39, %v2993_v37 }
 0xd05   :  { %v2996_v59 = vmax.f32 %v2994_v36, 0.0 }
 0xd06   :  { %v2997_v58 = vmax.f32 %v2995_v38, 0.0 }
 0xd07   :  { %v2998_v49 = vadd.f32 1e-05, %v2996_v59 }
 0xd08   :  { %v2999_v8 = vadd.f32 1e-05, %v2997_v58 }
 0xd09   :  { %3726 = vrsqrt.f32 %v2998_v49 }
 0xd0a   :  { %3728 = vrsqrt.f32 %v2999_v8 }
 0xd13   :  { %v3727_v42 = vpop.eup %3726 }
 0xd14   :  { %v3729_v24 = vpop.eup %3728 }
 0xd15   :  { %v3004_v53 = vcombine.low %v3727_v42, %v3729_v24 }
 0xd17   :  { %v3011_v47 = vrot.slane %v3004_v53, %v4583_v57 }
 0xd19   :  { %v3018_v30 = vrot.slane %v3011_v47, %v4583_v57 }
 0xd1b   :  { %v3020_v9 = vmul.f32 %v3018_v30, %v2876_v56 }
 0xd1d   :  { %v3025_v34 = vrot.slane %v3020_v9, %v4541_v10  ;;  %v3029_v20 = vrot.slane %v3020_v9, %v4588_v63 }
 0xd1f   :  { %v3032_v62 = vmul.f32 %v3025_v34, %v2970_v29  ;;  %v3033_v50 = vmul.f32 %v3029_v20, %v2971_v54  ;;  %v3053_v14 = vmul.f32 %v3025_v34, %v2947_v51  ;;  %v3054_v61 = vmul.f32 %v3029_v20, %v2949_v44 }
 0xd20   :  { %v3055_v6 = vmul.f32 %v3025_v34, %v2951_v27  ;;  %v3056_v13 = vmul.f32 %v3029_v20, %v2953_v35 }
 0xd21   :  { %v3036_v26 = vcombine.low %v3032_v62, %v3033_v50 }
 0xd23   :  { %v3043_v52 = vrot.slane %v3036_v26, %v4583_v57 }
 0xd25   :  { %v3050_v31 = vrot.slane %v3043_v52, %v4583_v57 }
 0xd27   :  { %v3052_v22 = vsub.f32 %v2878_v28, %v3050_v31 }
 0xd29   :  { %v3061_v12 = vrot.slane %v3052_v22, %v4541_v10  ;;  %v3065_v32 = vrot.slane %v3052_v22, %v4588_v63 }
 0xd2b   :  { %v3068_v25 = vadd.f32 %v3061_v12, %v3053_v14  ;;  %v3069_v43 = vadd.f32 %v3065_v32, %v3054_v61  ;;  %v3070_v33 = vadd.f32 %v3061_v12, %v3055_v6  ;;  %v3071_v29 = vadd.f32 %v3065_v32, %v3056_v13 }
 0xd2d   :  { %vm3072_vm8 = vcmp.ge.f32.partialorder %v3068_v25, 0.0  ;;  %vm3073_vm9 = vcmp.ge.f32.partialorder %v3069_v43, 0.0  ;;  %vm3074_vm10 = vcmp.ge.f32.partialorder %v3070_v33, 0.0  ;;  %vm3075_vm11 = vcmp.ge.f32.partialorder %v3071_v29, 0.0 }
 0xd2e   :  { %v3076_v51 = vmul.f32 0.01, %v3068_v25  ;;  %v3077_v44 = vmul.f32 0.01, %v3069_v43  ;;  %v3078_v27 = vmul.f32 0.01, %v3070_v33 }
 0xd2f   :  { %v3079_v35 = vmul.f32 0.01, %v3071_v29 }
 0xd30   :  { %v3080_v46 = vsel %vm3072_vm8, %v3068_v25, %v3076_v51  ;;  %v3081_v54 = vsel %vm3073_vm9, %v3069_v43, %v3077_v44  ;;  %v3082_v57 = vsel %vm3074_vm10, %v3070_v33, %v3078_v27 }
 0xd31   :  { %v3083_v45 = vsel %vm3075_vm11, %v3071_v29, %v3079_v35  ;;  %v3084_v63 = vadd.f32 %v3080_v46, %v2870_v60  ;;  %v3085_v41 = vadd.f32 %v3081_v54, %v2871_v23  ;;  %v3086_v17 = vadd.f32 %v3082_v57, %v2872_v7 }
 0xd32   :  { %v3087_v39 = vadd.f32 %v3083_v45, %v2873_v11 }
 0xd33   :  { %4056 = dma.done.wait [#allocation12 + $0x8], 2048 }
 0xd34   :  { %4057 = vsyncadd [#allocation12 + $0x8], 4294965248  ;;  %v3515_v37 = vpack.c.bf16 %v3087_v39, %v3085_v41  ;;  %v3107_v15 = vld [vmem:[#allocation10 + $0x40] sm:$0xff]  ;;  %v3108_v40 = vld [vmem:[#allocation10 + $0x48] sm:$0xff]  ;;  %v3518_v53 = vpack.c.bf16 %v3086_v17, %v3084_v63 }
 0xd35   :  { %v3099_v60 = vld [vmem:[#allocation10] sm:$0xff]  ;;  %3544 = vmatprep.subr.bf16.mxu0 %v3107_v15  ;;  %v3100_v23 = vld [vmem:[#allocation10 + $0x8] sm:$0xff]  ;;  %v3109_v19 = vld [vmem:[#allocation10 + $0x50] sm:$0xff] }
 0xd36   :  { %3516 = vmatprep.mubr.msk.bf16.mxu0 %vm4552_vm7, %v3515_v37  ;;  %3545 = vmatpush3.bf16.msra.mxu0 %v3099_v60  ;;  %v3101_v7 = vld [vmem:[#allocation10 + $0x10] sm:$0xff]  ;;  %v3110_v36 = vld [vmem:[#allocation10 + $0x58] sm:$0xff]  ;;  %v3111_v11 = vld [vmem:[#allocation10 + $0x60] sm:$0xff] }
 0xd37   :  { %3546 = vmatprep.subr.bf16.mxu0 %v3108_v40  ;;  %v3102_v21 = vld [vmem:[#allocation10 + $0x18] sm:$0xff]  ;;  %v3103_v38 = vld [vmem:[#allocation10 + $0x20] sm:$0xff]  ;;  %v3112_v59 = vld [vmem:[#allocation10 + $0x68] sm:$0xff] }
 0xd38   :  { %v3104_v58 = vld [vmem:[#allocation10 + $0x28] sm:$0xff]  ;;  %v3113_v49 = vld [vmem:[#allocation10 + $0x70] sm:$0xff]  ;;  %v3114_v42 = vld [vmem:[#allocation10 + $0x78] sm:$0xff] }
 0xd39   :  { %v3105_v8 = vld [vmem:[#allocation10 + $0x30] sm:$0xff]  ;;  %v3106_v24 = vld [vmem:[#allocation10 + $0x38] sm:$0xff] }
 0xd3a   :  { %3547 = vmatpush3.bf16.msra.mxu0 %v3100_v23  ;;  %v3095_v54 = vld [vmem:[#allocation29] sm:$0x1]  ;;  %v3096_v63 = vld [vmem:[#allocation29 + $0x1] sm:$0x1] }
 0xd3b   :  { %3548 = vmatprep.subr.bf16.mxu0 %v3109_v19 }
 0xd3e   :  { %3549 = vmatpush3.bf16.msra.mxu0 %v3101_v7 }
 0xd3f   :  { %3550 = vmatprep.subr.bf16.mxu0 %v3110_v36 }
 0xd42   :  { %3551 = vmatpush3.bf16.msra.mxu0 %v3102_v21 }
 0xd43   :  { %3552 = vmatprep.subr.bf16.mxu0 %v3111_v11  ;;  %v5315_v11 = vmov 0.0  }
 0xd44   :  { %3595 = vmatprep.subr.bf16.mxu1 %v5315_v11  ;;  %3611 = vmatprep.mubr.msk.bf16.mxu1 %vm4103_vm4, %v5315_v11 }
 0xd46   :  { %3553 = vmatpush3.bf16.msra.mxu0 %v3103_v38 }
 0xd47   :  { %3554 = vmatprep.subr.bf16.mxu0 %v3112_v59 }
 0xd4a   :  { %3555 = vmatpush3.bf16.msra.mxu0 %v3104_v58 }
 0xd4b   :  { %3556 = vmatprep.subr.bf16.mxu0 %v3113_v49 }
 0xd4e   :  { %3557 = vmatpush3.bf16.msra.mxu0 %v3105_v8 }
 0xd4f   :  { %3558 = vmatprep.subr.bf16.mxu0 %v3114_v42 }
 0xd52   :  { %3559 = vmatpush3.bf16.msra.mxu0 %v3106_v24 }
 0xd55   :  { %3519 = vmatmul.mubr.msk.bf16.vlgmr.msra.gmra.mrb[24].mxu0 %vm4552_vm7, %v3518_v53 }
 0xe28   :  { %v3560_v47 = vpop.f32.mrb[24].mxu0 }
 0xe29   :  { %v3561_v56 = vpop.f32.mrb[25].mxu0 }
 0xe2a   :  { %v3562_v30 = vadd.f32 %v3561_v56, %v3560_v47  ;;  %v3563_v9 = vpop.f32.mrb[26].mxu0 }
 0xe2b   :  { %v3564_v34 = vpop.f32.mrb[27].mxu0 }
 0xe2c   :  { %v3565_v20 = vadd.f32 %v3564_v34, %v3563_v9  ;;  %v3164_v62 = vmul.f32 %v3562_v30, %v3562_v30 }
 0xe2e   :  { %v3156_v50 = vadd.f32 %v3565_v20, %v3562_v30  ;;  %v3165_v14 = vmul.f32 %v3565_v20, %v3565_v20 }
 0xe30   :  { %v3157_v61 = vrot.slane %v3156_v50, 4  ;;  %v3166_v6 = vadd.f32 %v3165_v14, %v3164_v62 }
 0xe32   :  { %v3158_v13 = vadd.f32 %v3157_v61, %v3156_v50  ;;  %v3167_v26 = vrot.slane %v3166_v6, 4 }
 0xe34   :  { %v3159_v52 = vrot.slane %v3158_v13, 2  ;;  %v3168_v28 = vadd.f32 %v3167_v26, %v3166_v6 }
 0xe36   :  { %v3160_v31 = vadd.f32 %v3159_v52, %v3158_v13  ;;  %v3169_v22 = vrot.slane %v3168_v28, 2 }
 0xe38   :  { %v3161_v12 = vrot.slane %v3160_v31, 1  ;;  %v3170_v32 = vadd.f32 %v3169_v22, %v3168_v28 }
 0xe3a   :  { %v3162_v25 = vadd.f32 %v3161_v12, %v3160_v31  ;;  %v3171_v43 = vrot.slane %v3170_v32, 1 }
 0xe3c   :  { %v3163_v33 = vmul.f32 %v3162_v25, %v4533_v55  ;;  %v3172_v29 = vadd.f32 %v3171_v43, %v3170_v32 }
 0xe3e   :  { %v3173_v51 = vmul.f32 %v3172_v29, %v4533_v55  ;;  %v3174_v44 = vmul.f32 %v3163_v33, %v3163_v33 }
 0xe40   :  { %v3175_v27 = vsub.f32 %v3173_v51, %v3174_v44 }
 0xe42   :  { %v3176_v35 = vmax.f32 %v3175_v27, 0.0 }
 0xe44   :  { %v3177_v46 = vadd.f32 1e-05, %v3176_v35 }
 0xe46   :  { %3730 = vrsqrt.f32 %v3177_v46 }
 0xe50   :  { %v3731_v57 = vpop.eup %3730 }
 0xe51   :  { %v3179_v45 = vmul.f32 %v3731_v57, %v3095_v54 }
 0xe53   :  { %v3180_v41 = vmul.f32 %v3179_v45, %v3163_v33  ;;  %v3185_v17 = vrot.slane %v3179_v45, %v4541_v10 }
 0xe55   :  { %v3181_v39 = vsub.f32 %v3096_v63, %v3180_v41  ;;  %v3186_v37 = vmul.f32 %v3562_v30, %v3185_v17  ;;  %v3187_v15 = vmul.f32 %v3565_v20, %v3185_v17 }
 0xe57   :  { %v3191_v60 = vrot.slane %v3181_v39, %v4541_v10 }
 0xe59   :  { %v3192_v40 = vadd.f32 %v3191_v60, %v3186_v37  ;;  %v3193_v23 = vadd.f32 %v3191_v60, %v3187_v15 }
 0xe5b   :  { %vm3194_vm12 = vcmp.ge.f32.partialorder %v3192_v40, 0.0  ;;  %vm3195_vm13 = vcmp.ge.f32.partialorder %v3193_v23, 0.0  ;;  %v3196_v19 = vmul.f32 0.01, %v3192_v40  ;;  %v3197_v7 = vmul.f32 0.01, %v3193_v23 }
 0xe5d   :  { %v3198_v36 = vsel %vm3194_vm12, %v3192_v40, %v3196_v19  ;;  %v3199_v21 = vsel %vm3195_vm13, %v3193_v23, %v3197_v7 }
 0xe5e   :  { %4058 = dma.done.wait [#allocation12 + $0x9], 1024 }
 0xe5f   :  { %4059 = vsyncadd [#allocation12 + $0x9], 4294966272  ;;  %3596 = vmatpush3.bf16.msra.mxu1 %v4465_v0  ;;  %v5316_v0 = vld [vmem:[#allocation71_spill] sm:$0xff]  ;;  %v3204_v28 = vld [vmem:[#allocation30] sm:$0x1]  ;;  %s4106_s25 = smov [#allocation32]  }
 0xe60   :  { %3597 = vmatprep.subr.bf16.mxu1 %v5315_v11  ;;  %v3205_v12 = vld [vmem:[#allocation30 + $0x1] sm:$0x1]  ;;  %s3319_s28 = sshll.u32 %s4106_s25, 4  ;;  %s3320_s28 = int_to_ptr.vmem [resolvable:$true] %s3319_s28 }
 0xe61   :  { %s4006_s19 = scalar_lea.vmem %s3320_s28, 256  ;;  %p4011_p0 = scmp.lt.s32.totalorder %s3320_s28, %s3320_s28 }
 0xe62   :  { %p4007_p13 = scmp.ne.s32.totalorder %s3320_s28, %s4006_s19  ;;  %p4012_p1 = scmp.lt.s32.totalorder %s4006_s19, %s4006_s19 }
 0xe63   :  { %3598 = vmatpush3.bf16.msra.mxu1 %v4470_v1  ;;  %v3521_v1 = vpack.c.bf16 %v3199_v21, %v3198_v36 }
 0xe64   :  { %3599 = vmatprep.subr.bf16.mxu1 %v5315_v11  ;;  %p4013_p2 = por %p4012_p1, %p4011_p0 }
 0xe66   :  { %p4014_p3 = pnand %p4013_p2, %p4007_p13 }
 0xe67   :  { %3600 = vmatpush3.bf16.msra.mxu1 %v4475_v2  ;;  %v5317_v2 = vld [vmem:[#allocation72_spill] sm:$0xff] }
 0xe68   :  { %3601 = vmatprep.subr.bf16.mxu1 %v5315_v11 }
 0xe6b   :  { %3602 = vmatpush3.bf16.msra.mxu1 %v4480_v3 }
 0xe6c   :  { %3603 = vmatprep.subr.bf16.mxu1 %v5315_v11 }
 0xe6f   :  { %3604 = vmatpush3.bf16.msra.mxu1 %v4485_v4 }
 0xe70   :  { %3605 = vmatprep.subr.bf16.mxu1 %v5315_v11 }
 0xe73   :  { %3606 = vmatpush3.bf16.msra.mxu1 %v4490_v5 }
 0xe74   :  { %3607 = vmatprep.subr.bf16.mxu1 %v5315_v11 }
 0xe77   :  { %3608 = vmatpush3.bf16.msra.mxu1 %v5316_v0 }
 0xe78   :  { %3609 = vmatprep.subr.bf16.mxu1 %v5315_v11 }
 0xe7b   :  { %3610 = vmatpush3.bf16.msra.mxu1 %v5317_v2 }
 0xe7e   :  { %3612 = vmatmul.mubr.msk.bf16.vlgmr.msra.gmra.mrb[20].mxu1 %vm4552_vm7, %v3521_v1 }
 0xf51   :  { %v3249_v3 = vpop.f32.mrb[20].mxu1 }
 0xf52   :  { %v3613_v38 = vpop.f32.mrb[21].mxu1  ;;  %v3264_v4 = vmul.f32 %v3249_v3, %v3249_v3 }
 0xf53   :  { %v3252_v59 = vpop.f32.mrb[22].mxu1 }
 0xf54   :  { %v3256_v58 = vadd.f32 %v3252_v59, %v3249_v3  ;;  %v3265_v49 = vmul.f32 %v3252_v59, %v3252_v59  ;;  %v3614_v8 = vpop.f32.mrb[23].mxu1 }
 0xf56   :  { %v3257_v5 = vrot.slane %v3256_v58, 4  ;;  %v3266_v42 = vadd.f32 %v3265_v49, %v3264_v4 }
 0xf58   :  { %v3258_v24 = vadd.f32 %v3257_v5, %v3256_v58  ;;  %v3267_v53 = vrot.slane %v3266_v42, 4 }
 0xf5a   :  { %v3259_v47 = vrot.slane %v3258_v24, 2  ;;  %v3268_v56 = vadd.f32 %v3267_v53, %v3266_v42 }
 0xf5c   :  { %v3260_v30 = vadd.f32 %v3259_v47, %v3258_v24  ;;  %v3269_v9 = vrot.slane %v3268_v56, 2 }
 0xf5e   :  { %v3261_v34 = vrot.slane %v3260_v30, 1  ;;  %v3270_v20 = vadd.f32 %v3269_v9, %v3268_v56 }
 0xf60   :  { %v3262_v62 = vadd.f32 %v3261_v34, %v3260_v30  ;;  %v3271_v48 = vrot.slane %v3270_v20, 1 }
 0xf62   :  { %v3263_v50 = vmul.f32 %v3262_v62, %v4533_v55  ;;  %v3272_v14 = vadd.f32 %v3271_v48, %v3270_v20 }
 0xf64   :  { %v3273_v61 = vmul.f32 %v3272_v14, %v4533_v55  ;;  %v3274_v6 = vmul.f32 %v3263_v50, %v3263_v50 }
 0xf66   :  { %v3275_v13 = vsub.f32 %v3273_v61, %v3274_v6 }
 0xf68   :  { %v3276_v26 = vmax.f32 %v3275_v13, 0.0 }
 0xf6a   :  { %v3277_v52 = vadd.f32 1e-05, %v3276_v26 }
 0xf6c   :  { %3732 = vrsqrt.f32 %v3277_v52 }
 0xf76   :  { %v3733_v31 = vpop.eup %3732 }
 0xf77   :  { %v3279_v22 = vmul.f32 %v3733_v31, %v3204_v28 }
 0xf79   :  { %v3280_v32 = vmul.f32 %v3279_v22, %v3263_v50  ;;  %v3285_v25 = vrot.slane %v3279_v22, %v4541_v10 }
 0xf7b   :  { %v3281_v43 = vsub.f32 %v3205_v12, %v3280_v32  ;;  %v3286_v33 = vmul.f32 %v3285_v25, %v3249_v3  ;;  %v3287_v29 = vmul.f32 %v3285_v25, %v3252_v59 }
 0xf7d   :  { %v3291_v51 = vrot.slane %v3281_v43, %v4541_v10 }
 0xf7f   :  { %v3292_v44 = vadd.f32 %v3291_v51, %v3286_v33  ;;  %v3293_v27 = vadd.f32 %v3291_v51, %v3287_v29 }
 0xf81   :  { %v3294_v55 = vsel %vm4512_vm0, %v3292_v44, 0.0  ;;  %v3295_v35 = vsel %vm4516_vm1, %v3293_v27, 0.0 }
 0xf82   :  { %v3523_v46 = vmul.f32 -1.442695, %v3294_v55  ;;  %v3524_v54 = vmul.f32 -1.442695, %v3295_v35 }
 0xf84   :  { %3734 = vpow2.f32 %v3523_v46 }
 0xf85   :  { %3736 = vpow2.f32 %v3524_v54 }
 0xf8e   :  { %v3735_v57 = vpop.eup %3734 }
 0xf8f   :  { %v3737_v45 = vpop.eup %3736  ;;  %v3302_v63 = vadd.f32 1.0, %v3735_v57 }
 0xf90   :  { %v3303_v41 = vadd.f32 1.0, %v3737_v45 }
 0xf91   :  { %3738 = vrcp.f32 %v3302_v63 }
 0xf92   :  { %3740 = vrcp.f32 %v3303_v41 }
 0xf9b   :  { %v3739_v17 = vpop.eup %3738 }
 0xf9c   :  { %v3741_v10 = vpop.eup %3740  ;;  %v3308_v39 = vmul.f32 0.4490731, %v3739_v17 }
 0xf9d   :  { %v3309_v16 = vmul.f32 0.4490731, %v3741_v10 }
 0xf9e   :  { %v3310_v37 = vadd.f32 0.19391795, %v3308_v39 }
 0xf9f   :  { %v3311_v15 = vadd.f32 0.19391795, %v3309_v16 }
 0xfa0   :  { %3312 = vst [vmem:[#allocation32] sm:$0xff] %v3310_v37 }
 0xfa1   :  { %3313 = vst [vmem:[#allocation32 + $0x8] sm:$0xff] %v3311_v15 }
 0xfa2   :  { %4017 = shalt.err (!%p4014_p3)
}
 0xfa3   :  { %s4018_s7 = scalar_lea.hbm %s5269_s22, 256 }
 0xfa4   :  { %p4019_p4 = scmp.ne.s32.totalorder %s5269_s22, %s4018_s7  ;;  %p4022_p5 = scmp.lt.u32.totalorder %s4018_s7, %s5269_s22 }
 0xfa6   :  { %p4024_p6 = pnand %p4022_p5, %p4019_p4 }
 0xfa8   :  { %4027 = shalt.err (!%p4024_p6)
}
 0xfa9   :  { %3325 = dma.vmem_to_hbm [thread:$0]  %s3320_s28, 256, %s5269_s22, [#allocation17], %s4067_s17, %s4067_s17, %s4068_s27  }
 0xfaa   :  { %4060 = dma.done.wait [#allocation17], 256  }
 0xfab   :  { %4061 = vsyncadd [#allocation17], 4294967040 }
 0xfac   :  { %3329 = vsyncpa [#allocation16], 1 }
 0xfad   :  { %3330 = vsyncpa [#allocation19], 1 }
 0xfae   :  { %3331 = vsyncpa [#allocation22], 1 }
 0xfaf   :  { %3332 = vsyncpa [#allocation25], 1 }
 0xfb0   :  { %3333 = vsyncpa [#allocation28], 1 }
 0xfb1   :  { %3334 = vsyncpa [#allocation31], 1 }
 0xfb2   :  { %3335 = vsyncpa [#allocation17], 1 }
 0xfb3   :  { %3336 = vsyncmov [#allocation12] }
 0xfb6   :  { %s3337_s8 = vpop.sfrf %3336 }
 0xfb7   :  { %p3525_p7 = scmp.ne.s32.totalorder %s3337_s8, 0 }
 0xfb9   :  { %3341 = shalt.err (%p3525_p7)  }
 0xfba   :  { %3343 = vsyncmov [#allocation12 + $0x1] }
 0xfbd   :  { %s3344_s14 = vpop.sfrf %3343 }
 0xfbe   :  { %p3526_p8 = scmp.ne.s32.totalorder %s3344_s14, 0 }
 0xfc0   :  { %3348 = shalt.err (%p3526_p8)  }
 0xfc1   :  { %3350 = vsyncmov [#allocation12 + $0x2] }
 0xfc4   :  { %s3351_s13 = vpop.sfrf %3350 }
 0xfc5   :  { %p3527_p9 = scmp.ne.s32.totalorder %s3351_s13, 0 }
 0xfc7   :  { %3355 = shalt.err (%p3527_p9)  }
 0xfc8   :  { %3357 = vsyncmov [#allocation12 + $0x3] }
 0xfcb   :  { %s3358_s22 = vpop.sfrf %3357 }
 0xfcc   :  { %p3528_p10 = scmp.ne.s32.totalorder %s3358_s22, 0 }
 0xfce   :  { %3362 = shalt.err (%p3528_p10)  }
 0xfcf   :  { %3364 = vsyncmov [#allocation12 + $0x4] }
 0xfd2   :  { %s3365_s17 = vpop.sfrf %3364 }
 0xfd3   :  { %p3529_p11 = scmp.ne.s32.totalorder %s3365_s17, 0 }
 0xfd5   :  { %3369 = shalt.err (%p3529_p11)  }
 0xfd6   :  { %3371 = vsyncmov [#allocation12 + $0x5] }
 0xfd9   :  { %s3372_s27 = vpop.sfrf %3371 }
 0xfda   :  { %p3530_p12 = scmp.ne.s32.totalorder %s3372_s27, 0 }
 0xfdc   :  { %3376 = shalt.err (%p3530_p12)  }
 0xfdd   :  { %3378 = vsyncmov [#allocation12 + $0x6] }
 0xfe0   :  { %s3379_s24 = vpop.sfrf %3378 }
 0xfe1   :  { %p3531_p13 = scmp.ne.s32.totalorder %s3379_s24, 0 }
 0xfe3   :  { %3383 = shalt.err (%p3531_p13)  }
 0xfe4   :  { %3385 = vsyncmov [#allocation12 + $0x7] }
 0xfe7   :  { %s3386_s11 = vpop.sfrf %3385 }
 0xfe8   :  { %p3532_p0 = scmp.ne.s32.totalorder %s3386_s11, 0 }
 0xfea   :  { %3390 = shalt.err (%p3532_p0)  }
 0xfeb   :  { %3392 = vsyncmov [#allocation12 + $0x8] }
 0xfee   :  { %s3393_s30 = vpop.sfrf %3392 }
 0xfef   :  { %p3533_p1 = scmp.ne.s32.totalorder %s3393_s30, 0 }
 0xff1   :  { %3397 = shalt.err (%p3533_p1)  }
 0xff2   :  { %3399 = vsyncmov [#allocation12 + $0x9] }
 0xff5   :  { %s3400_s0 = vpop.sfrf %3399 }
 0xff6   :  { %p3534_p2 = scmp.ne.s32.totalorder %s3400_s0, 0 }
 0xff8   :  { %3404 = shalt.err (%p3534_p2)  }

</bundles_post_ra>
